<compile_context>
chip_gen: v5e
topology: v5e:2x2
jax: 0.10.0
libtpu: 0.0.40
codegen_flags: <defaults>
</compile_context>

<pallas_src>
import jax
import jax.numpy as jnp
from jax.experimental import pallas as pl
from jax.experimental.pallas import tpu as pltpu

F_IN = 5964
DIMS = [(F_IN, 512), (512, 256), (256, 64), (64, 2)]
BN_EPS = 1e-5
DEFAULT_TK = 1024   # K tile for fc1 (v7x can prefer 1536-3072; 1024 is safe everywhere)


def _mlp_kernel(x_ref,
                w1_ref, b1_ref,
                w2_ref, b2_ref,
                w3_ref, b3_ref,
                w4_ref, b4_ref,
                o_ref, acc_ref):
    k = pl.program_id(1)

    @pl.when(k == 0)
    def _():
        acc_ref[...] = jnp.zeros_like(acc_ref)

    # fc1 partial product, accumulated over the K (feature) grid axis.
    acc_ref[...] += jnp.dot(x_ref[...], w1_ref[...].astype(jnp.float32),
                            preferred_element_type=jnp.float32)

    @pl.when(k == pl.num_programs(1) - 1)
    def _():
        # fc1 bias + relu  (bn1 folded into fc2; dropout = identity in eval)
        h = jnp.maximum(acc_ref[...] + b1_ref[...], 0.0)
        # fc2 + relu  (bn2 folded into fc3)
        h = jnp.maximum(
            jnp.dot(h, w2_ref[...].astype(jnp.float32),
                    preferred_element_type=jnp.float32) + b2_ref[...], 0.0)
        # fc3 + relu  (bn3 folded into fc4)
        h = jnp.maximum(
            jnp.dot(h, w3_ref[...].astype(jnp.float32),
                    preferred_element_type=jnp.float32) + b3_ref[...], 0.0)
        # fc4 + softmax(dim=1)
        logits = jnp.dot(h, w4_ref[...].astype(jnp.float32),
                         preferred_element_type=jnp.float32) + b4_ref[...]
        m = jnp.max(logits, axis=1, keepdims=True)
        e = jnp.exp(logits - m)
        o_ref[...] = e * pl.reciprocal(jnp.sum(e, axis=1, keepdims=True),
                                       approx=False)


def word_nn_only_forward(x, kernel_params, *, tk=DEFAULT_TK):
    """x: (B, 5964) float32. kernel_params: output of prepare_kernel_params."""
    w1, b1, w2, b2, w3, b3, w4, b4 = kernel_params
    B = x.shape[0]
    f_pad = w1.shape[0]                      # fc1 contraction dim, padded
    assert f_pad % tk == 0 and f_pad % 128 == 0

    # Pad features with zeros to the padded contraction dim (zeros contribute 0).
    if x.shape[1] != f_pad:
        x = jnp.pad(x, ((0, 0), (0, f_pad - x.shape[1])))

    # Pad batch and pick the batch tile (<=128 rows, multiple of 8 sublanes).
    if B <= 128:
        b_pad = -(-B // 8) * 8
        tb = b_pad
    else:
        tb = 128
        b_pad = -(-B // tb) * tb
    if b_pad != B:
        x = jnp.pad(x, ((0, b_pad - B), (0, 0)))

    grid = (b_pad // tb, f_pad // tk)        # (batch tiles, K tiles) — K last

    def const_spec(a):
        return pl.BlockSpec(a.shape, lambda b, k: (0,) * a.ndim)

    in_specs = [
        pl.BlockSpec((tb, tk), lambda b, k: (b, k)),            # x tile
        pl.BlockSpec((tk, w1.shape[1]), lambda b, k: (k, 0)),   # W1 K-slab
        const_spec(b1),
        const_spec(w2), const_spec(b2),
        const_spec(w3), const_spec(b3),
        const_spec(w4), const_spec(b4),
    ]
    out_spec = pl.BlockSpec((tb, 2), lambda b, k: (b, 0))

    out = pl.pallas_call(
        _mlp_kernel,
        out_shape=jax.ShapeDtypeStruct((b_pad, 2), jnp.float32),
        grid_spec=pltpu.PrefetchScalarGridSpec(
            num_scalar_prefetch=0,
            grid=grid,
            in_specs=in_specs,
            out_specs=out_spec,
            scratch_shapes=[pltpu.VMEM((tb, 512), jnp.float32)],  # fc1 accumulator
        ),
        compiler_params=pltpu.CompilerParams(
            dimension_semantics=("parallel", "arbitrary"),
            vmem_limit_bytes=32 * 1024 * 1024,
        ),
    )(x, w1, b1, w2, b2, w3, b3, w4, b4)
    return out[:B]


def init_raw_params(key):
    """PyTorch-default-style params: Linear U(+-1/sqrt(fan_in)), BN at defaults."""
    params = {}
    keys = jax.random.split(key, 2 * len(DIMS))
    for i, (fin, fout) in enumerate(DIMS):
        bound = 1.0 / float(fin) ** 0.5
        params[f"w{i+1}"] = jax.random.uniform(keys[2 * i], (fin, fout),
                                               jnp.float32, -bound, bound)
        params[f"b{i+1}"] = jax.random.uniform(keys[2 * i + 1], (1, fout),
                                               jnp.float32, -bound, bound)
        if i < 3:   # bn1 / bn2 / bn3
            params[f"gamma{i+1}"] = jnp.ones((1, fout), jnp.float32)
            params[f"beta{i+1}"] = jnp.zeros((1, fout), jnp.float32)
            params[f"mean{i+1}"] = jnp.zeros((1, fout), jnp.float32)
            params[f"var{i+1}"] = jnp.ones((1, fout), jnp.float32)
    return params


def prepare_kernel_params(raw, *, tk=DEFAULT_TK, weight_dtype=jnp.bfloat16):
    """Fold eval-mode BN into the next layer, pad fc1's K dim, cast weights to bf16."""
    def bn_affine(i):
        scale = raw[f"gamma{i}"] / jnp.sqrt(raw[f"var{i}"] + BN_EPS)
        shift = raw[f"beta{i}"] - raw[f"mean{i}"] * scale
        return scale, shift

    w1, b1 = raw["w1"], raw["b1"]
    # (relu(xW1+b1)*s + t) @ W2 + b2 == relu(xW1+b1) @ (diag(s) W2) + (b2 + t @ W2)
    s1, t1 = bn_affine(1); w2f = s1.T * raw["w2"]; b2f = raw["b2"] + t1 @ raw["w2"]
    s2, t2 = bn_affine(2); w3f = s2.T * raw["w3"]; b3f = raw["b3"] + t2 @ raw["w3"]
    s3, t3 = bn_affine(3); w4f = s3.T * raw["w4"]; b4f = raw["b4"] + t3 @ raw["w4"]

    f_pad = -(-F_IN // tk) * tk              # lane-aligned, divisible by tk
    w1p = jnp.pad(w1, ((0, f_pad - F_IN), (0, 0)))

    cast = lambda w: w.astype(weight_dtype)
    return (cast(w1p), b1, cast(w2f), b2f, cast(w3f), b3f, cast(w4f), b4f)


def reference_kernel_params(x, kparams):
    """Pure-JAX reference using the exact (folded/padded/bf16) kernel params."""
    w1, b1, w2, b2, w3, b3, w4, b4 = [p.astype(jnp.float32) for p in kparams]
    xp = jnp.pad(x, ((0, 0), (0, w1.shape[0] - x.shape[1])))
    h = jnp.maximum(xp @ w1 + b1, 0.0)
    h = jnp.maximum(h @ w2 + b2, 0.0)
    h = jnp.maximum(h @ w3 + b3, 0.0)
    return jax.nn.softmax(h @ w4 + b4, axis=1)


def reference_eval_f32(x, raw):
    """Pure-JAX f32 reference of the PyTorch module forward (eval mode)."""
    h = x
    for i in range(1, 4):
        h = jnp.maximum(h @ raw[f"w{i}"] + raw[f"b{i}"], 0.0)
        scale = raw[f"gamma{i}"] / jnp.sqrt(raw[f"var{i}"] + BN_EPS)
        shift = raw[f"beta{i}"] - raw[f"mean{i}"] * scale
        h = h * scale + shift
    return jax.nn.softmax(h @ raw["w4"] + raw["b4"], axis=1)


if __name__ == "__main__":
    key = jax.random.PRNGKey(0)
    kx, kp = jax.random.split(key)

    B = 32  # small example batch; feature dim fixed at 5964 by the module
    x = jax.random.normal(kx, (B, F_IN), jnp.float32)

    raw = init_raw_params(kp)
    kparams = prepare_kernel_params(raw)

    out = word_nn_only_forward(x, kparams)
    out = jax.block_until_ready(out)

    assert out.shape == (B, 2)
    ref_exact = reference_kernel_params(x, kparams)     # same folded/bf16 params
    ref_f32 = reference_eval_f32(x, raw)                # full-f32 module semantics
    assert jnp.allclose(out, ref_exact, atol=1e-4, rtol=1e-4), "mismatch vs folded ref"
    assert jnp.allclose(out, ref_f32, atol=5e-3, rtol=5e-3), "mismatch vs f32 module ref"
    assert jnp.allclose(jnp.sum(out, axis=1), 1.0, atol=1e-5), "softmax rows != 1"

    print("KERNEL_OK")
</pallas_src>

<mosaic_0001>
module attributes {stable_mosaic.version = 11 : i64} {
  func.func @_mlp_kernel(%arg0: i32, %arg1: i32, %arg2: memref<32x1024xf32, #tpu.memory_space<vmem>>, %arg3: memref<1024x512xbf16, #tpu.memory_space<vmem>>, %arg4: memref<1x512xf32, #tpu.memory_space<vmem>>, %arg5: memref<512x256xbf16, #tpu.memory_space<vmem>>, %arg6: memref<1x256xf32, #tpu.memory_space<vmem>>, %arg7: memref<256x64xbf16, #tpu.memory_space<vmem>>, %arg8: memref<1x64xf32, #tpu.memory_space<vmem>>, %arg9: memref<64x2xbf16, #tpu.memory_space<vmem>>, %arg10: memref<1x2xf32, #tpu.memory_space<vmem>>, %arg11: memref<32x2xf32, #tpu.memory_space<vmem>>, %arg12: memref<32x512xf32, #tpu.memory_space<vmem>>) attributes {dimension_semantics = [#tpu.dimension_semantics<parallel>, #tpu.dimension_semantics<arbitrary>], iteration_bounds = array<i64: 1, 6>, scalar_prefetch = 0 : i64, scratch_operands = 1 : i64, tpu.core_type = #tpu.core_type<tc>, window_params = [{transform_indices = @transform_0, window_bounds = array<i64: 32, 1024>}, {transform_indices = @transform_1, window_bounds = array<i64: 1024, 512>}, {pipeline_mode = #tpu.pipeline_mode<synchronous>, transform_indices = @transform_2, window_bounds = array<i64: 1, 512>}, {pipeline_mode = #tpu.pipeline_mode<synchronous>, transform_indices = @transform_3, window_bounds = array<i64: 512, 256>}, {pipeline_mode = #tpu.pipeline_mode<synchronous>, transform_indices = @transform_4, window_bounds = array<i64: 1, 256>}, {pipeline_mode = #tpu.pipeline_mode<synchronous>, transform_indices = @transform_5, window_bounds = array<i64: 256, 64>}, {pipeline_mode = #tpu.pipeline_mode<synchronous>, transform_indices = @transform_6, window_bounds = array<i64: 1, 64>}, {pipeline_mode = #tpu.pipeline_mode<synchronous>, transform_indices = @transform_7, window_bounds = array<i64: 64, 2>}, {pipeline_mode = #tpu.pipeline_mode<synchronous>, transform_indices = @transform_8, window_bounds = array<i64: 1, 2>}, {transform_indices = @transform_9, window_bounds = array<i64: 32, 2>}]} {
    %c0_i32 = arith.constant 0 : i32
    %0 = arith.cmpi eq, %arg1, %c0_i32 : i32
    %1 = arith.extui %0 : i1 to i32
    %c0_i32_0 = arith.constant 0 : i32
    %2 = arith.cmpi ne, %1, %c0_i32_0 : i32
    scf.if %2 {
      %cst_9 = arith.constant 0.000000e+00 : f32
      %13 = vector.broadcast %cst_9 : f32 to vector<32x512xf32>
      %c0_10 = arith.constant 0 : index
      %c0_11 = arith.constant 0 : index
      %14 = vector.load %arg12[%c0_10, %c0_11] : memref<32x512xf32, #tpu.memory_space<vmem>>, vector<32x512xf32>
      tpu.vector_store %arg12[%c0_10, %c0_11], %13 {strides = array<i32>} : memref<32x512xf32, #tpu.memory_space<vmem>>, vector<32x512xf32>,
    } else {
    }
    %c0 = arith.constant 0 : index
    %c0_1 = arith.constant 0 : index
    %3 = vector.load %arg12[%c0, %c0_1] : memref<32x512xf32, #tpu.memory_space<vmem>>, vector<32x512xf32>
    %c0_2 = arith.constant 0 : index
    %c0_3 = arith.constant 0 : index
    %4 = vector.load %arg2[%c0_2, %c0_3] : memref<32x1024xf32, #tpu.memory_space<vmem>>, vector<32x1024xf32>
    %c0_4 = arith.constant 0 : index
    %c0_5 = arith.constant 0 : index
    %5 = vector.load %arg3[%c0_4, %c0_5] : memref<1024x512xbf16, #tpu.memory_space<vmem>>, vector<1024x512xbf16>
    %6 = arith.extf %5 : vector<1024x512xbf16> to vector<1024x512xf32>
    %cst = arith.constant dense<0.000000e+00> : vector<32x512xf32>
    %7 = tpu.matmul %4, %6, %cst {dimension_numbers = #tpu.dot_dimension_numbers<[1], [0], [0], [1], [0, 0, 1, 1], [], []>} : vector<32x1024xf32>, vector<1024x512xf32>, vector<32x512xf32> -> vector<32x512xf32>
    %8 = arith.addf %3, %7 : vector<32x512xf32>
    %c0_6 = arith.constant 0 : index
    %c0_7 = arith.constant 0 : index
    %9 = vector.load %arg12[%c0_6, %c0_7] : memref<32x512xf32, #tpu.memory_space<vmem>>, vector<32x512xf32>
    tpu.vector_store %arg12[%c0_6, %c0_7], %8 {strides = array<i32>} : memref<32x512xf32, #tpu.memory_space<vmem>>, vector<32x512xf32>,
    %c5_i32 = arith.constant 5 : i32
    %10 = arith.cmpi eq, %arg1, %c5_i32 : i32
    %11 = arith.extui %10 : i1 to i32
    %c0_i32_8 = arith.constant 0 : i32
    %12 = arith.cmpi ne, %11, %c0_i32_8 : i32
    scf.if %12 {
      %c0_9 = arith.constant 0 : index
      %c0_10 = arith.constant 0 : index
      %13 = vector.load %arg12[%c0_9, %c0_10] : memref<32x512xf32, #tpu.memory_space<vmem>>, vector<32x512xf32>
      %c0_11 = arith.constant 0 : index
      %c0_12 = arith.constant 0 : index
      %14 = vector.load %arg4[%c0_11, %c0_12] : memref<1x512xf32, #tpu.memory_space<vmem>>, vector<1x512xf32>
      %15 = vector.broadcast %14 : vector<1x512xf32> to vector<32x512xf32>
      %16 = arith.addf %13, %15 : vector<32x512xf32>
      %cst_13 = arith.constant 0.000000e+00 : f32
      %17 = vector.broadcast %cst_13 : f32 to vector<32x512xf32>
      %18 = arith.maximumf %16, %17 : vector<32x512xf32>
      %c0_14 = arith.constant 0 : index
      %c0_15 = arith.constant 0 : index
      %19 = vector.load %arg5[%c0_14, %c0_15] : memref<512x256xbf16, #tpu.memory_space<vmem>>, vector<512x256xbf16>
      %20 = arith.extf %19 : vector<512x256xbf16> to vector<512x256xf32>
      %cst_16 = arith.constant dense<0.000000e+00> : vector<32x256xf32>
      %21 = tpu.matmul %18, %20, %cst_16 {dimension_numbers = #tpu.dot_dimension_numbers<[1], [0], [0], [1], [0, 0, 1, 1], [], []>} : vector<32x512xf32>, vector<512x256xf32>, vector<32x256xf32> -> vector<32x256xf32>
      %c0_17 = arith.constant 0 : index
      %c0_18 = arith.constant 0 : index
      %22 = vector.load %arg6[%c0_17, %c0_18] : memref<1x256xf32, #tpu.memory_space<vmem>>, vector<1x256xf32>
      %23 = vector.broadcast %22 : vector<1x256xf32> to vector<32x256xf32>
      %24 = arith.addf %21, %23 : vector<32x256xf32>
      %cst_19 = arith.constant 0.000000e+00 : f32
      %25 = vector.broadcast %cst_19 : f32 to vector<32x256xf32>
      %26 = arith.maximumf %24, %25 : vector<32x256xf32>
      %c0_20 = arith.constant 0 : index
      %c0_21 = arith.constant 0 : index
      %27 = vector.load %arg7[%c0_20, %c0_21] : memref<256x64xbf16, #tpu.memory_space<vmem>>, vector<256x64xbf16>
      %28 = arith.extf %27 : vector<256x64xbf16> to vector<256x64xf32>
      %cst_22 = arith.constant dense<0.000000e+00> : vector<32x64xf32>
      %29 = tpu.matmul %26, %28, %cst_22 {dimension_numbers = #tpu.dot_dimension_numbers<[1], [0], [0], [1], [0, 0, 1, 1], [], []>} : vector<32x256xf32>, vector<256x64xf32>, vector<32x64xf32> -> vector<32x64xf32>
      %c0_23 = arith.constant 0 : index
      %c0_24 = arith.constant 0 : index
      %30 = vector.load %arg8[%c0_23, %c0_24] : memref<1x64xf32, #tpu.memory_space<vmem>>, vector<1x64xf32>
      %31 = vector.broadcast %30 : vector<1x64xf32> to vector<32x64xf32>
      %32 = arith.addf %29, %31 : vector<32x64xf32>
      %cst_25 = arith.constant 0.000000e+00 : f32
      %33 = vector.broadcast %cst_25 : f32 to vector<32x64xf32>
      %34 = arith.maximumf %32, %33 : vector<32x64xf32>
      %c0_26 = arith.constant 0 : index
      %c0_27 = arith.constant 0 : index
      %35 = vector.load %arg9[%c0_26, %c0_27] : memref<64x2xbf16, #tpu.memory_space<vmem>>, vector<64x2xbf16>
      %36 = arith.extf %35 : vector<64x2xbf16> to vector<64x2xf32>
      %cst_28 = arith.constant dense<0.000000e+00> : vector<32x2xf32>
      %37 = tpu.matmul %34, %36, %cst_28 {dimension_numbers = #tpu.dot_dimension_numbers<[1], [0], [0], [1], [0, 0, 1, 1], [], []>} : vector<32x64xf32>, vector<64x2xf32>, vector<32x2xf32> -> vector<32x2xf32>
      %c0_29 = arith.constant 0 : index
      %c0_30 = arith.constant 0 : index
      %38 = vector.load %arg10[%c0_29, %c0_30] : memref<1x2xf32, #tpu.memory_space<vmem>>, vector<1x2xf32>
      %39 = vector.broadcast %38 : vector<1x2xf32> to vector<32x2xf32>
      %40 = arith.addf %37, %39 : vector<32x2xf32>
      %cst_31 = arith.constant dense<0xFF800000> : vector<32xf32>
      %41 = vector.multi_reduction <maximumf>, %40, %cst_31 [1] : vector<32x2xf32> to vector<32xf32>
      %42 = vector.shape_cast %41 : vector<32xf32> to vector<32x1xf32>
      %43 = vector.broadcast %42 : vector<32x1xf32> to vector<32x2xf32>
      %44 = arith.subf %40, %43 : vector<32x2xf32>
      %45 = math.exp %44 : vector<32x2xf32>
      %cst_32 = arith.constant dense<0.000000e+00> : vector<32xf32>
      %46 = vector.multi_reduction <add>, %45, %cst_32 [1] : vector<32x2xf32> to vector<32xf32>
      %47 = vector.shape_cast %46 : vector<32xf32> to vector<32x1xf32>
      %48 = tpu.reciprocal %47 : vector<32x1xf32> -> vector<32x1xf32>
      %49 = vector.broadcast %48 : vector<32x1xf32> to vector<32x2xf32>
      %50 = arith.mulf %45, %49 : vector<32x2xf32>
      %c0_33 = arith.constant 0 : index
      %c0_34 = arith.constant 0 : index
      %51 = vector.load %arg11[%c0_33, %c0_34] : memref<32x2xf32, #tpu.memory_space<vmem>>, vector<32x2xf32>
      tpu.vector_store %arg11[%c0_33, %c0_34], %50 {strides = array<i32>} : memref<32x2xf32, #tpu.memory_space<vmem>>, vector<32x2xf32>,
    } else {
    }
    return
  }
  func.func @transform_0(%arg0: i32, %arg1: i32) -> (i32, i32) {
    %c0_i32 = arith.constant 0 : i32
    return %arg0, %arg1 : i32, i32
  }
  func.func @transform_1(%arg0: i32, %arg1: i32) -> (i32, i32) {
    %c0_i32 = arith.constant 0 : i32
    %c0_i32_0 = arith.constant 0 : i32
    return %arg1, %c0_i32 : i32, i32
  }
  func.func @transform_2(%arg0: i32, %arg1: i32) -> (i32, i32) {
    %c0_i32 = arith.constant 0 : i32
    %c0_i32_0 = arith.constant 0 : i32
    %c0_i32_1 = arith.constant 0 : i32
    return %c0_i32, %c0_i32_0 : i32, i32
  }
  func.func @transform_3(%arg0: i32, %arg1: i32) -> (i32, i32) {
    %c0_i32 = arith.constant 0 : i32
    %c0_i32_0 = arith.constant 0 : i32
    %c0_i32_1 = arith.constant 0 : i32
    return %c0_i32, %c0_i32_0 : i32, i32
  }
  func.func @transform_4(%arg0: i32, %arg1: i32) -> (i32, i32) {
    %c0_i32 = arith.constant 0 : i32
    %c0_i32_0 = arith.constant 0 : i32
    %c0_i32_1 = arith.constant 0 : i32
    return %c0_i32, %c0_i32_0 : i32, i32
  }
  func.func @transform_5(%arg0: i32, %arg1: i32) -> (i32, i32) {
    %c0_i32 = arith.constant 0 : i32
    %c0_i32_0 = arith.constant 0 : i32
    %c0_i32_1 = arith.constant 0 : i32
    return %c0_i32, %c0_i32_0 : i32, i32
  }
  func.func @transform_6(%arg0: i32, %arg1: i32) -> (i32, i32) {
    %c0_i32 = arith.constant 0 : i32
    %c0_i32_0 = arith.constant 0 : i32
    %c0_i32_1 = arith.constant 0 : i32
    return %c0_i32, %c0_i32_0 : i32, i32
  }
  func.func @transform_7(%arg0: i32, %arg1: i32) -> (i32, i32) {
    %c0_i32 = arith.constant 0 : i32
    %c0_i32_0 = arith.constant 0 : i32
    %c0_i32_1 = arith.constant 0 : i32
    return %c0_i32, %c0_i32_0 : i32, i32
  }
  func.func @transform_8(%arg0: i32, %arg1: i32) -> (i32, i32) {
    %c0_i32 = arith.constant 0 : i32
    %c0_i32_0 = arith.constant 0 : i32
    %c0_i32_1 = arith.constant 0 : i32
    return %c0_i32, %c0_i32_0 : i32, i32
  }
  func.func @transform_9(%arg0: i32, %arg1: i32) -> (i32, i32) {
    %c0_i32 = arith.constant 0 : i32
    %c0_i32_0 = arith.constant 0 : i32
    return %arg0, %c0_i32 : i32, i32
  }
}

</mosaic_0001>

<bundles_post_ra>
// kernel: tpu_custom_call.1
= control target key start
LH: loop header
LB: loop body
LE: loop exit
PB: predicated region body
PF: predicated region fallthrough
CT: control target
= control target key end

     0   :  { %s6245_s0 = inlined_call_operand.hbm [shape: f32[32,6144], index: 0, kind: input, shape index: {}]   ;;  %s6246_s1 = inlined_call_operand.hbm [shape: bf16[6144,512], index: 1, kind: input, shape index: {}]   ;;  %s6247_s2 = inlined_call_operand.hbm [shape: f32[1,512], index: 2, kind: input, shape index: {}]   ;;  %s6248_s3 = inlined_call_operand.hbm [shape: bf16[512,256], index: 3, kind: input, shape index: {}]   ;;  %s6249_s4 = inlined_call_operand.hbm [shape: f32[1,256], index: 4, kind: input, shape index: {}]   ;;  %s6250_s5 = inlined_call_operand.vmem [shape: bf16[256,64], index: 5, kind: input, shape index: {}]   ;;  %s6251_s6 = inlined_call_operand.hbm [shape: f32[1,64], index: 6, kind: input, shape index: {}]   ;;  %s6252_s7 = inlined_call_operand.vmem [shape: bf16[64,2], index: 7, kind: input, shape index: {}]   ;;  %s6253_s8 = inlined_call_operand.hbm [shape: f32[1,2], index: 8, kind: input, shape index: {}]   ;;  %s6254_s9 = inlined_call_operand.vmem [shape: f32[32,2], index: 9, kind: output, shape index: {}]  }
   0x1   :  { %6475 = sst [smem:[#allocation145_spill]] %s6245_s0 }
   0x2   :  { %6476 = sst [smem:[#allocation146_spill]] %s6247_s2 }
   0x3   :  { %6477 = sst [smem:[#allocation147_spill]] %s6248_s3 }
   0x4   :  { %6478 = sst [smem:[#allocation148_spill]] %s6249_s4 }
   0x5   :  { %6479 = sst [smem:[#allocation149_spill]] %s6251_s6 }
   0x6   :  { %6480 = sst [smem:[#allocation150_spill]] %s6253_s8 }
   0x7   :  { %14 = vsyncpa [#allocation4], 0 }
   0x8   :  { %16 = vsyncpa [#allocation4 + $0x1], 0 }
   0x9   :  { %17 = vsyncpa [#allocation6], 0 }
   0xa   :  { %19 = vsyncpa [#allocation6 + $0x1], 0 }
   0xb   :  { %20 = vsyncpa [#allocation9], 0 }
   0xc   :  { %21 = vsyncpa [#allocation12], 0  ;;  %s3888_s30 = smov 0   ;;  %s3890_s10 = smov 0  }
   0xd   :  { %s3892_s11 = smov 0   ;;  %s3894_s12 = smov 0  }
   0xe   :  { %s3896_s13 = smov 0   ;;  %s3898_s14 = smov 0  }
   0xf LB: > { %6481 = sst [smem:[#allocation19_spill]] %s3811_s11  ;;  %s6255_s15 = sadd.s32 4294967295, %s3823_s14   ;;  %s3823_s14 = sphi %s3898_s14, %s27_s14   ;;  %s3819_s13 = sphi %s3896_s13, %s6937_s13   ;;  %s3815_s12 = sphi %s3894_s12, %s6936_s12   ;;  %s3811_s11 = sphi %s3892_s11, %s6932_s11   ;;  %s3807_s10 = sphi %s3890_s10, %s6935_s10   ;;  %s3803_s30 = sphi %s3888_s30, %s6934_s30  }
  0x10   : > { %p61_p0 = scmp.ne.s32.totalorder %s3807_s10, %s3803_s30  ;;  %p3920_p1 = scmp.eq.s32.totalorder %s6255_s15, 0 }
  0x11   : > { %p3229_p2 = scmp.ge.s32.totalorder %s3823_s14, 1  ;;  %p271_p3 = scmp.lt.s32.totalorder %s3823_s14, 7 }
  0x12   : > { %p3928_p4 = por %p3920_p1, %p61_p0  ;;  %s6484_s2 = sld [smem:[#allocation146_spill]] }
  0x13   : > { %p3935_p5 = pnand %p3229_p2, %p271_p3  ;;  %s3825_s22 = smov [#allocation7]  }
  0x14   : > { %s285_s23 = sshll.u32 %s3825_s22, 4  ;;  %s6486_s3 = sld [smem:[#allocation147_spill]]  ;;  %s286_s23 = int_to_ptr.vmem [resolvable:$true] %s285_s23 }
  0x15   : > { %p3402_p6 = pneg %p3935_p5  ;;  %s3826_s28 = smov [#allocation8]  }
  0x16   : > { %s296_s29 = sshll.u32 %s3826_s28, 4  ;;  %s3827_s30 = smov 128   ;;  %s297_s29 = int_to_ptr.vmem [resolvable:$true] %s296_s29 }
  0x17   : > { %p3946_p7 = pnand %p3402_p6, %p3920_p1  ;;  %s3828_s18 = smov 8  }
  0x18   : > { %s283_s20 = sshll.u32 %s6484_s2, 4  ;;  %s6488_s6 = sld [smem:[#allocation149_spill]]  ;;  %s284_s20 = int_to_ptr.hbm [resolvable:$true] %s283_s20 }
  0x19   : > { %3405 = dma.hbm_to_vmem [thread:$0]  (!%p3946_p7), %s284_s20, 64, %s286_s23, [#allocation6]  }
  0x1a   : > { %s294_s26 = sshll.u32 %s6486_s3, 4  ;;  %s3829_s25 = smov [#allocation11]   ;;  %s295_s26 = int_to_ptr.hbm [resolvable:$true] %s294_s26 }
  0x1b   : > { %3408 = dma.hbm_to_vmem [thread:$0]  (!%p3946_p7), %s295_s26, 8192, %s297_s29, [#allocation9], %s3827_s30, %s3827_s30, %s3828_s18  }
  0x1c   : > { %s326_s15 = sshll.u32 %s3829_s25, 4  ;;  %s6489_s4 = sld [smem:[#allocation148_spill]]  ;;  %s327_s15 = int_to_ptr.vmem [resolvable:$true] %s326_s15 }
  0x1d   : > { %s3830_s23 = smov [#allocation10]   ;;  %s6490_s8 = sld [smem:[#allocation150_spill]] }
  0x1e   : > { %s324_s24 = sshll.u32 %s6488_s6, 4  ;;  %s311_s26 = sshll.u32 %s3830_s23, 4  ;;  %s325_s24 = int_to_ptr.hbm [resolvable:$true] %s324_s24  ;;  %s312_s26 = int_to_ptr.vmem [resolvable:$true] %s311_s26 }
  0x1f   : > { %3414 = dma.hbm_to_vmem [thread:$0]  (!%p3946_p7), %s325_s24, 16, %s327_s15, [#allocation12]  }
  0x20   : > { %s3831_s2 = smov [#allocation13]   ;;  %s36_s15 = sadd.s32 1, %s3819_s13 }
  0x21   : > { %s341_s19 = sshll.u32 %s3831_s2, 4  ;;  %p37_p8 = scmp.ge.s32.totalorder %s36_s15, 6  ;;  %s342_s19 = int_to_ptr.vmem [resolvable:$true] %s341_s19 }
  0x22   : > { %s309_s20 = sshll.u32 %s6489_s4, 4  ;;  %s48_s22 = sadd.s32 1, %s3811_s11  ;;  %s310_s20 = int_to_ptr.hbm [resolvable:$true] %s309_s20 }
  0x23   : > { %s339_s18 = sshll.u32 %s6490_s8, 4  ;;  %p55_p9 = scmp.ne.s32.totalorder %s3811_s11, %s3807_s10  ;;  %s340_s18 = int_to_ptr.hbm [resolvable:$true] %s339_s18 }
  0x24   : > { %3411 = dma.hbm_to_vmem [thread:$0]  (!%p3946_p7), %s310_s20, 32, %s312_s26, [#allocation9]  }
  0x25   : > { %3417 = dma.hbm_to_vmem [thread:$0]  (!%p3946_p7), %s340_s18, 16, %s342_s19, [#allocation12]  }
  0x26   : > { %p56_p10 = scmp.eq.s32.totalorder %s3823_s14, 0  ;;  %s6939_s15 = smov (%p37_p8, %s36_s15), 0 }
  0x27   : > { %6491 = sst [smem:[#allocation20_spill]] %s6939_s15  ;;  %p3430_p12 = scmp.lt.s32.totalorder %s3823_s14, 6 }
  0x28   : > { %p3976_p11 = por %p56_p10, %p55_p9  ;;  %s44_s25 = ssub.s32 %s3819_s13, %s6939_s15 }
  0x29   : > { %s352_s28 = sand.u32 1, %s3811_s11   ;;  %p46_p13 = scmp.eq.s32.totalorder %s44_s25, 0 }
  0x2a   : > { %s3236_s27 = sshll.u32 %s352_s28, 8  ;;  %s3261_s20 = sshll.u32 %s3819_s13, 6 }
  0x2b   : > { %s3986_s23 = scalar_select %p46_p13, %s3811_s11, %s48_s22  }
  0x2c   : > { %s6494_s0 = sld [smem:[#allocation145_spill]]  ;;  %s356_s2 = scalar_lea.vmem [#allocation3], %s3236_s27 }
  0x2d   : > { %6493 = sst [smem:[#allocation21_spill]] %s3986_s23  ;;  %s367_s19 = sshll.u32 %s356_s2, 4  ;;  %s368_s19 = int_to_ptr.vmem [resolvable:$true] %s367_s19 }
  0x2e   : > { %p3995_p0 = pnand %p3430_p12, %p3976_p11  ;;  %s377_s25 = sand.u32 1, %s3823_s14  }
  0x2f   : > { %s353_s4 = scalar_lea.sflag [#allocation4], %s352_s28  ;;  %s3832_s22 = smov 6144  }
  0x30   : > { %s3833_s6 = smov 1024   ;;  %s3834_s8 = smov 64  }
  0x31   : > { %s3263_s27 = sshll.u32 %s3819_s13, 11  ;;  %s378_s15 = scalar_lea.sflag [#allocation6], %s377_s25 }
  0x32   : > { %s364_s30 = scalar_lea.hbm %s6494_s0, %s3261_s20  ;;  %s3239_s20 = sshll.u32 %s352_s28, 11 }
  0x33   : > { %s365_s18 = sshll.u32 %s364_s30, 4  ;;  %s387_s24 = scalar_lea.hbm %s6246_s1, %s3263_s27  ;;  %s366_s18 = int_to_ptr.hbm [resolvable:$true] %s365_s18 }
  0x34   : > { %3421 = dma.hbm_to_vmem [thread:$0]  (!%p3995_p0), %s366_s18, 4096, %s368_s19, %s353_s4, %s3832_s22, %s3833_s6, %s3834_s8  }
  0x35   : > { %s381_s30 = scalar_lea.vmem [#allocation5], %s3239_s20  ;;  %s388_s0 = sshll.u32 %s387_s24, 4  ;;  %s389_s0 = int_to_ptr.hbm [resolvable:$true] %s388_s0 }
  0x36   : > { %s390_s2 = sshll.u32 %s381_s30, 4  ;;  %s3835_s23 = smov 256   ;;  %s391_s2 = int_to_ptr.vmem [resolvable:$true] %s390_s2 }
  0x37   : > { %s3836_s11 = smov 16   ;;  %402 = sbr.rel (%p3935_p5) target bundleno = 1414 (0x586), region = 56 }
  0x38   : > { %3424 = dma.hbm_to_vmem [thread:$0]  (!%p3995_p0), %s389_s0, 32768, %s391_s2, %s378_s15, %s3835_s23, %s3835_s23, %s3836_s11  }
  0x3c   : > { %s404_s4 = sand.u32 1, %s3807_s10  }
  0x3d   : > { %s3244_s6 = sshll.u32 %s404_s4, 8  ;;  %s405_s8 = scalar_lea.sflag [#allocation4], %s404_s4 }
  0x3e   : > { %s4011_s28 = scalar_lea.vmem [#allocation3], %s3244_s6 }
  0x3f   : > { %3782 = dma.done.wait (%p3928_p4), %s405_s8, 4096  }
  0x40   : > { %3784 = vsyncadd (%p3928_p4), %s405_s8, 4294963200  ;;  %s6496_s18 = sadd.s32 4294967295, %s3823_s14   ;;  %s3245_s0 = sshll.u32 %s404_s4, 11 }
  0x41   : > { %s414_s3 = sand.u32 1, %s6496_s18   ;;  %s4019_s21 = scalar_lea.vmem [#allocation5], %s3245_s0 }
  0x42   : > { %s415_s11 = scalar_lea.sflag [#allocation6], %s414_s3 }
  0x43   : > { %3786 = dma.done.wait (%p3928_p4), %s415_s11, 32768  }
  0x44   : > { %3788 = vsyncadd (%p3928_p4), %s415_s11, 4294934528 }
  0x45   : > { %3790 = dma.done.wait (%p3920_p1), [#allocation6], 64  }
  0x46   : > { %3792 = vsyncadd (%p3920_p1), [#allocation6], 4294967232 }
  0x47   : > { %3794 = dma.done.wait (%p3920_p1), [#allocation9], 8224  }
  0x48   : > { %3796 = vsyncadd (%p3920_p1), [#allocation9], 4294959072 }
  0x49   : > { %3798 = dma.done.wait (%p3920_p1), [#allocation12], 32  }
  0x4a   : > { %3800 = vsyncadd (%p3920_p1), [#allocation12], 4294967264  ;;  %p3251_p2 = scmp.ne.s32.totalorder %s3815_s12, 0 }
  0x4c   : > { %496 = sbr.rel (%p3251_p2) target bundleno = 98 (0x62), region = 88 }
  0x51   : > { %v3837_v0 = vmov 0.0  }
  0x52   : > { %497 = vst [vmem:[#allocation2 + $0x30] sm:$0xff] %v3837_v0 }
  0x53   : > { %498 = vst [vmem:[#allocation2] sm:$0xff] %v3837_v0 }
  0x54   : > { %499 = vst [vmem:[#allocation2 + $0x58] sm:$0xff] %v3837_v0 }
  0x55   : > { %500 = vst [vmem:[#allocation2 + $0x18] sm:$0xff] %v3837_v0 }
  0x56   : > { %501 = vst [vmem:[#allocation2 + $0x50] sm:$0xff] %v3837_v0 }
  0x57   : > { %502 = vst [vmem:[#allocation2 + $0x68] sm:$0xff] %v3837_v0 }
  0x58   : > { %503 = vst [vmem:[#allocation2 + $0x8] sm:$0xff] %v3837_v0 }
  0x59   : > { %504 = vst [vmem:[#allocation2 + $0x48] sm:$0xff] %v3837_v0 }
  0x5a   : > { %505 = vst [vmem:[#allocation2 + $0x40] sm:$0xff] %v3837_v0 }
  0x5b   : > { %506 = vst [vmem:[#allocation2 + $0x20] sm:$0xff] %v3837_v0 }
  0x5c   : > { %507 = vst [vmem:[#allocation2 + $0x10] sm:$0xff] %v3837_v0 }
  0x5d   : > { %508 = vst [vmem:[#allocation2 + $0x38] sm:$0xff] %v3837_v0 }
  0x5e   : > { %509 = vst [vmem:[#allocation2 + $0x60] sm:$0xff] %v3837_v0 }
  0x5f   : > { %510 = vst [vmem:[#allocation2 + $0x70] sm:$0xff] %v3837_v0 }
  0x60   : > { %511 = vst [vmem:[#allocation2 + $0x78] sm:$0xff] %v3837_v0 }
  0x61   : > { %512 = vst [vmem:[#allocation2 + $0x28] sm:$0xff] %v3837_v0 }
  0x62 PF: > { %v4039_v1 = vld [vmem:[%s4019_s21 + $0xf0] sm:$0xff]  ;;  %v4045_v3 = vld [vmem:[%s4019_s21 + $0xe0] sm:$0xff]  ;;  %p3252_p1 = scmp.ne.s32.totalorder %s3815_s12, 5 }
  0x63   : > { %v4042_v2 = vld [vmem:[%s4019_s21 + $0x2f0] sm:$0xff]  ;;  %v877_v4 = vunpack.c.l.bf16 %v4039_v1  ;;  %v4053_v7 = vld [vmem:[%s4019_s21 + $0x2e0] sm:$0xff]  ;;  %v873_v9 = vunpack.c.l.bf16 %v4045_v3 }
  0x64   : > { %v1005_v5 = vunpack.c.l.bf16 %v4042_v2  ;;  %v4050_v6 = vld [vmem:[%s4019_s21 + $0x1f0] sm:$0xff]  ;;  %v4064_v12 = vld [vmem:[%s4019_s21 + $0x1e0] sm:$0xff]  ;;  %v1001_v14 = vunpack.c.l.bf16 %v4053_v7 }
  0x65   : > { %v4056_v8 = vld [vmem:[%s4019_s21 + $0x3f0] sm:$0xff]  ;;  %v941_v10 = vunpack.c.l.bf16 %v4050_v6  ;;  %1329 = vmatpush.msra.mxu0 %v877_v4  ;;  %v4072_v16 = vld [vmem:[%s4019_s21 + $0x3e0] sm:$0xff]  ;;  %v937_v20 = vunpack.c.l.bf16 %v4064_v12 }
  0x66   : > { %v4061_v11 = vld [vmem:[%s4019_s21 + $0xd0] sm:$0xff]  ;;  %1387 = vmatpush.msra.mxu2 %v1005_v5  ;;  %v1069_v15 = vunpack.c.l.bf16 %v4056_v8  ;;  %v4075_v17 = vld [vmem:[%s4019_s21 + $0xc0] sm:$0xff]  ;;  %v1065_v24 = vunpack.c.l.bf16 %v4072_v16 }
  0x67   : > { %v4067_v13 = vld [vmem:[%s4019_s21 + $0x2d0] sm:$0xff]  ;;  %1358 = vmatpush.msra.mxu1 %v941_v10  ;;  %v869_v19 = vunpack.c.l.bf16 %v4061_v11  ;;  %v4083_v21 = vld [vmem:[%s4019_s21 + $0x2c0] sm:$0xff]  ;;  %1330 = vmatpush.msra.mxu0 %v873_v9  ;;  %v865_v27 = vunpack.c.l.bf16 %v4075_v17 }
  0x68   : > { %v4078_v18 = vld [vmem:[%s4019_s21 + $0x1d0] sm:$0xff]  ;;  %1388 = vmatpush.msra.mxu2 %v1001_v14  ;;  %v997_v23 = vunpack.c.l.bf16 %v4067_v13  ;;  %v4094_v26 = vld [vmem:[%s4019_s21 + $0x1c0] sm:$0xff]  ;;  %1416 = vmatpush.msra.mxu3 %v1069_v15  ;;  %v993_v31 = vunpack.c.l.bf16 %v4083_v21 }
  0x69   : > { %v4086_v22 = vld [vmem:[%s4019_s21 + $0x3d0] sm:$0xff]  ;;  %1359 = vmatpush.msra.mxu1 %v937_v20  ;;  %v933_v28 = vunpack.c.l.bf16 %v4078_v18  ;;  %v4102_v30 = vld [vmem:[%s4019_s21 + $0x3c0] sm:$0xff]  ;;  %1331 = vmatpush.msra.mxu0 %v869_v19  ;;  %v929_v36 = vunpack.c.l.bf16 %v4094_v26 }
  0x6a   : > { %v4091_v25 = vld [vmem:[%s4019_s21 + $0xb0] sm:$0xff]  ;;  %1389 = vmatpush.msra.mxu2 %v997_v23  ;;  %v1061_v32 = vunpack.c.l.bf16 %v4086_v22  ;;  %v4107_v33 = vld [vmem:[%s4019_s21 + $0xa0] sm:$0xff]  ;;  %1417 = vmatpush.msra.mxu3 %v1065_v24  ;;  %v1057_v40 = vunpack.c.l.bf16 %v4102_v30 }
  0x6b   : > { %v4099_v29 = vld [vmem:[%s4019_s21 + $0x2b0] sm:$0xff]  ;;  %1360 = vmatpush.msra.mxu1 %v933_v28  ;;  %v861_v35 = vunpack.c.l.bf16 %v4091_v25  ;;  %v4115_v37 = vld [vmem:[%s4019_s21 + $0x2a0] sm:$0xff]  ;;  %1332 = vmatpush.msra.mxu0 %v865_v27  ;;  %v857_v43 = vunpack.c.l.bf16 %v4107_v33 }
  0x6c   : > { %v4110_v34 = vld [vmem:[%s4019_s21 + $0x1b0] sm:$0xff]  ;;  %1390 = vmatpush.msra.mxu2 %v993_v31  ;;  %v989_v39 = vunpack.c.l.bf16 %v4099_v29  ;;  %v4126_v42 = vld [vmem:[%s4019_s21 + $0x1a0] sm:$0xff]  ;;  %1418 = vmatpush.msra.mxu3 %v1061_v32  ;;  %v985_v47 = vunpack.c.l.bf16 %v4115_v37 }
  0x6d   : > { %v4118_v38 = vld [vmem:[%s4019_s21 + $0x3b0] sm:$0xff]  ;;  %1361 = vmatpush.msra.mxu1 %v929_v36  ;;  %v925_v44 = vunpack.c.l.bf16 %v4110_v34  ;;  %v4134_v46 = vld [vmem:[%s4019_s21 + $0x3a0] sm:$0xff]  ;;  %1333 = vmatpush.msra.mxu0 %v861_v35  ;;  %v921_v52 = vunpack.c.l.bf16 %v4126_v42 }
  0x6e   : > { %v4123_v41 = vld [vmem:[%s4019_s21 + $0x90] sm:$0xff]  ;;  %1391 = vmatpush.msra.mxu2 %v989_v39  ;;  %v1053_v48 = vunpack.c.l.bf16 %v4118_v38  ;;  %v4139_v49 = vld [vmem:[%s4019_s21 + $0x80] sm:$0xff]  ;;  %1419 = vmatpush.msra.mxu3 %v1057_v40  ;;  %v1049_v56 = vunpack.c.l.bf16 %v4134_v46 }
  0x6f   : > { %v4131_v45 = vld [vmem:[%s4019_s21 + $0x290] sm:$0xff]  ;;  %1362 = vmatpush.msra.mxu1 %v925_v44  ;;  %v853_v51 = vunpack.c.l.bf16 %v4123_v41  ;;  %v4147_v53 = vld [vmem:[%s4019_s21 + $0x280] sm:$0xff]  ;;  %1334 = vmatpush.msra.mxu0 %v857_v43  ;;  %v849_v59 = vunpack.c.l.bf16 %v4139_v49 }
  0x70   : > { %v4142_v50 = vld [vmem:[%s4019_s21 + $0x190] sm:$0xff]  ;;  %1392 = vmatpush.msra.mxu2 %v985_v47  ;;  %v981_v55 = vunpack.c.l.bf16 %v4131_v45  ;;  %v4158_v58 = vld [vmem:[%s4019_s21 + $0x180] sm:$0xff]  ;;  %1420 = vmatpush.msra.mxu3 %v1053_v48  ;;  %v977_v63 = vunpack.c.l.bf16 %v4147_v53 }
  0x71   : > { %v4150_v54 = vld [vmem:[%s4019_s21 + $0x390] sm:$0xff]  ;;  %1363 = vmatpush.msra.mxu1 %v921_v52  ;;  %v917_v60 = vunpack.c.l.bf16 %v4142_v50  ;;  %v4166_v62 = vld [vmem:[%s4019_s21 + $0x380] sm:$0xff]  ;;  %1335 = vmatpush.msra.mxu0 %v853_v51  ;;  %v913_v10 = vunpack.c.l.bf16 %v4158_v58 }
  0x72   : > { %v4155_v57 = vld [vmem:[%s4019_s21 + $0x70] sm:$0xff]  ;;  %1393 = vmatpush.msra.mxu2 %v981_v55  ;;  %v1045_v0 = vunpack.c.l.bf16 %v4150_v54  ;;  %v4171_v4 = vld [vmem:[%s4019_s21 + $0x60] sm:$0xff]  ;;  %1421 = vmatpush.msra.mxu3 %v1049_v56  ;;  %v1041_v20 = vunpack.c.l.bf16 %v4166_v62 }
  0x73   : > { %v4163_v61 = vld [vmem:[%s4019_s21 + $0x270] sm:$0xff]  ;;  %1364 = vmatpush.msra.mxu1 %v917_v60  ;;  %v845_v9 = vunpack.c.l.bf16 %v4155_v57  ;;  %v4179_v14 = vld [vmem:[%s4019_s21 + $0x260] sm:$0xff]  ;;  %1336 = vmatpush.msra.mxu0 %v849_v59  ;;  %v841_v27 = vunpack.c.l.bf16 %v4171_v4 }
  0x74   : > { %v4174_v5 = vld [vmem:[%s4019_s21 + $0x170] sm:$0xff]  ;;  %1394 = vmatpush.msra.mxu2 %v977_v63  ;;  %v973_v19 = vunpack.c.l.bf16 %v4163_v61  ;;  %v4190_v24 = vld [vmem:[%s4019_s21 + $0x160] sm:$0xff]  ;;  %1422 = vmatpush.msra.mxu3 %v1045_v0  ;;  %v969_v35 = vunpack.c.l.bf16 %v4179_v14 }
  0x75   : > { %v4182_v15 = vld [vmem:[%s4019_s21 + $0x370] sm:$0xff]  ;;  %1365 = vmatpush.msra.mxu1 %v913_v10  ;;  %v909_v28 = vunpack.c.l.bf16 %v4174_v5  ;;  %v4198_v32 = vld [vmem:[%s4019_s21 + $0x360] sm:$0xff]  ;;  %1337 = vmatpush.msra.mxu0 %v845_v9  ;;  %v905_v44 = vunpack.c.l.bf16 %v4190_v24 }
  0x76   : > { %v4187_v23 = vld [vmem:[%s4019_s21 + $0x50] sm:$0xff]  ;;  %1395 = vmatpush.msra.mxu2 %v973_v19  ;;  %v1037_v36 = vunpack.c.l.bf16 %v4182_v15  ;;  %v4203_v39 = vld [vmem:[%s4019_s21 + $0x40] sm:$0xff]  ;;  %1423 = vmatpush.msra.mxu3 %v1041_v20  ;;  %v1033_v52 = vunpack.c.l.bf16 %v4198_v32 }
  0x77   : > { %v4195_v31 = vld [vmem:[%s4019_s21 + $0x250] sm:$0xff]  ;;  %6497 = vst [vmem:[#allocation22_spill] sm:$0xff] %v4203_v39  ;;  %1366 = vmatpush.msra.mxu1 %v909_v28  ;;  %v837_v43 = vunpack.c.l.bf16 %v4187_v23  ;;  %v4211_v47 = vld [vmem:[%s4019_s21 + $0x240] sm:$0xff]  ;;  %1338 = vmatpush.msra.mxu0 %v841_v27  ;;  %v833_v59 = vunpack.c.l.bf16 %v4203_v39 }
  0x78   : > { %v4206_v40 = vld [vmem:[%s4019_s21 + $0x150] sm:$0xff]  ;;  %1396 = vmatpush.msra.mxu2 %v969_v35  ;;  %v965_v51 = vunpack.c.l.bf16 %v4195_v31  ;;  %v4222_v56 = vld [vmem:[%s4019_s21 + $0x140] sm:$0xff]  ;;  %1424 = vmatpush.msra.mxu3 %v1037_v36  ;;  %v961_v9 = vunpack.c.l.bf16 %v4211_v47 }
  0x79   : > { %6498 = vst [vmem:[#allocation23_spill] sm:$0xff] %v4206_v40  ;;  %v4214_v48 = vld [vmem:[%s4019_s21 + $0x350] sm:$0xff]  ;;  %1367 = vmatpush.msra.mxu1 %v905_v44  ;;  %v901_v60 = vunpack.c.l.bf16 %v4206_v40  ;;  %v4230_v0 = vld [vmem:[%s4019_s21 + $0x340] sm:$0xff]  ;;  %1339 = vmatpush.msra.mxu0 %v837_v43  ;;  %v897_v28 = vunpack.c.l.bf16 %v4222_v56 }
  0x7a   : > { %6499 = vst [vmem:[#allocation24_spill] sm:$0xff] %v4214_v48  ;;  %v4219_v55 = vld [vmem:[%s4019_s21 + $0x30] sm:$0xff]  ;;  %1397 = vmatpush.msra.mxu2 %v965_v51  ;;  %v1029_v10 = vunpack.c.l.bf16 %v4214_v48  ;;  %v4235_v19 = vld [vmem:[%s4019_s21 + $0x20] sm:$0xff]  ;;  %1425 = vmatpush.msra.mxu3 %v1033_v52  ;;  %v1025_v44 = vunpack.c.l.bf16 %v4230_v0 }
  0x7b   : > { %6500 = vst [vmem:[#allocation25_spill] sm:$0xff] %v4219_v55  ;;  %v4227_v63 = vld [vmem:[%s4019_s21 + $0x230] sm:$0xff]  ;;  %1368 = vmatpush.msra.mxu1 %v901_v60  ;;  %v829_v27 = vunpack.c.l.bf16 %v4219_v55  ;;  %v4243_v35 = vld [vmem:[%s4019_s21 + $0x220] sm:$0xff]  ;;  %1340 = vmatpush.msra.mxu0 %v833_v59  ;;  %v825_v60 = vunpack.c.l.bf16 %v4235_v19 }
  0x7c   : > { %6501 = vst [vmem:[#allocation26_spill] sm:$0xff] %v4222_v56  ;;  %v4238_v20 = vld [vmem:[%s4019_s21 + $0x130] sm:$0xff]  ;;  %1398 = vmatpush.msra.mxu2 %v961_v9  ;;  %v957_v43 = vunpack.c.l.bf16 %v4227_v63  ;;  %v4254_v52 = vld [vmem:[%s4019_s21 + $0x120] sm:$0xff]  ;;  %1426 = vmatpush.msra.mxu3 %v1029_v10 }
  0x7d   : > { %6502 = vst [vmem:[#allocation27_spill] sm:$0xff] %v4227_v63  ;;  %v4246_v36 = vld [vmem:[%s4019_s21 + $0x330] sm:$0xff]  ;;  %1369 = vmatpush.msra.mxu1 %v897_v28  ;;  %v893_v56 = vunpack.c.l.bf16 %v4238_v20  ;;  %v4262_v9 = vld [vmem:[%s4019_s21 + $0x320] sm:$0xff]  ;;  %1341 = vmatpush.msra.mxu0 %v829_v27  ;;  %v953_v63 = vunpack.c.l.bf16 %v4243_v35 }
  0x7e   : > { %6503 = vst [vmem:[#allocation28_spill] sm:$0xff] %v4230_v0  ;;  %v4251_v51 = vld [vmem:[%s4019_s21 + $0x10] sm:$0xff]  ;;  %1399 = vmatpush.msra.mxu2 %v957_v43  ;;  %v1021_v55 = vunpack.c.l.bf16 %v4246_v36  ;;  %v4267_v10 = vld [vmem:[%s4019_s21] sm:$0xff]  ;;  %1427 = vmatpush.msra.mxu3 %v1025_v44 }
  0x7f   : > { %6504 = vst [vmem:[#allocation29_spill] sm:$0xff] %v4235_v19  ;;  %v4259_v59 = vld [vmem:[%s4019_s21 + $0x210] sm:$0xff]  ;;  %1370 = vmatpush.msra.mxu1 %v893_v56  ;;  %v889_v19 = vunpack.c.l.bf16 %v4254_v52  ;;  %v4275_v27 = vld [vmem:[%s4019_s21 + $0x200] sm:$0xff]  ;;  %1342 = vmatpush.msra.mxu0 %v825_v60 }
  0x80   : > { %6505 = vst [vmem:[#allocation30_spill] sm:$0xff] %v4238_v20  ;;  %v4270_v28 = vld [vmem:[%s4019_s21 + $0x110] sm:$0xff]  ;;  %v821_v20 = vunpack.c.l.bf16 %v4251_v51  ;;  %1400 = vmatpush.msra.mxu2 %v953_v63  ;;  %v4286_v56 = vld [vmem:[%s4019_s21 + $0x100] sm:$0xff]  ;;  %1428 = vmatpush.msra.mxu3 %v1021_v55 }
  0x81   : > { %6506 = vst [vmem:[#allocation31_spill] sm:$0xff] %v4243_v35  ;;  %v4278_v43 = vld [vmem:[%s4019_s21 + $0x310] sm:$0xff]  ;;  %v1017_v35 = vunpack.c.l.bf16 %v4262_v9  ;;  %1371 = vmatpush.msra.mxu1 %v889_v19  ;;  %v885_v60 = vunpack.c.l.bf16 %v4270_v28  ;;  %v4299_v55 = vld [vmem:[%s4011_s28] sm:$0xff] }
  0x82   : > { %6507 = vst [vmem:[#allocation32_spill] sm:$0xff] %v4246_v36  ;;  %v949_v36 = vunpack.c.l.bf16 %v4259_v59  ;;  %v4283_v44 = vld [vmem:[%s4019_s21 + $0x6f0] sm:$0xff]  ;;  %1343 = vmatpush.msra.mxu0 %v821_v20  ;;  %v4302_v19 = vld [vmem:[%s4019_s21 + $0x6e0] sm:$0xff] }
  0x83   : > { %6508 = vst [vmem:[#allocation33_spill] sm:$0xff] %v4251_v51  ;;  %v4291_v51 = vld [vmem:[%s4019_s21 + $0x300] sm:$0xff]  ;;  %v4294_v63 = vld [vmem:[%s4019_s21 + $0x4f0] sm:$0xff]  ;;  %1429 = vmatpush.msra.mxu3 %v1017_v35  ;;  %1372 = vmatpush.msra.mxu1 %v885_v60  ;;  %v1261_v20 = vunpack.c.l.bf16 %v4283_v44 }
  0x84   : > { %6509 = vst [vmem:[#allocation34_spill] sm:$0xff] %v4254_v52  ;;  %v817_v52 = vunpack.c.l.bf16 %v4267_v10  ;;  %1401 = vmatpush.msra.mxu2 %v949_v36  ;;  %v881_v36 = vunpack.c.l.bf16 %v4286_v56  ;;  %v1133_v35 = vunpack.c.l.bf16 %v4294_v63  ;;  %v4318_v60 = vld [vmem:[%s4019_s21 + $0x5f0] sm:$0xff]  ;;  %v4344_v40 = vld [vmem:[%s4019_s21 + $0x6c0] sm:$0xff] }
  0x85   : > { %6510 = vst [vmem:[#allocation35_spill] sm:$0xff] %v4259_v59  ;;  %v1013_v59 = vunpack.c.l.bf16 %v4278_v43  ;;  %v4321_v0 = vld [vmem:[%s4019_s21 + $0x6d0] sm:$0xff] }
  0x86   : > { %6511 = vst [vmem:[#allocation36_spill] sm:$0xff] %v4262_v9  ;;  %v945_v9 = vunpack.c.l.bf16 %v4275_v27  ;;  %1344 = vmatpush.msra.mxu0 %v817_v52  ;;  %v1257_v52 = vunpack.c.l.bf16 %v4302_v19  ;;  %1373 = vmatpush.msra.mxu1 %v881_v36  ;;  %v1253_v48 = vunpack.c.l.bf16 %v4321_v0  ;;  %v4352_v36 = vld [vmem:[%s4019_s21 + $0x4c0] sm:$0xff]  ;;  %v4598_v39 = vld [vmem:[%s4019_s21 + $0x510] sm:$0xff] }
  0x87   : > { %6512 = vst [vmem:[#allocation37_spill] sm:$0xff] %v4267_v10  ;;  %v4310_v10 = vld [vmem:[%s4019_s21 + $0x7f0] sm:$0xff]  ;;  %1430 = vmatpush.msra.mxu3 %v1013_v59  ;;  %1345 = vmatmul.f32.vlgmr.msra.gmra.mxu0 %v4299_v55 }
  0x88   : > { %6513 = vst [vmem:[#allocation38_spill] sm:$0xff] %v4270_v28  ;;  %v4305_v28 = vld [vmem:[%s4011_s28 + $0x10] sm:$0xff]  ;;  %1402 = vmatpush.msra.mxu2 %v945_v9  ;;  %v4329_v9 = vld [vmem:[%s4019_s21 + $0x7e0] sm:$0xff]  ;;  %v1325_v59 = vunpack.c.l.bf16 %v4310_v10  ;;  %1445 = vmatpush.msrb.mxu0 %v1133_v35 }
  0x89   : > { %6514 = vst [vmem:[#allocation39_spill] sm:$0xff] %v4275_v27  ;;  %v4313_v27 = vld [vmem:[%s4019_s21 + $0x4e0] sm:$0xff]  ;;  %1403 = vmatmul.f32.vlgmr.msra.gmra.mxu2 %v4305_v28 }
  0x8a   : > { %6515 = vst [vmem:[#allocation40_spill] sm:$0xff] %v4278_v43  ;;  %v1009_v43 = vunpack.c.l.bf16 %v4291_v51  ;;  %1503 = vmatpush.msrb.mxu2 %v1261_v20  ;;  %v4358_v20 = vld [vmem:[%s4019_s21 + $0x5d0] sm:$0xff] }
  0x8b   : > { %6516 = vst [vmem:[#allocation41_spill] sm:$0xff] %v4283_v44  ;;  %v4332_v44 = vld [vmem:[%s4019_s21 + $0x4d0] sm:$0xff] }
  0x8c   : > { %6517 = vst [vmem:[#allocation42_spill] sm:$0xff] %v4286_v56  ;;  %v4325_v56 = vld [vmem:[%s4011_s28 + $0x8] sm:$0xff]  ;;  %1431 = vmatpush.msra.mxu3 %v1009_v43  ;;  %1504 = vmatpush.msrb.mxu2 %v1257_v52  ;;  %v1189_v52 = vunpack.c.l.bf16 %v4358_v20 }
  0x8d   : > { %6518 = vst [vmem:[#allocation43_spill] sm:$0xff] %v4291_v51  ;;  %v4341_v51 = vld [vmem:[%s4019_s21 + $0x5e0] sm:$0xff]  ;;  %1374 = vmatmul.f32.vlgmr.msra.gmra.mxu1 %v4325_v56 }
  0x8e   : > { %6519 = vst [vmem:[#allocation44_spill] sm:$0xff] %v4294_v63  ;;  %v4336_v63 = vld [vmem:[%s4011_s28 + $0x18] sm:$0xff]  ;;  %v1193_v43 = vunpack.c.l.bf16 %v4341_v51  ;;  %1532 = vmatpush.msrb.mxu3 %v1325_v59  ;;  %1505 = vmatpush.msrb.mxu2 %v1253_v48  ;;  %v4386_v48 = vld [vmem:[%s4011_s28 + $0x50] sm:$0xff] }
  0x8f   : > { %6520 = vst [vmem:[#allocation45_spill] sm:$0xff] %v4299_v55  ;;  %v1129_v55 = vunpack.c.l.bf16 %v4313_v27  ;;  %1432 = vmatmul.f32.vlgmr.msra.gmra.mxu3 %v4336_v63 }
  0x90   : > { %6521 = vst [vmem:[#allocation46_spill] sm:$0xff] %v4302_v19  ;;  %v1197_v19 = vunpack.c.l.bf16 %v4318_v60 }
  0x91   : > { %6522 = vst [vmem:[#allocation47_spill] sm:$0xff] %v4305_v28  ;;  %v4349_v28 = vld [vmem:[%s4019_s21 + $0x7d0] sm:$0xff]  ;;  %1446 = vmatpush.msrb.mxu0 %v1129_v55  ;;  %v4379_v55 = vld [vmem:[%s4011_s28 + $0x40] sm:$0xff]  ;;  %1406 = vmatmul.f32.gmra.mxu2 %v4386_v48 }
  0x92   : > { %6523 = vst [vmem:[#allocation48_spill] sm:$0xff] %v4310_v10  ;;  %v1125_v10 = vunpack.c.l.bf16 %v4332_v44  ;;  %v1317_v35 = vunpack.c.l.bf16 %v4349_v28  ;;  %1474 = vmatpush.msrb.mxu1 %v1197_v19  ;;  %1348 = vmatmul.f32.gmra.mxu0 %v4379_v55 }
  0x93   : > { %6524 = vst [vmem:[#allocation49_spill] sm:$0xff] %v4313_v27  ;;  %v1321_v27 = vunpack.c.l.bf16 %v4329_v9 }
  0x94   : > { %6525 = vst [vmem:[#allocation50_spill] sm:$0xff] %v4318_v60  ;;  %v4364_v60 = vld [vmem:[%s4019_s21 + $0x7c0] sm:$0xff]  ;;  %1447 = vmatpush.msrb.mxu0 %v1125_v10  ;;  %1475 = vmatpush.msrb.mxu1 %v1193_v43 }
  0x95   : > { %6526 = vst [vmem:[#allocation51_spill] sm:$0xff] %v4321_v0  ;;  %v1249_v0 = vunpack.c.l.bf16 %v4344_v40  ;;  %1533 = vmatpush.msrb.mxu3 %v1321_v27  ;;  %v1313_v59 = vunpack.c.l.bf16 %v4364_v60  ;;  %v4391_v27 = vld [vmem:[%s4019_s21 + $0x7b0] sm:$0xff]  ;;  %v4394_v10 = vld [vmem:[%s4019_s21 + $0x4a0] sm:$0xff] }
  0x96   : > { %6527 = vst [vmem:[#allocation52_spill] sm:$0xff] %v4325_v56  ;;  %v1121_v56 = vunpack.c.l.bf16 %v4352_v36  ;;  %1476 = vmatpush.msrb.mxu1 %v1189_v52  ;;  %v1309_v52 = vunpack.c.l.bf16 %v4391_v27 }
  0x97   : > { %6528 = vst [vmem:[#allocation53_spill] sm:$0xff] %v4329_v9  ;;  %1506 = vmatpush.msrb.mxu2 %v1249_v0  ;;  %1534 = vmatpush.msrb.mxu3 %v1317_v35  ;;  %v4401_v0 = vld [vmem:[%s4019_s21 + $0x690] sm:$0xff] }
  0x98   : > { %6529 = vst [vmem:[#allocation54_spill] sm:$0xff] %v4332_v44  ;;  %v4369_v44 = vld [vmem:[%s4019_s21 + $0x6b0] sm:$0xff]  ;;  %1448 = vmatpush.msrb.mxu0 %v1121_v56  ;;  %v4416_v56 = vld [vmem:[%s4011_s28 + $0x48] sm:$0xff]  ;;  %v1237_v9 = vunpack.c.l.bf16 %v4401_v0 }
  0x99   : > { %6530 = vst [vmem:[#allocation55_spill] sm:$0xff] %v4336_v63  ;;  %v4372_v63 = vld [vmem:[%s4019_s21 + $0x4b0] sm:$0xff]  ;;  %v1245_v19 = vunpack.c.l.bf16 %v4369_v44  ;;  %1535 = vmatpush.msrb.mxu3 %v1313_v59  ;;  %v4432_v59 = vld [vmem:[%s4019_s21 + $0x480] sm:$0xff]  ;;  %1377 = vmatmul.f32.gmra.mxu1 %v4416_v56 }
  0x9a   : > { %6531 = vst [vmem:[#allocation56_spill] sm:$0xff] %v4341_v51  ;;  %v4412_v35 = vld [vmem:[%s4019_s21 + $0x490] sm:$0xff]  ;;  %v4424_v51 = vld [vmem:[%s4019_s21 + $0x680] sm:$0xff] }
  0x9b   : > { %6532 = vst [vmem:[#allocation57_spill] sm:$0xff] %v4344_v40  ;;  %v4376_v40 = vld [vmem:[%s4019_s21 + $0x5c0] sm:$0xff]  ;;  %1507 = vmatpush.msrb.mxu2 %v1245_v19  ;;  %v4438_v19 = vld [vmem:[%s4019_s21 + $0x590] sm:$0xff]  ;;  %1536 = vmatpush.msrb.mxu3 %v1309_v52 }
  0x9c   : > { %6533 = vst [vmem:[#allocation58_spill] sm:$0xff] %v4349_v28  ;;  %v1185_v43 = vunpack.c.l.bf16 %v4376_v40  ;;  %v4409_v28 = vld [vmem:[%s4019_s21 + $0x7a0] sm:$0xff] }
  0x9d   : > { %6534 = vst [vmem:[#allocation59_spill] sm:$0xff] %v4352_v36  ;;  %v4383_v36 = vld [vmem:[%s4019_s21 + $0x6a0] sm:$0xff] }
  0x9e   : > { %6535 = vst [vmem:[#allocation60_spill] sm:$0xff] %v4358_v20  ;;  %v1117_v20 = vunpack.c.l.bf16 %v4372_v63  ;;  %1477 = vmatpush.msrb.mxu1 %v1185_v43 }
  0x9f   : > { %6536 = vst [vmem:[#allocation61_spill] sm:$0xff] %v4364_v60  ;;  %v4398_v60 = vld [vmem:[%s4019_s21 + $0x5b0] sm:$0xff] }
  0xa0   : > { %6537 = vst [vmem:[#allocation62_spill] sm:$0xff] %v4369_v44  ;;  %v1241_v44 = vunpack.c.l.bf16 %v4383_v36  ;;  %1449 = vmatpush.msrb.mxu0 %v1117_v20 }
  0xa1   : > { %6538 = vst [vmem:[#allocation63_spill] sm:$0xff] %v4372_v63  ;;  %v4405_v63 = vld [vmem:[%s4011_s28 + $0x58] sm:$0xff] }
  0xa2   : > { %6539 = vst [vmem:[#allocation64_spill] sm:$0xff] %v4376_v40  ;;  %v4421_v40 = vld [vmem:[%s4019_s21 + $0x5a0] sm:$0xff]  ;;  %1435 = vmatmul.f32.gmra.mxu3 %v4405_v63  ;;  %1508 = vmatpush.msrb.mxu2 %v1241_v44  ;;  %v1173_v44 = vunpack.c.l.bf16 %v4438_v19 }
  0xa3   : > { %6540 = vst [vmem:[#allocation65_spill] sm:$0xff] %v4379_v55  ;;  %v1113_v55 = vunpack.c.l.bf16 %v4394_v10  ;;  %v1177_v20 = vunpack.c.l.bf16 %v4421_v40 }
  0xa4   : > { %6541 = vst [vmem:[#allocation66_spill] sm:$0xff] %v4383_v36  ;;  %v1181_v36 = vunpack.c.l.bf16 %v4398_v60  ;;  %1509 = vmatpush.msrb.mxu2 %v1237_v9  ;;  %v4466_v9 = vld [vmem:[%s4011_s28 + $0x90] sm:$0xff] }
  0xa5   : > { %6542 = vst [vmem:[#allocation67_spill] sm:$0xff] %v4386_v48  ;;  %v4429_v48 = vld [vmem:[%s4019_s21 + $0x790] sm:$0xff]  ;;  %1450 = vmatpush.msrb.mxu0 %v1113_v55  ;;  %v4459_v55 = vld [vmem:[%s4011_s28 + $0x80] sm:$0xff]  ;;  %1409 = vmatmul.f32.gmra.mxu2 %v4466_v9 }
  0xa6   : > { %6543 = vst [vmem:[#allocation68_spill] sm:$0xff] %v4391_v27  ;;  %v1109_v27 = vunpack.c.l.bf16 %v4412_v35  ;;  %v1301_v43 = vunpack.c.l.bf16 %v4429_v48  ;;  %1478 = vmatpush.msrb.mxu1 %v1181_v36  ;;  %1351 = vmatmul.f32.gmra.mxu0 %v4459_v55 }
  0xa7   : > { %6544 = vst [vmem:[#allocation69_spill] sm:$0xff] %v4394_v10  ;;  %v1305_v10 = vunpack.c.l.bf16 %v4409_v28 }
  0xa8   : > { %6545 = vst [vmem:[#allocation70_spill] sm:$0xff] %v4398_v60  ;;  %v4444_v60 = vld [vmem:[%s4019_s21 + $0x780] sm:$0xff]  ;;  %1451 = vmatpush.msrb.mxu0 %v1109_v27  ;;  %1479 = vmatpush.msrb.mxu1 %v1177_v20 }
  0xa9   : > { %6546 = vst [vmem:[#allocation71_spill] sm:$0xff] %v4401_v0  ;;  %v1233_v0 = vunpack.c.l.bf16 %v4424_v51  ;;  %1537 = vmatpush.msrb.mxu3 %v1305_v10  ;;  %v1297_v52 = vunpack.c.l.bf16 %v4444_v60  ;;  %v4471_v10 = vld [vmem:[%s4019_s21 + $0x770] sm:$0xff]  ;;  %v4474_v27 = vld [vmem:[%s4019_s21 + $0x460] sm:$0xff] }
  0xaa   : > { %6547 = vst [vmem:[#allocation72_spill] sm:$0xff] %v4405_v63  ;;  %v1105_v63 = vunpack.c.l.bf16 %v4432_v59  ;;  %1480 = vmatpush.msrb.mxu1 %v1173_v44  ;;  %v1293_v44 = vunpack.c.l.bf16 %v4471_v10 }
  0xab   : > { %6548 = vst [vmem:[#allocation73_spill] sm:$0xff] %v4409_v28  ;;  %1510 = vmatpush.msrb.mxu2 %v1233_v0  ;;  %1538 = vmatpush.msrb.mxu3 %v1301_v43  ;;  %v4481_v0 = vld [vmem:[%s4019_s21 + $0x650] sm:$0xff] }
  0xac   : > { %6549 = vst [vmem:[#allocation74_spill] sm:$0xff] %v4412_v35  ;;  %v4449_v35 = vld [vmem:[%s4019_s21 + $0x670] sm:$0xff]  ;;  %1452 = vmatpush.msrb.mxu0 %v1105_v63  ;;  %v4496_v63 = vld [vmem:[%s4011_s28 + $0x88] sm:$0xff]  ;;  %v1221_v28 = vunpack.c.l.bf16 %v4481_v0 }
  0xad   : > { %6550 = vst [vmem:[#allocation75_spill] sm:$0xff] %v4416_v56  ;;  %v4452_v56 = vld [vmem:[%s4019_s21 + $0x470] sm:$0xff]  ;;  %v1229_v36 = vunpack.c.l.bf16 %v4449_v35  ;;  %1539 = vmatpush.msrb.mxu3 %v1297_v52  ;;  %v4512_v52 = vld [vmem:[%s4019_s21 + $0x440] sm:$0xff]  ;;  %1380 = vmatmul.f32.gmra.mxu1 %v4496_v63 }
  0xae   : > { %6551 = vst [vmem:[#allocation76_spill] sm:$0xff] %v4421_v40  ;;  %v4492_v43 = vld [vmem:[%s4019_s21 + $0x450] sm:$0xff]  ;;  %v4504_v40 = vld [vmem:[%s4019_s21 + $0x640] sm:$0xff] }
  0xaf   : > { %6552 = vst [vmem:[#allocation77_spill] sm:$0xff] %v4424_v51  ;;  %v4456_v51 = vld [vmem:[%s4019_s21 + $0x580] sm:$0xff]  ;;  %1511 = vmatpush.msrb.mxu2 %v1229_v36  ;;  %v4518_v36 = vld [vmem:[%s4019_s21 + $0x550] sm:$0xff]  ;;  %1540 = vmatpush.msrb.mxu3 %v1293_v44 }
  0xb0   : > { %6553 = vst [vmem:[#allocation78_spill] sm:$0xff] %v4429_v48  ;;  %v1169_v20 = vunpack.c.l.bf16 %v4456_v51  ;;  %v4489_v48 = vld [vmem:[%s4019_s21 + $0x760] sm:$0xff] }
  0xb1   : > { %6554 = vst [vmem:[#allocation79_spill] sm:$0xff] %v4432_v59  ;;  %v4463_v59 = vld [vmem:[%s4019_s21 + $0x660] sm:$0xff] }
  0xb2   : > { %6555 = vst [vmem:[#allocation80_spill] sm:$0xff] %v4438_v19  ;;  %v1101_v19 = vunpack.c.l.bf16 %v4452_v56  ;;  %1481 = vmatpush.msrb.mxu1 %v1169_v20 }
  0xb3   : > { %6556 = vst [vmem:[#allocation81_spill] sm:$0xff] %v4444_v60  ;;  %v4478_v60 = vld [vmem:[%s4019_s21 + $0x570] sm:$0xff] }
  0xb4   : > { %6557 = vst [vmem:[#allocation82_spill] sm:$0xff] %v4449_v35  ;;  %v1225_v35 = vunpack.c.l.bf16 %v4463_v59  ;;  %1453 = vmatpush.msrb.mxu0 %v1101_v19 }
  0xb5   : > { %6558 = vst [vmem:[#allocation83_spill] sm:$0xff] %v4452_v56  ;;  %v4485_v56 = vld [vmem:[%s4011_s28 + $0x98] sm:$0xff] }
  0xb6   : > { %6559 = vst [vmem:[#allocation84_spill] sm:$0xff] %v4456_v51  ;;  %v4501_v51 = vld [vmem:[%s4019_s21 + $0x560] sm:$0xff]  ;;  %1438 = vmatmul.f32.gmra.mxu3 %v4485_v56  ;;  %1512 = vmatpush.msrb.mxu2 %v1225_v35  ;;  %v1157_v35 = vunpack.c.l.bf16 %v4518_v36 }
  0xb7   : > { %6560 = vst [vmem:[#allocation85_spill] sm:$0xff] %v4459_v55  ;;  %v1097_v55 = vunpack.c.l.bf16 %v4474_v27  ;;  %v1161_v19 = vunpack.c.l.bf16 %v4501_v51 }
  0xb8   : > { %6561 = vst [vmem:[#allocation86_spill] sm:$0xff] %v4463_v59  ;;  %v1165_v59 = vunpack.c.l.bf16 %v4478_v60  ;;  %1513 = vmatpush.msrb.mxu2 %v1221_v28  ;;  %v4546_v28 = vld [vmem:[%s4011_s28 + $0xd0] sm:$0xff] }
  0xb9   : > { %6562 = vst [vmem:[#allocation87_spill] sm:$0xff] %v4466_v9  ;;  %v4509_v9 = vld [vmem:[%s4019_s21 + $0x750] sm:$0xff]  ;;  %1454 = vmatpush.msrb.mxu0 %v1097_v55  ;;  %v4539_v55 = vld [vmem:[%s4011_s28 + $0xc0] sm:$0xff]  ;;  %1412 = vmatmul.f32.gmra.mxu2 %v4546_v28 }
  0xba   : > { %6563 = vst [vmem:[#allocation88_spill] sm:$0xff] %v4471_v10  ;;  %v1093_v10 = vunpack.c.l.bf16 %v4492_v43  ;;  %v1285_v20 = vunpack.c.l.bf16 %v4509_v9  ;;  %1482 = vmatpush.msrb.mxu1 %v1165_v59  ;;  %1354 = vmatmul.f32.gmra.mxu0 %v4539_v55 }
  0xbb   : > { %6564 = vst [vmem:[#allocation89_spill] sm:$0xff] %v4474_v27  ;;  %v1289_v27 = vunpack.c.l.bf16 %v4489_v48 }
  0xbc   : > { %6565 = vst [vmem:[#allocation90_spill] sm:$0xff] %v4478_v60  ;;  %v4524_v60 = vld [vmem:[%s4019_s21 + $0x740] sm:$0xff]  ;;  %1455 = vmatpush.msrb.mxu0 %v1093_v10  ;;  %1483 = vmatpush.msrb.mxu1 %v1161_v19 }
  0xbd   : > { %6566 = vst [vmem:[#allocation91_spill] sm:$0xff] %v4481_v0  ;;  %v1217_v0 = vunpack.c.l.bf16 %v4504_v40  ;;  %1541 = vmatpush.msrb.mxu3 %v1289_v27  ;;  %v1281_v44 = vunpack.c.l.bf16 %v4524_v60  ;;  %v4551_v27 = vld [vmem:[%s4019_s21 + $0x730] sm:$0xff]  ;;  %v4554_v10 = vld [vmem:[%s4019_s21 + $0x420] sm:$0xff] }
  0xbe   : > { %6567 = vst [vmem:[#allocation92_spill] sm:$0xff] %v4485_v56  ;;  %v1089_v56 = vunpack.c.l.bf16 %v4512_v52  ;;  %1484 = vmatpush.msrb.mxu1 %v1157_v35  ;;  %v1277_v35 = vunpack.c.l.bf16 %v4551_v27 }
  0xbf   : > { %6568 = vst [vmem:[#allocation93_spill] sm:$0xff] %v4489_v48  ;;  %1514 = vmatpush.msrb.mxu2 %v1217_v0  ;;  %1542 = vmatpush.msrb.mxu3 %v1285_v20  ;;  %v4561_v0 = vld [vmem:[%s4019_s21 + $0x610] sm:$0xff] }
  0xc0   : > { %6569 = vst [vmem:[#allocation94_spill] sm:$0xff] %v4492_v43  ;;  %v4529_v43 = vld [vmem:[%s4019_s21 + $0x630] sm:$0xff]  ;;  %1456 = vmatpush.msrb.mxu0 %v1089_v56  ;;  %v4576_v56 = vld [vmem:[%s4011_s28 + $0xc8] sm:$0xff]  ;;  %v1205_v48 = vunpack.c.l.bf16 %v4561_v0 }
  0xc1   : > { %6570 = vst [vmem:[#allocation95_spill] sm:$0xff] %v4496_v63  ;;  %v4532_v63 = vld [vmem:[%s4019_s21 + $0x430] sm:$0xff]  ;;  %v1213_v59 = vunpack.c.l.bf16 %v4529_v43  ;;  %1543 = vmatpush.msrb.mxu3 %v1281_v44  ;;  %v4592_v44 = vld [vmem:[%s4019_s21 + $0x400] sm:$0xff]  ;;  %1383 = vmatmul.f32.gmra.mxu1 %v4576_v56 }
  0xc2   : > { %6571 = vst [vmem:[#allocation96_spill] sm:$0xff] %v4501_v51  ;;  %v4572_v20 = vld [vmem:[%s4019_s21 + $0x410] sm:$0xff]  ;;  %v4584_v51 = vld [vmem:[%s4019_s21 + $0x600] sm:$0xff] }
  0xc3   : > { %6572 = vst [vmem:[#allocation97_spill] sm:$0xff] %v4504_v40  ;;  %v4536_v40 = vld [vmem:[%s4019_s21 + $0x540] sm:$0xff]  ;;  %1515 = vmatpush.msrb.mxu2 %v1213_v59  ;;  %v1201_v59 = vunpack.c.l.bf16 %v4584_v51  ;;  %1544 = vmatpush.msrb.mxu3 %v1277_v35  ;;  %v1006_v35 = vunpack.c.h.bf16 %v4042_v2  ;;  %v874_v2 = vunpack.c.h.bf16 %v4045_v3  ;;  %v938_v3 = vunpack.c.h.bf16 %v4064_v12 }
  0xc4   : > { %6573 = vst [vmem:[#allocation98_spill] sm:$0xff] %v4509_v9  ;;  %v1153_v19 = vunpack.c.l.bf16 %v4536_v40  ;;  %v4569_v9 = vld [vmem:[%s4019_s21 + $0x720] sm:$0xff] }
  0xc5   : > { %6574 = vst [vmem:[#allocation99_spill] sm:$0xff] %v4512_v52  ;;  %v4543_v52 = vld [vmem:[%s4019_s21 + $0x620] sm:$0xff] }
  0xc6   : > { %6575 = vst [vmem:[#allocation100_spill] sm:$0xff] %v4518_v36  ;;  %v1085_v36 = vunpack.c.l.bf16 %v4532_v63  ;;  %1485 = vmatpush.msrb.mxu1 %v1153_v19  ;;  %v4646_v12 = vld [vmem:[%s4011_s28 + $0x60] sm:$0xff] }
  0xc7   : > { %6576 = vst [vmem:[#allocation101_spill] sm:$0xff] %v4524_v60  ;;  %v4558_v60 = vld [vmem:[%s4019_s21 + $0x530] sm:$0xff] }
  0xc8   : > { %6577 = vst [vmem:[#allocation102_spill] sm:$0xff] %v4529_v43  ;;  %v1209_v43 = vunpack.c.l.bf16 %v4543_v52  ;;  %1457 = vmatpush.msrb.mxu0 %v1085_v36 }
  0xc9   : > { %6578 = vst [vmem:[#allocation103_spill] sm:$0xff] %v4532_v63  ;;  %v4565_v63 = vld [vmem:[%s4011_s28 + $0xd8] sm:$0xff] }
  0xca   : > { %6579 = vst [vmem:[#allocation104_spill] sm:$0xff] %v4536_v40  ;;  %v4581_v40 = vld [vmem:[%s4019_s21 + $0x520] sm:$0xff]  ;;  %1441 = vmatmul.f32.gmra.mxu3 %v4565_v63  ;;  %1516 = vmatpush.msrb.mxu2 %v1209_v43 }
  0xcb   : > { %6580 = vst [vmem:[#allocation105_spill] sm:$0xff] %v4539_v55  ;;  %v1081_v55 = vunpack.c.l.bf16 %v4554_v10  ;;  %v1145_v36 = vunpack.c.l.bf16 %v4581_v40  ;;  %v4613_v43 = vld [vmem:[%s4011_s28 + $0x20] sm:$0xff] }
  0xcc   : > { %6581 = vst [vmem:[#allocation106_spill] sm:$0xff] %v4543_v52  ;;  %v1149_v52 = vunpack.c.l.bf16 %v4558_v60  ;;  %1517 = vmatpush.msrb.mxu2 %v1205_v48  ;;  %v878_v48 = vunpack.c.h.bf16 %v4039_v1  ;;  %v942_v1 = vunpack.c.h.bf16 %v4050_v6  ;;  %v866_v6 = vunpack.c.h.bf16 %v4075_v17 }
  0xcd   : > { %6582 = vst [vmem:[#allocation107_spill] sm:$0xff] %v4546_v28  ;;  %v4589_v28 = vld [vmem:[%s4019_s21 + $0x710] sm:$0xff]  ;;  %1458 = vmatpush.msrb.mxu0 %v1081_v55  ;;  %v990_v17 = vunpack.c.h.bf16 %v4099_v29  ;;  %v4663_v29 = vld [vmem:[%s4011_s28 + $0x68] sm:$0xff] }
  0xce   : > { %6583 = vst [vmem:[#allocation108_spill] sm:$0xff] %v4551_v27  ;;  %v1077_v27 = vunpack.c.l.bf16 %v4572_v20  ;;  %v1269_v19 = vunpack.c.l.bf16 %v4589_v28  ;;  %1486 = vmatpush.msrb.mxu1 %v1149_v52  ;;  %1518 = vmatpush.msrb.mxu2 %v1201_v59  ;;  %v4618_v55 = vld [vmem:[%s4011_s28 + $0x30] sm:$0xff]  ;;  %v1002_v52 = vunpack.c.h.bf16 %v4053_v7  ;;  %v870_v7 = vunpack.c.h.bf16 %v4061_v11 }
  0xcf   : > { %6584 = vst [vmem:[#allocation109_spill] sm:$0xff] %v4554_v10  ;;  %v1273_v10 = vunpack.c.l.bf16 %v4569_v9  ;;  %1519 = vmatmul.f32.vlgmr.msrb.gmra.mxu2 %v4618_v55  ;;  %v934_v11 = vunpack.c.h.bf16 %v4078_v18  ;;  %v930_v18 = vunpack.c.h.bf16 %v4094_v26  ;;  %v926_v26 = vunpack.c.h.bf16 %v4110_v34 }
  0xd0   : > { %6585 = vst [vmem:[#allocation110_spill] sm:$0xff] %v4561_v0  ;;  %v4604_v0 = vld [vmem:[%s4019_s21 + $0x700] sm:$0xff]  ;;  %1459 = vmatpush.msrb.mxu0 %v1077_v27  ;;  %1487 = vmatpush.msrb.mxu1 %v1145_v36  ;;  %v4625_v27 = vld [vmem:[%s4011_s28 + $0x28] sm:$0xff]  ;;  %v4631_v36 = vld [vmem:[%s4011_s28 + $0x38] sm:$0xff]  ;;  %v982_v59 = vunpack.c.h.bf16 %v4131_v45  ;;  %v850_v34 = vunpack.c.h.bf16 %v4139_v49  ;;  %v1046_v45 = vunpack.c.h.bf16 %v4150_v54  ;;  %v974_v49 = vunpack.c.h.bf16 %v4163_v61 }
  0xd1   : > { %6586 = vst [vmem:[#allocation111_spill] sm:$0xff] %v4565_v63  ;;  %v1073_v63 = vunpack.c.l.bf16 %v4592_v44  ;;  %1545 = vmatpush.msrb.mxu3 %v1273_v10  ;;  %v1070_v10 = vunpack.c.h.bf16 %v4056_v8  ;;  %1619 = vmatpush.msra.mxu2 %v1006_v35  ;;  %v994_v8 = vunpack.c.h.bf16 %v4083_v21  ;;  %v862_v21 = vunpack.c.h.bf16 %v4091_v25  ;;  %v4683_v54 = vld [vmem:[%s4011_s28 + $0xb0] sm:$0xff]  ;;  %v4695_v61 = vld [vmem:[%s4011_s28 + $0xa8] sm:$0xff] }
  0xd2   : > { %6587 = vst [vmem:[#allocation112_spill] sm:$0xff] %v4572_v20  ;;  %v4609_v20 = vld [vmem:[%s4019_s21 + $0x500] sm:$0xff]  ;;  %v858_v25 = vunpack.c.h.bf16 %v4107_v33  ;;  %v922_v33 = vunpack.c.h.bf16 %v4126_v42  ;;  %v970_v35 = vunpack.c.h.bf16 %v4179_v14  ;;  %v838_v14 = vunpack.c.h.bf16 %v4187_v23  ;;  %v6593_v23 = vld [vmem:[#allocation23_spill] sm:$0xff] }
  0xd3   : > { %6588 = vst [vmem:[#allocation113_spill] sm:$0xff] %v4576_v56  ;;  %v1141_v56 = vunpack.c.l.bf16 %v4598_v39  ;;  %1546 = vmatpush.msrb.mxu3 %v1269_v19  ;;  %1460 = vmatpush.msrb.mxu0 %v1073_v63  ;;  %v998_v63 = vunpack.c.h.bf16 %v4067_v13  ;;  %v1062_v13 = vunpack.c.h.bf16 %v4086_v22  ;;  %v4651_v22 = vld [vmem:[%s4011_s28 + $0x70] sm:$0xff]  ;;  %v1050_v19 = vunpack.c.h.bf16 %v4134_v46  ;;  %v4678_v42 = vld [vmem:[%s4011_s28 + $0xa0] sm:$0xff] }
  0xd4   : > { %6589 = vst [vmem:[#allocation114_spill] sm:$0xff] %v4584_v51  ;;  %v1265_v51 = vunpack.c.l.bf16 %v4604_v0  ;;  %1461 = vmatmul.f32.vlgmr.msrb.gmra.mxu0 %v4613_v43  ;;  %1620 = vmatpush.msra.mxu2 %v1002_v52  ;;  %v1042_v46 = vunpack.c.h.bf16 %v4166_v62  ;;  %v4689_v62 = vld [vmem:[%s4011_s28 + $0xb8] sm:$0xff]  ;;  %v966_v52 = vunpack.c.h.bf16 %v4195_v31 }
  0xd5   : > { %6590 = vst [vmem:[#allocation115_spill] sm:$0xff] %v4592_v44  ;;  %v1137_v44 = vunpack.c.l.bf16 %v4609_v20  ;;  %1488 = vmatpush.msrb.mxu1 %v1141_v56  ;;  %v1066_v56 = vunpack.c.h.bf16 %v4072_v16  ;;  %1561 = vmatpush.msra.mxu0 %v878_v48  ;;  %v1058_v16 = vunpack.c.h.bf16 %v4102_v30  ;;  %v4657_v30 = vld [vmem:[%s4011_s28 + $0x78] sm:$0xff]  ;;  %v1038_v48 = vunpack.c.h.bf16 %v4182_v15 }
  0xd6   : > { %1547 = vmatpush.msrb.mxu3 %v1265_v51  ;;  %1621 = vmatpush.msra.mxu2 %v998_v63  ;;  %v986_v51 = vunpack.c.h.bf16 %v4115_v37  ;;  %v854_v37 = vunpack.c.h.bf16 %v4123_v41  ;;  %v918_v41 = vunpack.c.h.bf16 %v4142_v50  ;;  %v914_v50 = vunpack.c.h.bf16 %v4158_v58  ;;  %v6594_v63 = vld [vmem:[#allocation28_spill] sm:$0xff] }
  0xd7   : > { %1489 = vmatpush.msrb.mxu1 %v1137_v44  ;;  %1548 = vmatmul.f32.vlgmr.msrb.gmra.mxu3 %v4631_v36  ;;  %v1054_v44 = vunpack.c.h.bf16 %v4118_v38  ;;  %v978_v38 = vunpack.c.h.bf16 %v4147_v53  ;;  %v846_v53 = vunpack.c.h.bf16 %v4155_v57  ;;  %v842_v57 = vunpack.c.h.bf16 %v4171_v4 }
  0xd8   : > { %1490 = vmatmul.f32.vlgmr.msrb.gmra.mxu1 %v4625_v27  ;;  %1648 = vmatpush.msra.mxu3 %v1070_v10  ;;  %v910_v58 = vunpack.c.h.bf16 %v4174_v5  ;;  %v906_v4 = vunpack.c.h.bf16 %v4190_v24  ;;  %v962_v15 = vunpack.c.h.bf16 %v4211_v47  ;;  %v6591_v5 = vld [vmem:[#allocation22_spill] sm:$0xff]  ;;  %v6592_v10 = vld [vmem:[#allocation24_spill] sm:$0xff]  ;;  %v6595_v47 = vld [vmem:[#allocation25_spill] sm:$0xff] }
  0xd9   : > { %1562 = vmatpush.msra.mxu0 %v874_v2  ;;  %1590 = vmatpush.msra.mxu1 %v942_v1  ;;  %v1034_v2 = vunpack.c.h.bf16 %v4198_v32  ;;  %v834_v31 = vunpack.c.h.bf16 %v6591_v5  ;;  %v1030_v1 = vunpack.c.h.bf16 %v6592_v10  ;;  %v902_v32 = vunpack.c.h.bf16 %v6593_v23  ;;  %v4710_v24 = vld [vmem:[%s4011_s28 + $0xe0] sm:$0xff] }
  0xda   : > { %1649 = vmatpush.msra.mxu3 %v1066_v56  ;;  %1622 = vmatpush.msra.mxu2 %v994_v8  ;;  %v830_v56 = vunpack.c.h.bf16 %v6595_v47  ;;  %v6616_v47 = vld [vmem:[#allocation48_spill] sm:$0xff] }
  0xdb   : > { %1563 = vmatpush.msra.mxu0 %v870_v7  ;;  %1591 = vmatpush.msra.mxu1 %v938_v3  ;;  %v1026_v7 = vunpack.c.h.bf16 %v6594_v63  ;;  %v6596_v3 = vld [vmem:[#allocation27_spill] sm:$0xff] }
  0xdc   : > { %1650 = vmatpush.msra.mxu3 %v1062_v13  ;;  %1464 = vmatmul.f32.gmra.mxu0 %v4646_v12  ;;  %v958_v8 = vunpack.c.h.bf16 %v6596_v3  ;;  %v6597_v13 = vld [vmem:[#allocation26_spill] sm:$0xff]  ;;  %v6617_v3 = vld [vmem:[#allocation49_spill] sm:$0xff] }
  0xdd   : > { %1564 = vmatpush.msra.mxu0 %v866_v6  ;;  %1592 = vmatpush.msra.mxu1 %v934_v11  ;;  %v4715_v6 = vld [vmem:[%s4011_s28 + $0xf0] sm:$0xff]  ;;  %v898_v11 = vunpack.c.h.bf16 %v6597_v13 }
  0xde   : > { %1522 = vmatmul.f32.gmra.mxu2 %v4651_v22  ;;  %1651 = vmatpush.msra.mxu3 %v1058_v16  ;;  %v6598_v16 = vld [vmem:[#allocation31_spill] sm:$0xff] }
  0xdf   : > { %1623 = vmatpush.msra.mxu2 %v990_v17  ;;  %1565 = vmatpush.msra.mxu0 %v862_v21  ;;  %v954_v21 = vunpack.c.h.bf16 %v6598_v16  ;;  %v4721_v17 = vld [vmem:[%s4011_s28 + $0xf8] sm:$0xff] }
  0xe0   : > { %1593 = vmatpush.msra.mxu1 %v930_v18  ;;  %1551 = vmatmul.f32.gmra.mxu3 %v4657_v30  ;;  %v6599_v18 = vld [vmem:[#allocation29_spill] sm:$0xff]  ;;  %v6618_v13 = vld [vmem:[#allocation47_spill] sm:$0xff] }
  0xe1   : > { %1493 = vmatmul.f32.gmra.mxu1 %v4663_v29  ;;  %1624 = vmatpush.msra.mxu2 %v986_v51  ;;  %v826_v51 = vunpack.c.h.bf16 %v6599_v18 }
  0xe2   : > { %1652 = vmatpush.msra.mxu3 %v1054_v44  ;;  %1566 = vmatpush.msra.mxu0 %v858_v25  ;;  %v6600_v25 = vld [vmem:[#allocation32_spill] sm:$0xff] }
  0xe3   : > { %1594 = vmatpush.msra.mxu1 %v926_v26  ;;  %1625 = vmatpush.msra.mxu2 %v982_v59  ;;  %v1022_v44 = vunpack.c.h.bf16 %v6600_v25  ;;  %v4727_v26 = vld [vmem:[%s4011_s28 + $0xe8] sm:$0xff] }
  0xe4   : > { %1653 = vmatpush.msra.mxu3 %v1050_v19  ;;  %1567 = vmatpush.msra.mxu0 %v854_v37  ;;  %v6601_v59 = vld [vmem:[#allocation30_spill] sm:$0xff]  ;;  %v6602_v19 = vld [vmem:[#allocation35_spill] sm:$0xff] }
  0xe5   : > { %1595 = vmatpush.msra.mxu1 %v922_v33  ;;  %1626 = vmatpush.msra.mxu2 %v978_v38  ;;  %v894_v37 = vunpack.c.h.bf16 %v6601_v59  ;;  %v950_v33 = vunpack.c.h.bf16 %v6602_v19  ;;  %v6603_v38 = vld [vmem:[#allocation33_spill] sm:$0xff]  ;;  %v6624_v19 = vld [vmem:[#allocation56_spill] sm:$0xff] }
  0xe6   : > { %1654 = vmatpush.msra.mxu3 %v1046_v45  ;;  %1568 = vmatpush.msra.mxu0 %v850_v34  ;;  %v822_v34 = vunpack.c.h.bf16 %v6603_v38  ;;  %v6604_v45 = vld [vmem:[#allocation36_spill] sm:$0xff]  ;;  %v6625_v38 = vld [vmem:[#allocation57_spill] sm:$0xff] }
  0xe7   : > { %1596 = vmatpush.msra.mxu1 %v918_v41  ;;  %1467 = vmatmul.f32.gmra.mxu0 %v4678_v42  ;;  %v1018_v41 = vunpack.c.h.bf16 %v6604_v45  ;;  %v6626_v45 = vld [vmem:[#allocation55_spill] sm:$0xff] }
  0xe8   : > { %1525 = vmatmul.f32.gmra.mxu2 %v4683_v54  ;;  %1655 = vmatpush.msra.mxu3 %v1042_v46  ;;  %v6605_v46 = vld [vmem:[#allocation34_spill] sm:$0xff] }
  0xe9   : > { %1627 = vmatpush.msra.mxu2 %v974_v49  ;;  %1569 = vmatpush.msra.mxu0 %v846_v53  ;;  %v890_v53 = vunpack.c.h.bf16 %v6605_v46  ;;  %v6606_v49 = vld [vmem:[#allocation39_spill] sm:$0xff] }
  0xea   : > { %1597 = vmatpush.msra.mxu1 %v914_v50  ;;  %1554 = vmatmul.f32.gmra.mxu3 %v4689_v62  ;;  %v946_v50 = vunpack.c.h.bf16 %v6606_v49 }
  0xeb   : > { %1496 = vmatmul.f32.gmra.mxu1 %v4695_v61  ;;  %1628 = vmatpush.msra.mxu2 %v970_v35  ;;  %v6607_v35 = vld [vmem:[#allocation37_spill] sm:$0xff] }
  0xec   : > { %1656 = vmatpush.msra.mxu3 %v1038_v48  ;;  %1570 = vmatpush.msra.mxu0 %v842_v57  ;;  %v818_v57 = vunpack.c.h.bf16 %v6607_v35  ;;  %v6608_v48 = vld [vmem:[#allocation40_spill] sm:$0xff] }
  0xed   : > { %1598 = vmatpush.msra.mxu1 %v910_v58  ;;  %1629 = vmatpush.msra.mxu2 %v966_v52  ;;  %v1014_v58 = vunpack.c.h.bf16 %v6608_v48  ;;  %v6609_v52 = vld [vmem:[#allocation38_spill] sm:$0xff] }
  0xee   : > { %1657 = vmatpush.msra.mxu3 %v1034_v2  ;;  %1571 = vmatpush.msra.mxu0 %v838_v14  ;;  %v886_v14 = vunpack.c.h.bf16 %v6609_v52  ;;  %v6610_v2 = vld [vmem:[#allocation43_spill] sm:$0xff] }
  0xef   : > { %1599 = vmatpush.msra.mxu1 %v906_v4  ;;  %1630 = vmatpush.msra.mxu2 %v962_v15  ;;  %v1010_v4 = vunpack.c.h.bf16 %v6610_v2  ;;  %v6611_v15 = vld [vmem:[#allocation41_spill] sm:$0xff] }
  0xf0   : > { %1658 = vmatpush.msra.mxu3 %v1030_v1  ;;  %1572 = vmatpush.msra.mxu0 %v834_v31  ;;  %v1262_v5 = vunpack.c.h.bf16 %v6611_v15  ;;  %v6612_v31 = vld [vmem:[#allocation42_spill] sm:$0xff]  ;;  %v6613_v1 = vld [vmem:[#allocation44_spill] sm:$0xff] }
  0xf1   : > { %1600 = vmatpush.msra.mxu1 %v902_v32  ;;  %1470 = vmatmul.f32.gmra.mxu0 %v4710_v24  ;;  %v882_v10 = vunpack.c.h.bf16 %v6612_v31  ;;  %v1134_v23 = vunpack.c.h.bf16 %v6613_v1  ;;  %v6614_v32 = vld [vmem:[#allocation46_spill] sm:$0xff]  ;;  %v6636_v1 = vld [vmem:[#allocation68_spill] sm:$0xff] }
  0xf2   : > { %1528 = vmatmul.f32.gmra.mxu2 %v4715_v6  ;;  %1659 = vmatpush.msra.mxu3 %v1026_v7  ;;  %v1258_v63 = vunpack.c.h.bf16 %v6614_v32  ;;  %v6615_v7 = vld [vmem:[#allocation45_spill] sm:$0xff] }
  0xf3   : > { %1631 = vmatpush.msra.mxu2 %v958_v8  ;;  %1573 = vmatpush.msra.mxu0 %v830_v56  ;;  %v1326_v56 = vunpack.c.h.bf16 %v6616_v47  ;;  %v1130_v8 = vunpack.c.h.bf16 %v6617_v3  ;;  %v6637_v32 = vld [vmem:[#allocation69_spill] sm:$0xff]  ;;  %v6639_v47 = vld [vmem:[#allocation70_spill] sm:$0xff]  ;;  %v6640_v3 = vld [vmem:[#allocation71_spill] sm:$0xff] }
  0xf4   : > { %1601 = vmatpush.msra.mxu1 %v898_v11  ;;  %1557 = vmatmul.f32.gmra.mxu3 %v4721_v17  ;;  %v6619_v11 = vld [vmem:[#allocation50_spill] sm:$0xff] }
  0xf5   : > { %1499 = vmatmul.f32.gmra.mxu1 %v4727_v26  ;;  %1632 = vmatpush.msra.mxu2 %v954_v21  ;;  %v1198_v16 = vunpack.c.h.bf16 %v6619_v11  ;;  %v6620_v21 = vld [vmem:[#allocation51_spill] sm:$0xff] }
  0xf6   : > { %1660 = vmatpush.msra.mxu3 %v1022_v44  ;;  %1574 = vmatpush.msra.mxu0 %v826_v51  ;;  %v1254_v18 = vunpack.c.h.bf16 %v6620_v21  ;;  %v6621_v51 = vld [vmem:[#allocation53_spill] sm:$0xff]  ;;  %v6622_v44 = vld [vmem:[#allocation54_spill] sm:$0xff] }
  0xf7   : > { %1602 = vmatpush.msra.mxu1 %v894_v37  ;;  %1633 = vmatpush.msra.mxu2 %v950_v33  ;;  %v1322_v25 = vunpack.c.h.bf16 %v6621_v51  ;;  %v1126_v59 = vunpack.c.h.bf16 %v6622_v44  ;;  %v6623_v37 = vld [vmem:[#allocation52_spill] sm:$0xff]  ;;  %v1194_v33 = vunpack.c.h.bf16 %v6624_v19  ;;  %v6645_v44 = vld [vmem:[#allocation77_spill] sm:$0xff]  ;;  %v6647_v19 = vld [vmem:[#allocation78_spill] sm:$0xff] }
  0xf8   : > { %1661 = vmatpush.msra.mxu3 %v1018_v41  ;;  %1575 = vmatpush.msra.mxu0 %v822_v34  ;;  %v1250_v34 = vunpack.c.h.bf16 %v6625_v38  ;;  %v6627_v41 = vld [vmem:[#allocation58_spill] sm:$0xff]  ;;  %v6644_v51 = vld [vmem:[#allocation76_spill] sm:$0xff]  ;;  %v6648_v38 = vld [vmem:[#allocation79_spill] sm:$0xff] }
  0xf9   : > { %1603 = vmatpush.msra.mxu1 %v890_v53  ;;  %1634 = vmatpush.msra.mxu2 %v946_v50  ;;  %v1318_v46 = vunpack.c.h.bf16 %v6627_v41  ;;  %v6628_v53 = vld [vmem:[#allocation59_spill] sm:$0xff]  ;;  %v6629_v50 = vld [vmem:[#allocation60_spill] sm:$0xff] }
  0xfa   : > { %1662 = vmatpush.msra.mxu3 %v1014_v58  ;;  %1576 = vmatpush.msra.mxu0 %v818_v57  ;;  %v1122_v49 = vunpack.c.h.bf16 %v6628_v53  ;;  %v1190_v35 = vunpack.c.h.bf16 %v6629_v50  ;;  %v6630_v57 = vld [vmem:[#allocation61_spill] sm:$0xff]  ;;  %v6631_v58 = vld [vmem:[#allocation62_spill] sm:$0xff] }
  0xfb   : > { %1604 = vmatpush.msra.mxu1 %v886_v14  ;;  %1577 = vmatmul.f32.vlgmr.msra.gmra.mxu0 %v6615_v7  ;;  %v1314_v48 = vunpack.c.h.bf16 %v6630_v57  ;;  %v1246_v52 = vunpack.c.h.bf16 %v6631_v58  ;;  %v6632_v14 = vld [vmem:[#allocation63_spill] sm:$0xff] }
  0xfc   : > { %1635 = vmatmul.f32.vlgmr.msra.gmra.mxu2 %v6618_v13  ;;  %1663 = vmatpush.msra.mxu3 %v1010_v4  ;;  %v1118_v2 = vunpack.c.h.bf16 %v6632_v14  ;;  %v6633_v4 = vld [vmem:[#allocation64_spill] sm:$0xff]  ;;  %v6638_v7 = vld [vmem:[#allocation67_spill] sm:$0xff]  ;;  %v6641_v13 = vld [vmem:[#allocation73_spill] sm:$0xff] }
  0xfd   : > { %1735 = vmatpush.msrb.mxu2 %v1262_v5  ;;  %1605 = vmatpush.msra.mxu1 %v882_v10  ;;  %v1186_v15 = vunpack.c.h.bf16 %v6633_v4  ;;  %v6634_v5 = vld [vmem:[#allocation66_spill] sm:$0xff]  ;;  %v6635_v10 = vld [vmem:[#allocation65_spill] sm:$0xff]  ;;  %v1306_v11 = vunpack.c.h.bf16 %v6641_v13  ;;  %v6656_v4 = vld [vmem:[#allocation88_spill] sm:$0xff] }
  0xfe   : > { %1677 = vmatpush.msrb.mxu0 %v1134_v23  ;;  %1606 = vmatmul.f32.vlgmr.msra.gmra.mxu1 %v6623_v37  ;;  %v1242_v31 = vunpack.c.h.bf16 %v6634_v5  ;;  %v1310_v23 = vunpack.c.h.bf16 %v6636_v1  ;;  %v6646_v37 = vld [vmem:[#allocation75_spill] sm:$0xff]  ;;  %v6657_v5 = vld [vmem:[#allocation89_spill] sm:$0xff]  ;;  %v6659_v1 = vld [vmem:[#allocation90_spill] sm:$0xff] }
  0xff   : > { %1664 = vmatmul.f32.vlgmr.msra.gmra.mxu3 %v6626_v45  ;;  %1736 = vmatpush.msrb.mxu2 %v1258_v63  ;;  %v1114_v63 = vunpack.c.h.bf16 %v6637_v32  ;;  %v6649_v45 = vld [vmem:[#allocation80_spill] sm:$0xff]  ;;  %v6660_v32 = vld [vmem:[#allocation91_spill] sm:$0xff] }
 0x100   : > { %1764 = vmatpush.msrb.mxu3 %v1326_v56  ;;  %1678 = vmatpush.msrb.mxu0 %v1130_v8  ;;  %v1182_v56 = vunpack.c.h.bf16 %v6639_v47  ;;  %v1238_v8 = vunpack.c.h.bf16 %v6640_v3  ;;  %v1174_v41 = vunpack.c.h.bf16 %v6649_v45  ;;  %v6664_v13 = vld [vmem:[#allocation96_spill] sm:$0xff] }
 0x101   : > { %1706 = vmatpush.msrb.mxu1 %v1198_v16  ;;  %1737 = vmatpush.msrb.mxu2 %v1254_v18  ;;  %v6642_v16 = vld [vmem:[#allocation74_spill] sm:$0xff]  ;;  %v6643_v18 = vld [vmem:[#allocation72_spill] sm:$0xff] }
 0x102   : > { %1765 = vmatpush.msrb.mxu3 %v1322_v25  ;;  %1679 = vmatpush.msrb.mxu0 %v1126_v59  ;;  %v1110_v21 = vunpack.c.h.bf16 %v6642_v16  ;;  %v1178_v25 = vunpack.c.h.bf16 %v6644_v51  ;;  %v1234_v59 = vunpack.c.h.bf16 %v6645_v44  ;;  %v6665_v16 = vld [vmem:[#allocation97_spill] sm:$0xff]  ;;  %v6667_v51 = vld [vmem:[#allocation98_spill] sm:$0xff]  ;;  %v6668_v44 = vld [vmem:[#allocation99_spill] sm:$0xff] }
 0x103   : > { %1707 = vmatpush.msrb.mxu1 %v1194_v33  ;;  %1738 = vmatpush.msrb.mxu2 %v1250_v34  ;;  %v1302_v33 = vunpack.c.h.bf16 %v6647_v19  ;;  %v1106_v34 = vunpack.c.h.bf16 %v6648_v38 }
 0x104   : > { %1766 = vmatpush.msrb.mxu3 %v1318_v46  ;;  %1680 = vmatpush.msrb.mxu0 %v1122_v49  ;;  %v6650_v46 = vld [vmem:[#allocation81_spill] sm:$0xff]  ;;  %v6651_v49 = vld [vmem:[#allocation82_spill] sm:$0xff] }
 0x105   : > { %1708 = vmatpush.msrb.mxu1 %v1190_v35  ;;  %1580 = vmatmul.f32.gmra.mxu0 %v6635_v10  ;;  %v1298_v53 = vunpack.c.h.bf16 %v6650_v46  ;;  %v1230_v50 = vunpack.c.h.bf16 %v6651_v49  ;;  %v6652_v35 = vld [vmem:[#allocation83_spill] sm:$0xff] }
 0x106   : > { %1638 = vmatmul.f32.gmra.mxu2 %v6638_v7  ;;  %1767 = vmatpush.msrb.mxu3 %v1314_v48  ;;  %v1102_v57 = vunpack.c.h.bf16 %v6652_v35  ;;  %v6653_v48 = vld [vmem:[#allocation84_spill] sm:$0xff]  ;;  %v6658_v10 = vld [vmem:[#allocation87_spill] sm:$0xff]  ;;  %v6661_v7 = vld [vmem:[#allocation93_spill] sm:$0xff] }
 0x107   : > { %1739 = vmatpush.msrb.mxu2 %v1246_v52  ;;  %1681 = vmatpush.msrb.mxu0 %v1118_v2  ;;  %v1170_v58 = vunpack.c.h.bf16 %v6653_v48  ;;  %v6654_v52 = vld [vmem:[#allocation86_spill] sm:$0xff]  ;;  %v6655_v2 = vld [vmem:[#allocation85_spill] sm:$0xff]  ;;  %v1290_v47 = vunpack.c.h.bf16 %v6661_v7  ;;  %v6676_v48 = vld [vmem:[#allocation108_spill] sm:$0xff] }
 0x108   : > { %1709 = vmatpush.msrb.mxu1 %v1186_v15  ;;  %1667 = vmatmul.f32.gmra.mxu3 %v6643_v18  ;;  %v1226_v14 = vunpack.c.h.bf16 %v6654_v52  ;;  %v1294_v15 = vunpack.c.h.bf16 %v6656_v4  ;;  %v6666_v18 = vld [vmem:[#allocation95_spill] sm:$0xff]  ;;  %v6677_v52 = vld [vmem:[#allocation109_spill] sm:$0xff]  ;;  %v1150_v4 = vunpack.c.h.bf16 %v4558_v60  ;;  %v1270_v60 = vunpack.c.h.bf16 %v4589_v28 }
 0x109   : > { %1609 = vmatmul.f32.gmra.mxu1 %v6646_v37  ;;  %1740 = vmatpush.msrb.mxu2 %v1242_v31  ;;  %v1098_v31 = vunpack.c.h.bf16 %v6657_v5  ;;  %v6669_v37 = vld [vmem:[#allocation100_spill] sm:$0xff]  ;;  %v4828_v28 = vld [vmem:[%s4019_s21 + $0x2e8] sm:$0xff] }
 0x10a   : > { %1768 = vmatpush.msrb.mxu3 %v1310_v23  ;;  %1682 = vmatpush.msrb.mxu0 %v1114_v63  ;;  %v1166_v23 = vunpack.c.h.bf16 %v6659_v1  ;;  %v1222_v63 = vunpack.c.h.bf16 %v6660_v32  ;;  %v1158_v19 = vunpack.c.h.bf16 %v6669_v37  ;;  %v1146_v32 = vunpack.c.h.bf16 %v4581_v40  ;;  %v4824_v40 = vld [vmem:[%s4019_s21 + $0xf8] sm:$0xff] }
 0x10b   : > { %1710 = vmatpush.msrb.mxu1 %v1182_v56  ;;  %1741 = vmatpush.msrb.mxu2 %v1238_v8  ;;  %v6662_v56 = vld [vmem:[#allocation94_spill] sm:$0xff]  ;;  %v6663_v8 = vld [vmem:[#allocation92_spill] sm:$0xff] }
 0x10c   : > { %1769 = vmatpush.msrb.mxu3 %v1306_v11  ;;  %1683 = vmatpush.msrb.mxu0 %v1110_v21  ;;  %v1094_v3 = vunpack.c.h.bf16 %v6662_v56  ;;  %v1162_v11 = vunpack.c.h.bf16 %v6664_v13  ;;  %v1218_v21 = vunpack.c.h.bf16 %v6665_v16  ;;  %v6684_v56 = vld [vmem:[#allocation115_spill] sm:$0xff]  ;;  %v1266_v13 = vunpack.c.h.bf16 %v4604_v0 }
 0x10d   : > { %1711 = vmatpush.msrb.mxu1 %v1178_v25  ;;  %1742 = vmatpush.msrb.mxu2 %v1234_v59  ;;  %v1286_v25 = vunpack.c.h.bf16 %v6667_v51  ;;  %v1090_v59 = vunpack.c.h.bf16 %v6668_v44  ;;  %v4833_v16 = vld [vmem:[%s4019_s21 + $0x3f8] sm:$0xff]  ;;  %v879_v0 = vunpack.c.l.bf16 %v4824_v40 }
 0x10e   : > { %1770 = vmatpush.msrb.mxu3 %v1302_v33  ;;  %1684 = vmatpush.msrb.mxu0 %v1106_v34  ;;  %v6670_v33 = vld [vmem:[#allocation101_spill] sm:$0xff]  ;;  %v6671_v34 = vld [vmem:[#allocation102_spill] sm:$0xff]  ;;  %v4843_v51 = vld [vmem:[%s4019_s21 + $0x2d8] sm:$0xff] }
 0x10f   : > { %1712 = vmatpush.msrb.mxu1 %v1174_v41  ;;  %1583 = vmatmul.f32.gmra.mxu0 %v6655_v2  ;;  %v1282_v38 = vunpack.c.h.bf16 %v6670_v33  ;;  %v1214_v45 = vunpack.c.h.bf16 %v6671_v34  ;;  %v6672_v41 = vld [vmem:[#allocation103_spill] sm:$0xff]  ;;  %v4860_v33 = vld [vmem:[%s4019_s21 + $0x2c8] sm:$0xff] }
 0x110   : > { %1641 = vmatmul.f32.gmra.mxu2 %v6658_v10  ;;  %1771 = vmatpush.msrb.mxu3 %v1298_v53  ;;  %v1086_v46 = vunpack.c.h.bf16 %v6672_v41  ;;  %v6673_v53 = vld [vmem:[#allocation104_spill] sm:$0xff]  ;;  %v6678_v2 = vld [vmem:[#allocation107_spill] sm:$0xff] }
 0x111   : > { %1743 = vmatpush.msrb.mxu2 %v1230_v50  ;;  %1685 = vmatpush.msrb.mxu0 %v1102_v57  ;;  %v1154_v49 = vunpack.c.h.bf16 %v6673_v53  ;;  %v6674_v50 = vld [vmem:[#allocation106_spill] sm:$0xff]  ;;  %v6675_v57 = vld [vmem:[#allocation105_spill] sm:$0xff]  ;;  %v6680_v10 = vld [vmem:[#allocation112_spill] sm:$0xff] }
 0x112   : > { %1713 = vmatpush.msrb.mxu1 %v1170_v58  ;;  %1670 = vmatmul.f32.gmra.mxu3 %v6663_v8  ;;  %v1210_v35 = vunpack.c.h.bf16 %v6674_v50  ;;  %v1278_v58 = vunpack.c.h.bf16 %v6676_v48  ;;  %v1078_v1 = vunpack.c.h.bf16 %v6680_v10  ;;  %v1142_v8 = vunpack.c.h.bf16 %v4598_v39  ;;  %v4851_v44 = vld [vmem:[%s4019_s21 + $0xd8] sm:$0xff]  ;;  %v4880_v50 = vld [vmem:[%s4019_s21 + $0x3c8] sm:$0xff] }
 0x113   : > { %1612 = vmatmul.f32.gmra.mxu1 %v6666_v18  ;;  %1744 = vmatpush.msrb.mxu2 %v1226_v14  ;;  %v1082_v14 = vunpack.c.h.bf16 %v6677_v52  ;;  %v4840_v18 = vld [vmem:[%s4019_s21 + $0x1f8] sm:$0xff]  ;;  %v871_v41 = vunpack.c.l.bf16 %v4851_v44  ;;  %v4894_v52 = vld [vmem:[%s4019_s21 + $0x1c8] sm:$0xff] }
 0x114   : > { %1772 = vmatpush.msrb.mxu3 %v1294_v15  ;;  %1686 = vmatpush.msrb.mxu0 %v1098_v31  ;;  %v6679_v15 = vld [vmem:[#allocation110_spill] sm:$0xff]  ;;  %v1274_v31 = vunpack.c.h.bf16 %v4569_v9  ;;  %v4820_v9 = vld [vmem:[%s4019_s21 + $0x2f8] sm:$0xff]  ;;  %v931_v10 = vunpack.c.l.bf16 %v4894_v52 }
 0x115   : > { %1714 = vmatpush.msrb.mxu1 %v1166_v23  ;;  %1745 = vmatpush.msrb.mxu2 %v1222_v63  ;;  %v1206_v5 = vunpack.c.h.bf16 %v6679_v15  ;;  %v6681_v23 = vld [vmem:[#allocation111_spill] sm:$0xff]  ;;  %v6682_v63 = vld [vmem:[#allocation114_spill] sm:$0xff]  ;;  %v1007_v39 = vunpack.c.l.bf16 %v4820_v9 }
 0x116   : > { %1773 = vmatpush.msrb.mxu3 %v1290_v47  ;;  %1687 = vmatpush.msrb.mxu0 %v1094_v3  ;;  %v1202_v7 = vunpack.c.h.bf16 %v6682_v63  ;;  %v6683_v47 = vld [vmem:[#allocation113_spill] sm:$0xff]  ;;  %v1074_v3 = vunpack.c.h.bf16 %v6684_v56  ;;  %v4865_v34 = vld [vmem:[%s4019_s21 + $0x3d8] sm:$0xff] }
 0x117   : > { %1715 = vmatpush.msrb.mxu1 %v1162_v11  ;;  %1746 = vmatpush.msrb.mxu2 %v1218_v21  ;;  %v1138_v11 = vunpack.c.h.bf16 %v4609_v20  ;;  %v4836_v21 = vld [vmem:[%s4019_s21 + $0xe8] sm:$0xff]  ;;  %v1003_v20 = vunpack.c.l.bf16 %v4828_v28  ;;  %v4888_v48 = vld [vmem:[%s4019_s21 + $0xb8] sm:$0xff] }
 0x118   : > { %1774 = vmatpush.msrb.mxu3 %v1286_v25  ;;  %1688 = vmatpush.msrb.mxu0 %v1090_v59  ;;  %v4848_v25 = vld [vmem:[%s4019_s21 + $0x3e8] sm:$0xff]  ;;  %v1071_v59 = vunpack.c.l.bf16 %v4833_v16  ;;  %v875_v37 = vunpack.c.l.bf16 %v4836_v21  ;;  %v863_v15 = vunpack.c.l.bf16 %v4888_v48 }
 0x119   : > { %1716 = vmatpush.msrb.mxu1 %v1158_v19  ;;  %1586 = vmatmul.f32.gmra.mxu0 %v6675_v57  ;;  %v4857_v19 = vld [vmem:[%s4019_s21 + $0x1e8] sm:$0xff]  ;;  %v4885_v57 = vld [vmem:[%s4019_s21 + $0x2b8] sm:$0xff] }
 0x11a   : > { %1644 = vmatmul.f32.gmra.mxu2 %v6678_v2  ;;  %1775 = vmatpush.msrb.mxu3 %v1282_v38  ;;  %v999_v38 = vunpack.c.l.bf16 %v4843_v51  ;;  %v939_v53 = vunpack.c.l.bf16 %v4857_v19  ;;  %v4898_v2 = vld [vmem:[%s4019_s21 + $0x2a8] sm:$0xff] }
 0x11b   : > { %1747 = vmatpush.msrb.mxu2 %v1214_v45  ;;  %1689 = vmatpush.msrb.mxu0 %v1086_v46  ;;  %v1067_v45 = vunpack.c.l.bf16 %v4848_v25  ;;  %v4874_v46 = vld [vmem:[%s4019_s21 + $0x1d8] sm:$0xff]  ;;  %v987_v63 = vunpack.c.l.bf16 %v4898_v2 }
 0x11c   : > { %1717 = vmatpush.msrb.mxu1 %v1154_v49  ;;  %1673 = vmatmul.f32.gmra.mxu3 %v6681_v23  ;;  %v995_v49 = vunpack.c.l.bf16 %v4860_v33  ;;  %v4913_v23 = vld [vmem:[%s4019_s21 + $0x298] sm:$0xff] }
 0x11d   : > { %1615 = vmatmul.f32.gmra.mxu1 %v6683_v47  ;;  %1748 = vmatpush.msrb.mxu2 %v1210_v35  ;;  %v4923_v47 = vld [vmem:[%s4019_s21 + $0x98] sm:$0xff] }
 0x11e   : > { %1776 = vmatpush.msrb.mxu3 %v1278_v58  ;;  %1690 = vmatpush.msrb.mxu0 %v1082_v14  ;;  %v935_v58 = vunpack.c.l.bf16 %v4874_v46  ;;  %v1059_v14 = vunpack.c.l.bf16 %v4880_v50 }
 0x11f   : > { %1718 = vmatpush.msrb.mxu1 %v1150_v4  ;;  %1749 = vmatpush.msrb.mxu2 %v1206_v5  ;;  %v991_v4 = vunpack.c.l.bf16 %v4885_v57  ;;  %v4903_v5 = vld [vmem:[%s4019_s21 + $0x3b8] sm:$0xff] }
 0x120   : > { %1777 = vmatpush.msrb.mxu3 %v1274_v31  ;;  %1691 = vmatpush.msrb.mxu0 %v1078_v1  ;;  %v4906_v31 = vld [vmem:[%s4019_s21 + $0xa8] sm:$0xff]  ;;  %v4910_v1 = vld [vmem:[%s4019_s21 + $0x1b8] sm:$0xff] }
 0x121   : > { %1719 = vmatpush.msrb.mxu1 %v1146_v32  ;;  %1750 = vmatpush.msrb.mxu2 %v1202_v7  ;;  %v4915_v32 = vpop.f32.mrf.mxu1  ;;  %v4920_v7 = vld [vmem:[%s4019_s21 + $0x3a8] sm:$0xff]  ;;  %v859_v56 = vunpack.c.l.bf16 %v4906_v31 }
 0x122   : > { %1778 = vmatpush.msrb.mxu3 %v1270_v60  ;;  %1692 = vmatpush.msrb.mxu0 %v1074_v3  ;;  %v1055_v60 = vunpack.c.l.bf16 %v4903_v5  ;;  %v4929_v3 = vld [vmem:[%s4019_s21 + $0x1a8] sm:$0xff] }
 0x123   : > { %1720 = vmatpush.msrb.mxu1 %v1142_v8  ;;  %1693 = vmatmul.f32.vlgmr.msrb.gmra.mxu0 %v4613_v43  ;;  %v943_v43 = vunpack.c.l.bf16 %v4840_v18  ;;  %v4932_v8 = vld [vmem:[%s4019_s21 + $0x288] sm:$0xff] }
 0x124   : > { %1751 = vmatmul.f32.vlgmr.msrb.gmra.mxu2 %v4618_v55  ;;  %1779 = vmatpush.msrb.mxu3 %v1266_v13  ;;  %v4868_v55 = vld [vmem:[%s4019_s21 + $0xc8] sm:$0xff]  ;;  %v983_v13 = vunpack.c.l.bf16 %v4913_v23 }
 0x125   : > { %1851 = vmatpush.msra.mxu2 %v1007_v39  ;;  %1721 = vmatpush.msrb.mxu1 %v1138_v11  ;;  %v867_v35 = vunpack.c.l.bf16 %v4868_v55  ;;  %v4937_v11 = vld [vmem:[%s4019_s21 + $0x398] sm:$0xff]  ;;  %v1051_v39 = vunpack.c.l.bf16 %v4920_v7 }
 0x126   : > { %1793 = vmatpush.msra.mxu0 %v879_v0  ;;  %1722 = vmatmul.f32.vlgmr.msrb.gmra.mxu1 %v4625_v27  ;;  %v1063_v27 = vunpack.c.l.bf16 %v4865_v34  ;;  %v855_v0 = vunpack.c.l.bf16 %v4923_v47 }
 0x127   : > { %1780 = vmatmul.f32.vlgmr.msrb.gmra.mxu3 %v4631_v36  ;;  %1852 = vmatpush.msra.mxu2 %v1003_v20  ;;  %v4890_v36 = vpop.f32.mrf.mxu0  ;;  %v4946_v20 = vld [vmem:[%s4019_s21 + $0x198] sm:$0xff] }
 0x128   : > { %1880 = vmatpush.msra.mxu3 %v1071_v59  ;;  %1794 = vmatpush.msra.mxu0 %v875_v37  ;;  %v4948_v59 = vpop.f32.mrf.mxu2  ;;  %v923_v37 = vunpack.c.l.bf16 %v4929_v3 }
 0x129   : > { %1822 = vmatpush.msra.mxu1 %v943_v43  ;;  %1853 = vmatpush.msra.mxu2 %v999_v38  ;;  %v979_v43 = vunpack.c.l.bf16 %v4932_v8  ;;  %v4954_v38 = vld [vmem:[%s4019_s21 + $0x388] sm:$0xff] }
 0x12a   : > { %1881 = vmatpush.msra.mxu3 %v1067_v45  ;;  %1795 = vmatpush.msra.mxu0 %v871_v41  ;;  %v4959_v41 = vld [vmem:[%s4019_s21 + $0x278] sm:$0xff] }
 0x12b   : > { %1823 = vmatpush.msra.mxu1 %v939_v53  ;;  %1854 = vmatpush.msra.mxu2 %v995_v49  ;;  %6685 = vst [vmem:[#allocation22_spill] sm:$0xff] %v4959_v41  ;;  %v4962_v53 = vld [vmem:[%s4019_s21 + $0x78] sm:$0xff]  ;;  %v4966_v49 = vpop.f32.mrf.mxu3 }
 0x12c   : > { %1882 = vmatpush.msra.mxu3 %v1063_v27  ;;  %1796 = vmatpush.msra.mxu0 %v867_v35  ;;  %6686 = vst [vmem:[#allocation24_spill] sm:$0xff] %v4962_v53  ;;  %v919_v27 = vunpack.c.l.bf16 %v4946_v20  ;;  %v4970_v35 = vld [vmem:[%s4019_s21 + $0x188] sm:$0xff] }
 0x12d   : > { %1824 = vmatpush.msra.mxu1 %v935_v58  ;;  %1696 = vmatmul.f32.gmra.mxu0 %v4646_v12  ;;  %v927_v12 = vunpack.c.l.bf16 %v4910_v1  ;;  %6687 = vst [vmem:[#allocation23_spill] sm:$0xff] %v4970_v35  ;;  %v1043_v58 = vunpack.c.l.bf16 %v4954_v38 }
 0x12e   : > { %1754 = vmatmul.f32.gmra.mxu2 %v4651_v22  ;;  %1883 = vmatpush.msra.mxu3 %v1059_v14  ;;  %v4940_v22 = vld [vmem:[%s4019_s21 + $0x88] sm:$0xff] }
 0x12f   : > { %1855 = vmatpush.msra.mxu2 %v991_v4  ;;  %1797 = vmatpush.msra.mxu0 %v863_v15  ;;  %v851_v45 = vunpack.c.l.bf16 %v4940_v22  ;;  %v4974_v14 = vld [vmem:[%s4019_s21 + $0x268] sm:$0xff]  ;;  %v975_v4 = vunpack.c.l.bf16 %v4959_v41  ;;  %v847_v15 = vunpack.c.l.bf16 %v4962_v53  ;;  %v5202_v53 = vld [vmem:[%s4019_s21 + $0x6b8] sm:$0xff] }
 0x130   : > { %1825 = vmatpush.msra.mxu1 %v931_v10  ;;  %1783 = vmatmul.f32.gmra.mxu3 %v4657_v30  ;;  %v1047_v30 = vunpack.c.l.bf16 %v4937_v11  ;;  %6688 = vst [vmem:[#allocation28_spill] sm:$0xff] %v4974_v14  ;;  %v4979_v10 = vld [vmem:[%s4019_s21 + $0x378] sm:$0xff] }
 0x131   : > { %1725 = vmatmul.f32.gmra.mxu1 %v4663_v29  ;;  %1856 = vmatpush.msra.mxu2 %v987_v63  ;;  %v4964_v29 = vpop.f32.mrf.mxu0  ;;  %6689 = vst [vmem:[#allocation25_spill] sm:$0xff] %v4979_v10  ;;  %v4982_v63 = vld [vmem:[%s4019_s21 + $0x68] sm:$0xff]  ;;  %v5205_v41 = vld [vmem:[%s4019_s21 + $0x4b8] sm:$0xff] }
 0x132   : > { %1884 = vmatpush.msra.mxu3 %v1055_v60  ;;  %1798 = vmatpush.msra.mxu0 %v859_v56  ;;  %6690 = vst [vmem:[#allocation27_spill] sm:$0xff] %v4982_v63  ;;  %v915_v60 = vunpack.c.l.bf16 %v4970_v35  ;;  %v4986_v56 = vld [vmem:[%s4019_s21 + $0x178] sm:$0xff] }
 0x133   : > { %1826 = vmatpush.msra.mxu1 %v927_v12  ;;  %1857 = vmatpush.msra.mxu2 %v983_v13  ;;  %6691 = vst [vmem:[#allocation26_spill] sm:$0xff] %v4986_v56  ;;  %v4989_v12 = vld [vmem:[%s4019_s21 + $0x258] sm:$0xff]  ;;  %v4991_v13 = vpop.f32.mrf.mxu1 }
 0x134   : > { %1885 = vmatpush.msra.mxu3 %v1051_v39  ;;  %1799 = vmatpush.msra.mxu0 %v855_v0  ;;  %6692 = vst [vmem:[#allocation31_spill] sm:$0xff] %v4989_v12  ;;  %v971_v39 = vunpack.c.l.bf16 %v4974_v14  ;;  %v4996_v0 = vld [vmem:[%s4019_s21 + $0x368] sm:$0xff]  ;;  %v967_v14 = vunpack.c.l.bf16 %v4989_v12  ;;  %v5013_v35 = vld [vmem:[%s4019_s21 + $0x358] sm:$0xff] }
 0x135   : > { %1827 = vmatpush.msra.mxu1 %v923_v37  ;;  %1858 = vmatpush.msra.mxu2 %v979_v43  ;;  %6693 = vst [vmem:[#allocation29_spill] sm:$0xff] %v4996_v0  ;;  %v4999_v37 = vld [vmem:[%s4019_s21 + $0x58] sm:$0xff]  ;;  %v1039_v43 = vunpack.c.l.bf16 %v4979_v10 }
 0x136   : > { %1886 = vmatpush.msra.mxu3 %v1047_v30  ;;  %1800 = vmatpush.msra.mxu0 %v851_v45  ;;  %6694 = vst [vmem:[#allocation32_spill] sm:$0xff] %v4999_v37  ;;  %v843_v30 = vunpack.c.l.bf16 %v4982_v63  ;;  %v5005_v45 = vld [vmem:[%s4019_s21 + $0x168] sm:$0xff]  ;;  %v839_v63 = vunpack.c.l.bf16 %v4999_v37  ;;  %v5038_v10 = vld [vmem:[%s4019_s21 + $0x38] sm:$0xff] }
 0x137   : > { %1828 = vmatpush.msra.mxu1 %v919_v27  ;;  %1699 = vmatmul.f32.gmra.mxu0 %v4678_v42  ;;  %6695 = vst [vmem:[#allocation30_spill] sm:$0xff] %v5005_v45  ;;  %v5008_v27 = vld [vmem:[%s4019_s21 + $0x248] sm:$0xff]  ;;  %v911_v42 = vunpack.c.l.bf16 %v4986_v56  ;;  %v907_v12 = vunpack.c.l.bf16 %v5005_v45  ;;  %v5089_v45 = vld [vmem:[%s4019_s21 + $0x318] sm:$0xff] }
 0x138   : > { %1757 = vmatmul.f32.gmra.mxu2 %v4683_v54  ;;  %1887 = vmatpush.msra.mxu3 %v1043_v58  ;;  %6696 = vst [vmem:[#allocation35_spill] sm:$0xff] %v5008_v27  ;;  %v5016_v54 = vld [vmem:[%s4019_s21 + $0x48] sm:$0xff]  ;;  %v1035_v58 = vunpack.c.l.bf16 %v4996_v0  ;;  %v963_v56 = vunpack.c.l.bf16 %v5008_v27  ;;  %v5035_v0 = vld [vmem:[%s4019_s21 + $0x238] sm:$0xff] }
 0x139   : > { %1859 = vmatpush.msra.mxu2 %v975_v4  ;;  %1801 = vmatpush.msra.mxu0 %v847_v15  ;;  %6697 = vst [vmem:[#allocation33_spill] sm:$0xff] %v5013_v35  ;;  %v5022_v4 = vld [vmem:[%s4019_s21 + $0x158] sm:$0xff]  ;;  %v5024_v15 = vpop.f32.mrf.mxu2  ;;  %v835_v37 = vunpack.c.l.bf16 %v5016_v54  ;;  %v959_v27 = vunpack.c.l.bf16 %v5035_v0 }
 0x13a   : > { %6698 = vst [vmem:[#allocation36_spill] sm:$0xff] %v5016_v54  ;;  %1829 = vmatpush.msra.mxu1 %v915_v60  ;;  %1786 = vmatmul.f32.gmra.mxu3 %v4689_v62  ;;  %v5030_v60 = vld [vmem:[%s4019_s21 + $0x348] sm:$0xff]  ;;  %v1031_v62 = vunpack.c.l.bf16 %v5013_v35 }
 0x13b   : > { %6699 = vst [vmem:[#allocation34_spill] sm:$0xff] %v5022_v4  ;;  %1728 = vmatmul.f32.gmra.mxu1 %v4695_v61  ;;  %1860 = vmatpush.msra.mxu2 %v971_v39  ;;  %v5040_v61 = vpop.f32.mrf.mxu0  ;;  %v5042_v39 = vpop.f32.mrf.mxu3  ;;  %v1027_v54 = vunpack.c.l.bf16 %v5030_v60  ;;  %v5050_v35 = vld [vmem:[%s4019_s21 + $0x228] sm:$0xff] }
 0x13c   : > { %6700 = vst [vmem:[#allocation39_spill] sm:$0xff] %v5030_v60  ;;  %1888 = vmatpush.msra.mxu3 %v1039_v43  ;;  %1802 = vmatpush.msra.mxu0 %v843_v30  ;;  %v903_v43 = vunpack.c.l.bf16 %v5022_v4  ;;  %v5046_v30 = vld [vmem:[%s4019_s21 + $0x148] sm:$0xff]  ;;  %v5065_v60 = vld [vmem:[%s4019_s21 + $0x218] sm:$0xff] }
 0x13d   : > { %6701 = vst [vmem:[#allocation37_spill] sm:$0xff] %v5035_v0  ;;  %1830 = vmatpush.msra.mxu1 %v911_v42  ;;  %1861 = vmatpush.msra.mxu2 %v967_v14  ;;  %v831_v14 = vunpack.c.l.bf16 %v5038_v10  ;;  %v5055_v42 = vld [vmem:[%s4019_s21 + $0x338] sm:$0xff]  ;;  %v5058_v4 = vld [vmem:[%s4019_s21 + $0x28] sm:$0xff] }
 0x13e   : > { %6702 = vst [vmem:[#allocation40_spill] sm:$0xff] %v5038_v10  ;;  %1889 = vmatpush.msra.mxu3 %v1035_v58  ;;  %1803 = vmatpush.msra.mxu0 %v839_v63  ;;  %v899_v63 = vunpack.c.l.bf16 %v5046_v30  ;;  %v5062_v58 = vld [vmem:[%s4019_s21 + $0x138] sm:$0xff]  ;;  %v5072_v10 = vld [vmem:[%s4019_s21 + $0x328] sm:$0xff] }
 0x13f   : > { %6703 = vst [vmem:[#allocation38_spill] sm:$0xff] %v5046_v30  ;;  %1831 = vmatpush.msra.mxu1 %v907_v12  ;;  %1862 = vmatpush.msra.mxu2 %v963_v56  ;;  %v5067_v12 = vpop.f32.mrf.mxu1  ;;  %v955_v56 = vunpack.c.l.bf16 %v5050_v35  ;;  %v827_v30 = vunpack.c.l.bf16 %v5058_v4  ;;  %v5081_v0 = vld [vmem:[%s4019_s21 + $0x128] sm:$0xff] }
 0x140   : > { %6704 = vst [vmem:[#allocation43_spill] sm:$0xff] %v5050_v35  ;;  %1890 = vmatpush.msra.mxu3 %v1031_v62  ;;  %1804 = vmatpush.msra.mxu0 %v835_v37  ;;  %v5075_v62 = vld [vmem:[%s4019_s21 + $0x18] sm:$0xff]  ;;  %v1023_v37 = vunpack.c.l.bf16 %v5055_v42  ;;  %v951_v35 = vunpack.c.l.bf16 %v5065_v60 }
 0x141   : > { %6705 = vst [vmem:[#allocation41_spill] sm:$0xff] %v5055_v42  ;;  %1832 = vmatpush.msra.mxu1 %v903_v43  ;;  %1702 = vmatmul.f32.gmra.mxu0 %v4710_v24  ;;  %v5084_v43 = vld [vmem:[%s4019_s21 + $0x208] sm:$0xff]  ;;  %v895_v24 = vunpack.c.l.bf16 %v5062_v58 }
 0x142   : > { %6706 = vst [vmem:[#allocation42_spill] sm:$0xff] %v5058_v4  ;;  %1760 = vmatmul.f32.gmra.mxu2 %v4715_v6  ;;  %1891 = vmatpush.msra.mxu3 %v1027_v54  ;;  %v5092_v6 = vld [vmem:[%s4019_s21 + $0x8] sm:$0xff]  ;;  %v1019_v54 = vunpack.c.l.bf16 %v5072_v10  ;;  %v823_v4 = vunpack.c.l.bf16 %v5075_v62 }
 0x143   : > { %6707 = vst [vmem:[#allocation44_spill] sm:$0xff] %v5062_v58  ;;  %1863 = vmatpush.msra.mxu2 %v959_v27  ;;  %1805 = vmatpush.msra.mxu0 %v831_v14  ;;  %v5098_v27 = vld [vmem:[%s4019_s21 + $0x118] sm:$0xff]  ;;  %v5100_v14 = vpop.f32.mrf.mxu2  ;;  %v947_v58 = vunpack.c.l.bf16 %v5084_v43  ;;  %v5114_v42 = vld [vmem:[%s4019_s21 + $0x108] sm:$0xff] }
 0x144   : > { %6708 = vst [vmem:[#allocation46_spill] sm:$0xff] %v5065_v60  ;;  %1833 = vmatpush.msra.mxu1 %v899_v63  ;;  %1789 = vmatmul.f32.gmra.mxu3 %v4721_v17  ;;  %v891_v60 = vunpack.c.l.bf16 %v5081_v0  ;;  %v5106_v63 = vld [vmem:[%s4019_s21 + $0x308] sm:$0xff]  ;;  %v1015_v17 = vunpack.c.l.bf16 %v5089_v45 }
 0x145   : > { %6709 = vst [vmem:[#allocation45_spill] sm:$0xff] %v5072_v10  ;;  %1731 = vmatmul.f32.gmra.mxu1 %v4727_v26  ;;  %1864 = vmatpush.msra.mxu2 %v955_v56  ;;  %v5111_v10 = vld [vmem:[%s4019_s21 + $0x6f8] sm:$0xff]  ;;  %v5116_v26 = vpop.f32.mrf.mxu0  ;;  %v5118_v56 = vpop.f32.mrf.mxu3 }
 0x146   : > { %6710 = vst [vmem:[#allocation48_spill] sm:$0xff] %v5075_v62  ;;  %1892 = vmatpush.msra.mxu3 %v1023_v37  ;;  %1806 = vmatpush.msra.mxu0 %v827_v30  ;;  %v819_v62 = vunpack.c.l.bf16 %v5092_v6  ;;  %v887_v37 = vunpack.c.l.bf16 %v5098_v27  ;;  %v5122_v30 = vld [vmem:[%s4019_s21 + $0x4f8] sm:$0xff] }
 0x147   : > { %6711 = vst [vmem:[#allocation49_spill] sm:$0xff] %v5081_v0  ;;  %1834 = vmatpush.msra.mxu1 %v895_v24  ;;  %1865 = vmatpush.msra.mxu2 %v951_v35  ;;  %v883_v35 = vunpack.c.l.bf16 %v5114_v42  ;;  %v5131_v24 = vld [vmem:[%s4019_s21 + $0x7f8] sm:$0xff] }
 0x148   : > { %6712 = vst [vmem:[#allocation47_spill] sm:$0xff] %v5084_v43  ;;  %1893 = vmatpush.msra.mxu3 %v1019_v54  ;;  %1807 = vmatpush.msra.mxu0 %v823_v4  ;;  %v1263_v43 = vunpack.c.l.bf16 %v5111_v10  ;;  %v1135_v4 = vunpack.c.l.bf16 %v5122_v30  ;;  %v5138_v54 = vld [vmem:[%s4019_s21 + $0x5f8] sm:$0xff] }
 0x149   : > { %6713 = vst [vmem:[#allocation50_spill] sm:$0xff] %v5089_v45  ;;  %v5126_v45 = vld [vmem:[%s4019_s21 + $0x6e8] sm:$0xff]  ;;  %1835 = vmatpush.msra.mxu1 %v891_v60  ;;  %1866 = vmatpush.msra.mxu2 %v947_v58  ;;  %v5141_v60 = vld [vmem:[%s4019_s21 + $0x6d8] sm:$0xff]  ;;  %v5143_v58 = vpop.f32.mrf.mxu1  ;;  %v1199_v0 = vunpack.c.l.bf16 %v5138_v54 }
 0x14a   : > { %6714 = vst [vmem:[#allocation51_spill] sm:$0xff] %v5092_v6  ;;  %v1011_v6 = vunpack.c.l.bf16 %v5106_v63  ;;  %1894 = vmatpush.msra.mxu3 %v1015_v17  ;;  %1808 = vmatpush.msra.mxu0 %v819_v62  ;;  %v1259_v62 = vunpack.c.l.bf16 %v5126_v45  ;;  %v5153_v17 = vld [vmem:[%s4019_s21 + $0x7e8] sm:$0xff] }
 0x14b   : > { %6715 = vst [vmem:[#allocation53_spill] sm:$0xff] %v5098_v27  ;;  %v5134_v27 = vld [vmem:[%s4019_s21 + $0x4e8] sm:$0xff]  ;;  %1836 = vmatpush.msra.mxu1 %v887_v37  ;;  %1967 = vmatpush.msrb.mxu2 %v1263_v43  ;;  %v1323_v43 = vunpack.c.l.bf16 %v5153_v17 }
 0x14c   : > { %6716 = vst [vmem:[#allocation54_spill] sm:$0xff] %v5106_v63  ;;  %v5159_v63 = vld [vmem:[%s4011_s28 + $0x10] sm:$0xff]  ;;  %1895 = vmatpush.msra.mxu3 %v1011_v6  ;;  %v5165_v37 = vld [vmem:[%s4019_s21 + $0x5e8] sm:$0xff]  ;;  %v5174_v6 = vld [vmem:[%s4019_s21 + $0x7d8] sm:$0xff]  ;;  %1909 = vmatpush.msrb.mxu0 %v1135_v4 }
 0x14d   : > { %6717 = vst [vmem:[#allocation52_spill] sm:$0xff] %v5111_v10  ;;  %v5148_v10 = vld [vmem:[%s4011_s28] sm:$0xff]  ;;  %1867 = vmatmul.f32.vlgmr.msra.gmra.mxu2 %v5159_v63  ;;  %1837 = vmatpush.msra.mxu1 %v883_v35  ;;  %v5188_v35 = vpop.f32.mrf.mxu2  ;;  %v1195_v4 = vunpack.c.l.bf16 %v5165_v37 }
 0x14e   : > { %6718 = vst [vmem:[#allocation56_spill] sm:$0xff] %v5114_v42  ;;  %v1376_v42 = vadd.f32 %v4915_v32, %v4890_v36  ;;  %1809 = vmatmul.f32.vlgmr.msra.gmra.mxu0 %v5148_v10  ;;  %v1327_v36 = vunpack.c.l.bf16 %v5131_v24  ;;  %v1131_v32 = vunpack.c.l.bf16 %v5134_v27  ;;  %1968 = vmatpush.msrb.mxu2 %v1259_v62  ;;  %v5207_v62 = vpop.f32.mrf.mxu3 }
 0x14f   : > { %6719 = vst [vmem:[#allocation57_spill] sm:$0xff] %v5122_v30  ;;  %v5156_v30 = vld [vmem:[%s4019_s21 + $0x4d8] sm:$0xff]  ;;  %1938 = vmatpush.msrb.mxu1 %v1199_v0  ;;  %v1247_v0 = vunpack.c.l.bf16 %v5202_v53 }
 0x150   : > { %6720 = vst [vmem:[#allocation55_spill] sm:$0xff] %v5126_v45  ;;  %v5168_v45 = vld [vmem:[%s4019_s21 + $0x6c8] sm:$0xff]  ;;  %1996 = vmatpush.msrb.mxu3 %v1327_v36  ;;  %1910 = vmatpush.msrb.mxu0 %v1131_v32 }
 0x151   : > { %6721 = vst [vmem:[#allocation58_spill] sm:$0xff] %v5131_v24  ;;  %v5177_v24 = vld [vmem:[%s4019_s21 + $0x4c8] sm:$0xff]  ;;  %1939 = vmatpush.msrb.mxu1 %v1195_v4 }
 0x152   : > { %6722 = vst [vmem:[#allocation59_spill] sm:$0xff] %v5134_v27  ;;  %v5180_v27 = vld [vmem:[%s4011_s28 + $0x8] sm:$0xff]  ;;  %1997 = vmatpush.msrb.mxu3 %v1323_v43 }
 0x153   : > { %6723 = vst [vmem:[#allocation60_spill] sm:$0xff] %v5138_v54  ;;  %1838 = vmatmul.f32.vlgmr.msra.gmra.mxu1 %v5180_v27  ;;  %v1251_v54 = vunpack.c.l.bf16 %v5168_v45  ;;  %v5212_v32 = vld [vmem:[%s4019_s21 + $0x5c8] sm:$0xff] }
 0x154   : > { %6724 = vst [vmem:[#allocation61_spill] sm:$0xff] %v5141_v60 }
 0x155   : > { %6725 = vst [vmem:[#allocation62_spill] sm:$0xff] %v5148_v10  ;;  %v1405_v10 = vadd.f32 %v4948_v59, %v1376_v42  ;;  %v1127_v59 = vunpack.c.l.bf16 %v5156_v30  ;;  %v5186_v42 = vld [vmem:[%s4019_s21 + $0x5d8] sm:$0xff]  ;;  %v1491_v4 = vpop.f32.mrf.mxu1 }
 0x156   : > { %6726 = vst [vmem:[#allocation63_spill] sm:$0xff] %v5153_v17  ;;  %v1123_v17 = vunpack.c.l.bf16 %v5177_v24  ;;  %v1191_v36 = vunpack.c.l.bf16 %v5186_v42 }
 0x157   : > { %6727 = vst [vmem:[#allocation64_spill] sm:$0xff] %v5156_v30  ;;  %v1319_v30 = vunpack.c.l.bf16 %v5174_v6  ;;  %1911 = vmatpush.msrb.mxu0 %v1127_v59  ;;  %v1187_v59 = vunpack.c.l.bf16 %v5212_v32 }
 0x158   : > { %6728 = vst [vmem:[#allocation66_spill] sm:$0xff] %v5159_v63  ;;  %v1255_v63 = vunpack.c.l.bf16 %v5141_v60  ;;  %v5191_v60 = vld [vmem:[%s4011_s28 + $0x18] sm:$0xff]  ;;  %1940 = vmatpush.msrb.mxu1 %v1191_v36  ;;  %v5253_v36 = vld [vmem:[%s4019_s21 + $0x5a8] sm:$0xff] }
 0x159   : > { %6729 = vst [vmem:[#allocation65_spill] sm:$0xff] %v5165_v37  ;;  %1896 = vmatmul.f32.vlgmr.msra.gmra.mxu3 %v5191_v60  ;;  %v1462_v37 = vpop.f32.mrf.mxu0  ;;  %1912 = vmatpush.msrb.mxu0 %v1123_v17  ;;  %v5244_v17 = vld [vmem:[%s4019_s21 + $0x498] sm:$0xff] }
 0x15a   : > { %6730 = vst [vmem:[#allocation68_spill] sm:$0xff] %v5168_v45  ;;  %1969 = vmatpush.msrb.mxu2 %v1255_v63  ;;  %v1434_v45 = vadd.f32 %v4966_v49, %v1405_v10  ;;  %v1119_v49 = vunpack.c.l.bf16 %v5205_v41  ;;  %v5221_v10 = vld [vmem:[%s4019_s21 + $0x7b8] sm:$0xff]  ;;  %v5224_v63 = vld [vmem:[%s4019_s21 + $0x4a8] sm:$0xff]  ;;  %1998 = vmatpush.msrb.mxu3 %v1319_v30 }
 0x15b   : > { %6731 = vst [vmem:[#allocation69_spill] sm:$0xff] %v5174_v6  ;;  %v5216_v6 = vld [vmem:[%s4019_s21 + $0x6a8] sm:$0xff]  ;;  %1941 = vmatpush.msrb.mxu1 %v1187_v59 }
 0x15c   : > { %6732 = vst [vmem:[#allocation67_spill] sm:$0xff] %v5177_v24  ;;  %1970 = vmatpush.msrb.mxu2 %v1251_v54  ;;  %v1463_v43 = vadd.f32 %v1462_v37, %v1434_v45  ;;  %v5231_v54 = vld [vmem:[%s4019_s21 + $0x698] sm:$0xff]  ;;  %v1243_v45 = vunpack.c.l.bf16 %v5216_v6  ;;  %v5241_v30 = vld [vmem:[%s4019_s21 + $0x7a8] sm:$0xff]  ;;  %v5247_v37 = vld [vmem:[%s4011_s28 + $0x50] sm:$0xff]  ;;  %1913 = vmatpush.msrb.mxu0 %v1119_v49  ;;  %v1520_v49 = vpop.f32.mrf.mxu2 }
 0x15d   : > { %6733 = vst [vmem:[#allocation70_spill] sm:$0xff] %v5180_v27  ;;  %v5197_v27 = vld [vmem:[%s4019_s21 + $0x7c8] sm:$0xff]  ;;  %1870 = vmatmul.f32.gmra.mxu2 %v5247_v37 }
 0x15e   : > { %6734 = vst [vmem:[#allocation71_spill] sm:$0xff] %v5186_v42  ;;  %v1315_v24 = vunpack.c.l.bf16 %v5197_v27  ;;  %1971 = vmatpush.msrb.mxu2 %v1247_v0  ;;  %v1239_v42 = vunpack.c.l.bf16 %v5231_v54  ;;  %v1307_v0 = vunpack.c.l.bf16 %v5241_v30 }
 0x15f   : > { %6735 = vst [vmem:[#allocation73_spill] sm:$0xff] %v5191_v60  ;;  %v5291_v60 = vld [vmem:[%s4019_s21 + $0x478] sm:$0xff] }
 0x160   : > { %6736 = vst [vmem:[#allocation74_spill] sm:$0xff] %v5197_v27  ;;  %v5228_v27 = vld [vmem:[%s4019_s21 + $0x5b8] sm:$0xff]  ;;  %1999 = vmatpush.msrb.mxu3 %v1315_v24  ;;  %1972 = vmatpush.msrb.mxu2 %v1243_v45 }
 0x161   : > { %6737 = vst [vmem:[#allocation72_spill] sm:$0xff] %v5202_v53  ;;  %v5236_v53 = vld [vmem:[%s4011_s28 + $0x40] sm:$0xff]  ;;  %v5262_v24 = vld [vmem:[%s4019_s21 + $0x798] sm:$0xff]  ;;  %v1465_v45 = vpop.f32.mrf.mxu0 }
 0x162   : > { %6738 = vst [vmem:[#allocation76_spill] sm:$0xff] %v5205_v41  ;;  %v1379_v41 = vadd.f32 %v4991_v13, %v4964_v29  ;;  %1812 = vmatmul.f32.gmra.mxu0 %v5236_v53  ;;  %v1311_v29 = vunpack.c.l.bf16 %v5221_v10  ;;  %v1115_v13 = vunpack.c.l.bf16 %v5224_v63  ;;  %1973 = vmatpush.msrb.mxu2 %v1239_v42 }
 0x163   : > { %6739 = vst [vmem:[#allocation77_spill] sm:$0xff] %v5212_v32  ;;  %v1183_v32 = vunpack.c.l.bf16 %v5228_v27 }
 0x164   : > { %6740 = vst [vmem:[#allocation75_spill] sm:$0xff] %v5216_v6  ;;  %v1408_v6 = vadd.f32 %v5024_v15, %v1379_v41  ;;  %v1111_v41 = vunpack.c.l.bf16 %v5244_v17  ;;  %v5274_v15 = vld [vmem:[%s4019_s21 + $0x598] sm:$0xff]  ;;  %2000 = vmatpush.msrb.mxu3 %v1311_v29  ;;  %1914 = vmatpush.msrb.mxu0 %v1115_v13  ;;  %v5296_v13 = vld [vmem:[%s4019_s21 + $0x588] sm:$0xff] }
 0x165   : > { %6741 = vst [vmem:[#allocation78_spill] sm:$0xff] %v5221_v10  ;;  %v5265_v10 = vld [vmem:[%s4019_s21 + $0x488] sm:$0xff]  ;;  %1942 = vmatpush.msrb.mxu1 %v1183_v32  ;;  %v1175_v29 = vunpack.c.l.bf16 %v5274_v15 }
 0x166   : > { %6742 = vst [vmem:[#allocation79_spill] sm:$0xff] %v5224_v63  ;;  %v1492_v63 = vadd.f32 %v1491_v4, %v1463_v43  ;;  %v1179_v43 = vunpack.c.l.bf16 %v5253_v36  ;;  %v5283_v4 = vld [vmem:[%s4019_s21 + $0x788] sm:$0xff]  ;;  %2001 = vmatpush.msrb.mxu3 %v1307_v0  ;;  %1915 = vmatpush.msrb.mxu0 %v1111_v41  ;;  %v1171_v0 = vunpack.c.l.bf16 %v5296_v13  ;;  %v5312_v41 = vld [vmem:[%s4019_s21 + $0x578] sm:$0xff] }
 0x167   : > { %6743 = vst [vmem:[#allocation80_spill] sm:$0xff] %v5228_v27  ;;  %v5288_v27 = vld [vmem:[%s4019_s21 + $0x678] sm:$0xff]  ;;  %v5308_v32 = vld [vmem:[%s4019_s21 + $0x468] sm:$0xff] }
 0x168   : > { %6744 = vst [vmem:[#allocation81_spill] sm:$0xff] %v5231_v54  ;;  %v5277_v54 = vld [vmem:[%s4011_s28 + $0x48] sm:$0xff]  ;;  %1943 = vmatpush.msrb.mxu1 %v1179_v43  ;;  %v1231_v42 = vunpack.c.l.bf16 %v5288_v27  ;;  %v5315_v43 = vld [vmem:[%s4019_s21 + $0x658] sm:$0xff] }
 0x169   : > { %6745 = vst [vmem:[#allocation82_spill] sm:$0xff] %v5236_v53  ;;  %v5256_v53 = vld [vmem:[%s4019_s21 + $0x688] sm:$0xff]  ;;  %1841 = vmatmul.f32.gmra.mxu1 %v5277_v54 }
 0x16a   : > { %6746 = vst [vmem:[#allocation83_spill] sm:$0xff] %v5241_v30  ;;  %v1235_v59 = vunpack.c.l.bf16 %v5256_v53  ;;  %v1107_v30 = vunpack.c.l.bf16 %v5265_v10  ;;  %1944 = vmatpush.msrb.mxu1 %v1175_v29  ;;  %v5340_v29 = vld [vmem:[%s4019_s21 + $0x648] sm:$0xff] }
 0x16b   : > { %6747 = vst [vmem:[#allocation84_spill] sm:$0xff] %v5244_v17  ;;  %v1303_v17 = vunpack.c.l.bf16 %v5262_v24 }
 0x16c   : > { %6748 = vst [vmem:[#allocation86_spill] sm:$0xff] %v5247_v37  ;;  %v5268_v37 = vld [vmem:[%s4011_s28 + $0x58] sm:$0xff]  ;;  %1974 = vmatpush.msrb.mxu2 %v1235_v59  ;;  %1916 = vmatpush.msrb.mxu0 %v1107_v30  ;;  %v1494_v59 = vpop.f32.mrf.mxu1  ;;  %v5325_v30 = vld [vmem:[%s4019_s21 + $0x768] sm:$0xff] }
 0x16d   : > { %6749 = vst [vmem:[#allocation85_spill] sm:$0xff] %v5253_v36  ;;  %1899 = vmatmul.f32.gmra.mxu3 %v5268_v37  ;;  %v1549_v36 = vpop.f32.mrf.mxu3  ;;  %1945 = vmatpush.msrb.mxu1 %v1171_v0  ;;  %v1219_v0 = vunpack.c.l.bf16 %v5340_v29 }
 0x16e   : > { %6750 = vst [vmem:[#allocation88_spill] sm:$0xff] %v5262_v24  ;;  %v5300_v24 = vld [vmem:[%s4019_s21 + $0x668] sm:$0xff]  ;;  %2002 = vmatpush.msrb.mxu3 %v1303_v17  ;;  %v5328_v17 = vld [vmem:[%s4019_s21 + $0x458] sm:$0xff]  ;;  %1975 = vmatpush.msrb.mxu2 %v1231_v42  ;;  %v1291_v42 = vunpack.c.l.bf16 %v5325_v30 }
 0x16f   : > { %6751 = vst [vmem:[#allocation89_spill] sm:$0xff] %v5265_v10  ;;  %v1299_v10 = vunpack.c.l.bf16 %v5283_v4 }
 0x170   : > { %6752 = vst [vmem:[#allocation87_spill] sm:$0xff] %v5268_v37  ;;  %v1521_v37 = vadd.f32 %v1520_v49, %v1492_v63  ;;  %v1437_v63 = vadd.f32 %v5042_v39, %v1408_v6  ;;  %v1103_v39 = vunpack.c.l.bf16 %v5291_v60  ;;  %v5305_v6 = vld [vmem:[%s4019_s21 + $0x778] sm:$0xff] }
 0x171   : > { %6753 = vst [vmem:[#allocation90_spill] sm:$0xff] %v5277_v54  ;;  %v513_v54 = vld [vmem:[#allocation2 + $0x30] sm:$0xff]  ;;  %2003 = vmatpush.msrb.mxu3 %v1299_v10  ;;  %v5346_v10 = vld [vmem:[%s4019_s21 + $0x758] sm:$0xff] }
 0x172   : > { %6754 = vst [vmem:[#allocation91_spill] sm:$0xff] %v5288_v27  ;;  %v1550_v49 = vadd.f32 %v1549_v36, %v1521_v37  ;;  %v1466_v37 = vadd.f32 %v1465_v45, %v1437_v63  ;;  %v5320_v27 = vld [vmem:[%s4011_s28 + $0x80] sm:$0xff]  ;;  %v5331_v45 = vld [vmem:[%s4011_s28 + $0x90] sm:$0xff]  ;;  %v5337_v63 = vld [vmem:[%s4019_s21 + $0x568] sm:$0xff]  ;;  %1917 = vmatpush.msrb.mxu0 %v1103_v39  ;;  %v1523_v39 = vpop.f32.mrf.mxu2 }
 0x173   : > { %6755 = vst [vmem:[#allocation93_spill] sm:$0xff] %v5291_v60  ;;  %v1382_v60 = vadd.f32 %v5067_v12, %v5040_v61  ;;  %1815 = vmatmul.f32.gmra.mxu0 %v5320_v27  ;;  %1873 = vmatmul.f32.gmra.mxu2 %v5331_v45  ;;  %v1295_v61 = vunpack.c.l.bf16 %v5305_v6  ;;  %v1099_v12 = vunpack.c.l.bf16 %v5308_v32 }
 0x174   : > { %6756 = vst [vmem:[#allocation94_spill] sm:$0xff] %v5300_v24  ;;  %v2257_v36 = vadd.f32 %v1550_v49, %v513_v54  ;;  %v1227_v54 = vunpack.c.l.bf16 %v5300_v24  ;;  %v1223_v24 = vunpack.c.l.bf16 %v5315_v43 }
 0x175   : > { %6757 = vst [vmem:[#allocation92_spill] sm:$0xff] %v5305_v6  ;;  %v1411_v49 = vadd.f32 %v5100_v14, %v1382_v60  ;;  %v5349_v6 = vld [vmem:[%s4019_s21 + $0x448] sm:$0xff]  ;;  %v1095_v14 = vunpack.c.l.bf16 %v5328_v17  ;;  %v5358_v60 = vld [vmem:[%s4019_s21 + $0x558] sm:$0xff]  ;;  %2004 = vmatpush.msrb.mxu3 %v1295_v61  ;;  %1918 = vmatpush.msrb.mxu0 %v1099_v12 }
 0x176   : > { %6758 = vst [vmem:[#allocation96_spill] sm:$0xff] %v5308_v32  ;;  %v1495_v32 = vadd.f32 %v1494_v59, %v1466_v37  ;;  %1976 = vmatpush.msrb.mxu2 %v1227_v54  ;;  %v1163_v37 = vunpack.c.l.bf16 %v5337_v63  ;;  %v5367_v59 = vld [vmem:[%s4019_s21 + $0x748] sm:$0xff]  ;;  %v1468_v54 = vpop.f32.mrf.mxu0  ;;  %v1159_v61 = vunpack.c.l.bf16 %v5358_v60 }
 0x177   : > { %6759 = vst [vmem:[#allocation97_spill] sm:$0xff] %v5312_v41  ;;  %v5380_v12 = vld [vmem:[%s4019_s21 + $0x548] sm:$0xff]  ;;  %2005 = vmatpush.msrb.mxu3 %v1291_v42  ;;  %1919 = vmatpush.msrb.mxu0 %v1095_v14  ;;  %v5396_v14 = vld [vmem:[%s4019_s21 + $0x538] sm:$0xff] }
 0x178   : > { %6760 = vst [vmem:[#allocation95_spill] sm:$0xff] %v5315_v43  ;;  %v5361_v43 = vld [vmem:[%s4011_s28 + $0x88] sm:$0xff]  ;;  %1977 = vmatpush.msrb.mxu2 %v1223_v24  ;;  %v1155_v42 = vunpack.c.l.bf16 %v5380_v12 }
 0x179   : > { %6761 = vst [vmem:[#allocation98_spill] sm:$0xff] %v5320_v27  ;;  %1844 = vmatmul.f32.gmra.mxu1 %v5361_v43  ;;  %v5375_v27 = vld [vmem:[%s4019_s21 + $0x438] sm:$0xff] }
 0x17a   : > { %6762 = vst [vmem:[#allocation99_spill] sm:$0xff] %v5325_v30  ;;  %v1091_v30 = vunpack.c.l.bf16 %v5349_v6  ;;  %1978 = vmatpush.msrb.mxu2 %v1219_v0  ;;  %v1497_v0 = vpop.f32.mrf.mxu1 }
 0x17b   : > { %6763 = vst [vmem:[#allocation100_spill] sm:$0xff] %v5328_v17  ;;  %v1287_v17 = vunpack.c.l.bf16 %v5346_v10 }
 0x17c   : > { %2273 = vst [vmem:[#allocation2 + $0x30] sm:$0xff] %v2257_v36  ;;  %v1167_v36 = vunpack.c.l.bf16 %v5312_v41  ;;  %v5372_v41 = vld [vmem:[%s4019_s21 + $0x638] sm:$0xff]  ;;  %1920 = vmatpush.msrb.mxu0 %v1091_v30  ;;  %v5409_v30 = vld [vmem:[%s4019_s21 + $0x728] sm:$0xff] }
 0x17d   : > { %6764 = vst [vmem:[#allocation101_spill] sm:$0xff] %v5331_v45  ;;  %v5352_v45 = vld [vmem:[%s4011_s28 + $0x98] sm:$0xff]  ;;  %v1215_v24 = vunpack.c.l.bf16 %v5372_v41  ;;  %2006 = vmatpush.msrb.mxu3 %v1287_v17 }
 0x17e   : > { %6765 = vst [vmem:[#allocation102_spill] sm:$0xff] %v5337_v63  ;;  %1902 = vmatmul.f32.gmra.mxu3 %v5352_v45  ;;  %v1552_v63 = vpop.f32.mrf.mxu3  ;;  %1946 = vmatpush.msrb.mxu1 %v1167_v36  ;;  %v5412_v17 = vld [vmem:[%s4019_s21 + $0x418] sm:$0xff] }
 0x17f   : > { %6766 = vst [vmem:[#allocation103_spill] sm:$0xff] %v5346_v10  ;;  %v5384_v10 = vld [vmem:[%s4019_s21 + $0x628] sm:$0xff]  ;;  %1979 = vmatpush.msrb.mxu2 %v1215_v24  ;;  %v1275_v24 = vunpack.c.l.bf16 %v5409_v30 }
 0x180   : > { %6767 = vst [vmem:[#allocation104_spill] sm:$0xff] %v5349_v6  ;;  %v1283_v6 = vunpack.c.l.bf16 %v5367_v59  ;;  %1947 = vmatpush.msrb.mxu1 %v1163_v37  ;;  %v5399_v37 = vld [vmem:[%s4019_s21 + $0x618] sm:$0xff] }
 0x181   : > { %6768 = vst [vmem:[#allocation106_spill] sm:$0xff] %v5352_v45  ;;  %v1524_v45 = vadd.f32 %v1523_v39, %v1495_v32  ;;  %v1440_v32 = vadd.f32 %v5118_v56, %v1411_v49  ;;  %v1087_v56 = vunpack.c.l.bf16 %v5375_v27  ;;  %v5389_v49 = vld [vmem:[%s4019_s21 + $0x738] sm:$0xff] }
 0x182   : > { %6769 = vst [vmem:[#allocation105_spill] sm:$0xff] %v5361_v43  ;;  %v517_v43 = vld [vmem:[#allocation2 + $0x50] sm:$0xff]  ;;  %1948 = vmatpush.msrb.mxu1 %v1159_v61  ;;  %2007 = vmatpush.msrb.mxu3 %v1283_v6  ;;  %v5424_v61 = vld [vmem:[%s4019_s21 + $0x608] sm:$0xff]  ;;  %v5430_v6 = vld [vmem:[%s4019_s21 + $0x718] sm:$0xff] }
 0x183   : > { %6770 = vst [vmem:[#allocation108_spill] sm:$0xff] %v5367_v59  ;;  %v1553_v39 = vadd.f32 %v1552_v63, %v1524_v45  ;;  %v5392_v45 = vld [vmem:[%s4019_s21 + $0x428] sm:$0xff]  ;;  %v1469_v63 = vadd.f32 %v1468_v54, %v1440_v32  ;;  %v5415_v54 = vld [vmem:[%s4011_s28 + $0xd0] sm:$0xff]  ;;  %1921 = vmatpush.msrb.mxu0 %v1087_v56  ;;  %v1526_v56 = vpop.f32.mrf.mxu2 }
 0x184   : > { %6771 = vst [vmem:[#allocation109_spill] sm:$0xff] %v5372_v41  ;;  %v5404_v41 = vld [vmem:[%s4011_s28 + $0xc0] sm:$0xff]  ;;  %1876 = vmatmul.f32.gmra.mxu2 %v5415_v54  ;;  %v5421_v32 = vld [vmem:[%s4019_s21 + $0x528] sm:$0xff]  ;;  %1949 = vmatpush.msrb.mxu1 %v1155_v42  ;;  %v1203_v42 = vunpack.c.l.bf16 %v5424_v61 }
 0x185   : > { %6772 = vst [vmem:[#allocation107_spill] sm:$0xff] %v5375_v27  ;;  %v2261_v36 = vadd.f32 %v1553_v39, %v517_v43  ;;  %v1385_v27 = vadd.f32 %v5143_v58, %v5116_v26  ;;  %1818 = vmatmul.f32.gmra.mxu0 %v5404_v41  ;;  %v1211_v43 = vunpack.c.l.bf16 %v5384_v10  ;;  %v1279_v26 = vunpack.c.l.bf16 %v5389_v49 }
 0x186   : > { %6773 = vst [vmem:[#allocation110_spill] sm:$0xff] %v5380_v12  ;;  %v1083_v58 = vunpack.c.l.bf16 %v5392_v45  ;;  %v521_v12 = vld [vmem:[#allocation2 + $0x40] sm:$0xff]  ;;  %v1555_v59 = vpop.f32.mrf.mxu3 }
 0x187   : > { %6774 = vst [vmem:[#allocation112_spill] sm:$0xff] %v5384_v10  ;;  %v1414_v39 = vadd.f32 %v5188_v35, %v1385_v27  ;;  %v1207_v10 = vunpack.c.l.bf16 %v5399_v37  ;;  %v1079_v27 = vunpack.c.l.bf16 %v5412_v17  ;;  %v5442_v35 = vld [vmem:[%s4019_s21 + $0x518] sm:$0xff]  ;;  %1980 = vmatpush.msrb.mxu2 %v1211_v43  ;;  %2008 = vmatpush.msrb.mxu3 %v1279_v26  ;;  %v1008_v26 = vunpack.c.h.bf16 %v4820_v9 }
 0x188   : > { %6775 = vst [vmem:[#allocation111_spill] sm:$0xff] %v5389_v49  ;;  %v5433_v49 = vld [vmem:[%s4019_s21 + $0x408] sm:$0xff]  ;;  %1922 = vmatpush.msrb.mxu0 %v1083_v58  ;;  %v1072_v9 = vunpack.c.h.bf16 %v4833_v16  ;;  %v5484_v16 = vld [vmem:[%s4011_s28 + $0x38] sm:$0xff] }
 0x189   : > { %6776 = vst [vmem:[#allocation114_spill] sm:$0xff] %v5392_v45  ;;  %v1498_v45 = vadd.f32 %v1497_v0, %v1469_v63  ;;  %v1147_v63 = vunpack.c.l.bf16 %v5421_v32  ;;  %v5451_v0 = vld [vmem:[%s4019_s21 + $0x708] sm:$0xff]  ;;  %1981 = vmatpush.msrb.mxu2 %v1207_v10  ;;  %v1443_v43 = vadd.f32 %v5207_v62, %v1414_v39  ;;  %2009 = vmatpush.msrb.mxu3 %v1275_v24  ;;  %v880_v62 = vunpack.c.h.bf16 %v4824_v40  ;;  %v1500_v10 = vpop.f32.mrf.mxu1  ;;  %v5470_v39 = vld [vmem:[%s4011_s28 + $0x30] sm:$0xff] }
 0x18a   : > { %6777 = vst [vmem:[#allocation113_spill] sm:$0xff] %v5396_v14  ;;  %1923 = vmatpush.msrb.mxu0 %v1079_v27  ;;  %v876_v40 = vunpack.c.h.bf16 %v4836_v21  ;;  %v940_v21 = vunpack.c.h.bf16 %v4857_v19  ;;  %v1064_v24 = vunpack.c.h.bf16 %v4865_v34  ;;  %v868_v27 = vunpack.c.h.bf16 %v4868_v55 }
 0x18b   : > { %6778 = vst [vmem:[#allocation115_spill] sm:$0xff] %v5399_v37  ;;  %v5445_v37 = vld [vmem:[%s4011_s28 + $0xc8] sm:$0xff]  ;;  %1982 = vmatpush.msrb.mxu2 %v1203_v42  ;;  %v936_v42 = vunpack.c.h.bf16 %v4874_v46  ;;  %v1060_v19 = vunpack.c.h.bf16 %v4880_v50  ;;  %v864_v34 = vunpack.c.h.bf16 %v4888_v48  ;;  %v5501_v46 = vld [vmem:[%s4011_s28 + $0x60] sm:$0xff]  ;;  %v988_v50 = vunpack.c.h.bf16 %v4898_v2 }
 0x18c   : > { %6779 = vst [vmem:[#allocation116_spill] sm:$0xff] %v5404_v41  ;;  %1847 = vmatmul.f32.gmra.mxu1 %v5445_v37  ;;  %v1471_v41 = vpop.f32.mrf.mxu0  ;;  %1983 = vmatmul.f32.vlgmr.msrb.gmra.mxu2 %v5470_v39  ;;  %v1056_v48 = vunpack.c.h.bf16 %v4903_v5  ;;  %v1052_v2 = vunpack.c.h.bf16 %v4920_v7  ;;  %v5522_v5 = vld [vmem:[%s4011_s28 + $0x68] sm:$0xff] }
 0x18d   : > { %6780 = vst [vmem:[#allocation117_spill] sm:$0xff] %v5409_v30  ;;  %v1271_v30 = vunpack.c.l.bf16 %v5430_v6  ;;  %2083 = vmatpush.msra.mxu2 %v1008_v26 }
 0x18e   : > { %6781 = vst [vmem:[#allocation118_spill] sm:$0xff] %v5412_v17  ;;  %v1075_v17 = vunpack.c.l.bf16 %v5433_v49 }
 0x18f   : > { %2277 = vst [vmem:[#allocation2 + $0x50] sm:$0xff] %v2261_v36  ;;  %v1151_v36 = vunpack.c.l.bf16 %v5396_v14  ;;  %v5456_v14 = vld [vmem:[%s4019_s21 + $0x508] sm:$0xff]  ;;  %2010 = vmatpush.msrb.mxu3 %v1271_v30 }
 0x190   : > { %6782 = vst [vmem:[#allocation119_spill] sm:$0xff] %v5415_v54  ;;  %v5436_v54 = vld [vmem:[%s4011_s28 + $0xd8] sm:$0xff]  ;;  %v1139_v58 = vunpack.c.l.bf16 %v5456_v14  ;;  %1924 = vmatpush.msrb.mxu0 %v1075_v17  ;;  %v1068_v17 = vunpack.c.h.bf16 %v4848_v25  ;;  %v525_v25 = vld [vmem:[#allocation2 + $0x60] sm:$0xff] }
 0x191   : > { %6783 = vst [vmem:[#allocation120_spill] sm:$0xff] %v5421_v32  ;;  %1905 = vmatmul.f32.gmra.mxu3 %v5436_v54  ;;  %1950 = vmatpush.msrb.mxu1 %v1151_v36  ;;  %v5498_v26 = vpop.f32.mrf.mxu1 }
 0x192   : > { %6784 = vst [vmem:[#allocation121_spill] sm:$0xff] %v5424_v61  ;;  %v1143_v61 = vunpack.c.l.bf16 %v5442_v35  ;;  %2025 = vmatpush.msra.mxu0 %v880_v62  ;;  %v856_v62 = vunpack.c.h.bf16 %v4923_v47 }
 0x193   : > { %6785 = vst [vmem:[#allocation122_spill] sm:$0xff] %v5436_v54  ;;  %v1527_v54 = vadd.f32 %v1526_v56, %v1498_v45  ;;  %v1267_v45 = vunpack.c.l.bf16 %v5451_v0  ;;  %1951 = vmatpush.msrb.mxu1 %v1147_v63  ;;  %v1472_v56 = vadd.f32 %v1471_v41, %v1443_v43  ;;  %v944_v41 = vunpack.c.h.bf16 %v4840_v18  ;;  %v1558_v63 = vpop.f32.mrf.mxu3 }
 0x194   : > { %v996_v18 = vunpack.c.h.bf16 %v4860_v33  ;;  %2026 = vmatpush.msra.mxu0 %v876_v40  ;;  %v992_v33 = vunpack.c.h.bf16 %v4885_v57  ;;  %v5506_v57 = vld [vmem:[%s4011_s28 + $0x70] sm:$0xff]  ;;  %v6787_v40 = vld [vmem:[#allocation24_spill] sm:$0xff] }
 0x195   : > { %v1556_v32 = vadd.f32 %v1555_v59, %v1527_v54  ;;  %1952 = vmatpush.msrb.mxu1 %v1143_v61  ;;  %v5465_v59 = vld [vmem:[%s4011_s28 + $0x20] sm:$0xff]  ;;  %v1004_v54 = vunpack.c.h.bf16 %v4828_v28  ;;  %2011 = vmatpush.msrb.mxu3 %v1267_v45  ;;  %v1501_v30 = vadd.f32 %v1500_v10, %v1472_v56  ;;  %v5478_v28 = vld [vmem:[%s4011_s28 + $0x28] sm:$0xff]  ;;  %v1529_v61 = vpop.f32.mrf.mxu2  ;;  %v932_v45 = vunpack.c.h.bf16 %v4894_v52 }
 0x196   : > { %1925 = vmatmul.f32.vlgmr.msrb.gmra.mxu0 %v5465_v59  ;;  %1986 = vmatmul.f32.gmra.mxu2 %v5506_v57  ;;  %v860_v52 = vunpack.c.h.bf16 %v4906_v31  ;;  %v984_v56 = vunpack.c.h.bf16 %v4913_v23  ;;  %v924_v31 = vunpack.c.h.bf16 %v4929_v3  ;;  %v1048_v23 = vunpack.c.h.bf16 %v4937_v11 }
 0x197   : > { %v2265_v36 = vadd.f32 %v1556_v32, %v521_v12  ;;  %1953 = vmatpush.msrb.mxu1 %v1139_v58  ;;  %v1000_v12 = vunpack.c.h.bf16 %v4843_v51  ;;  %v872_v32 = vunpack.c.h.bf16 %v4851_v44  ;;  %2084 = vmatpush.msra.mxu2 %v1004_v54  ;;  %v1530_v51 = vadd.f32 %v1529_v61, %v1501_v30  ;;  %v5491_v44 = vpop.f32.mrf.mxu0  ;;  %v6790_v61 = vld [vmem:[#allocation25_spill] sm:$0xff] }
 0x198   : > { %1954 = vmatmul.f32.vlgmr.msrb.gmra.mxu1 %v5478_v28  ;;  %2112 = vmatpush.msra.mxu3 %v1072_v9  ;;  %v928_v58 = vunpack.c.h.bf16 %v4910_v1  ;;  %v980_v1 = vunpack.c.h.bf16 %v4932_v8  ;;  %v852_v54 = vunpack.c.h.bf16 %v4940_v22  ;;  %v920_v9 = vunpack.c.h.bf16 %v4946_v20  ;;  %v6786_v8 = vld [vmem:[#allocation22_spill] sm:$0xff]  ;;  %v5541_v20 = vld [vmem:[%s4011_s28 + $0xa0] sm:$0xff] }
 0x199   : > { %2281 = vst [vmem:[#allocation2 + $0x40] sm:$0xff] %v2265_v36  ;;  %2012 = vmatmul.f32.vlgmr.msrb.gmra.mxu3 %v5484_v16  ;;  %2054 = vmatpush.msra.mxu1 %v944_v41  ;;  %v1559_v43 = vadd.f32 %v1558_v63, %v1530_v51  ;;  %v5514_v36 = vld [vmem:[%s4011_s28 + $0x78] sm:$0xff]  ;;  %v1044_v3 = vunpack.c.h.bf16 %v4954_v38  ;;  %v976_v11 = vunpack.c.h.bf16 %v6786_v8  ;;  %v848_v22 = vunpack.c.h.bf16 %v6787_v40  ;;  %v5538_v30 = vpop.f32.mrf.mxu1 }
 0x19a   : > { %2085 = vmatpush.msra.mxu2 %v1000_v12  ;;  %2113 = vmatpush.msra.mxu3 %v1068_v17  ;;  %v6788_v41 = vld [vmem:[#allocation23_spill] sm:$0xff]  ;;  %v6789_v17 = vld [vmem:[#allocation28_spill] sm:$0xff] }
 0x19b   : > { %2027 = vmatpush.msra.mxu0 %v872_v32  ;;  %2055 = vmatpush.msra.mxu1 %v940_v21  ;;  %v2269_v55 = vadd.f32 %v1559_v43, %v525_v25  ;;  %v5531_v47 = vpop.f32.mrf.mxu3  ;;  %v916_v12 = vunpack.c.h.bf16 %v6788_v41  ;;  %v972_v38 = vunpack.c.h.bf16 %v6789_v17  ;;  %v5546_v32 = vld [vmem:[%s4011_s28 + $0xb0] sm:$0xff]  ;;  %v1040_v21 = vunpack.c.h.bf16 %v6790_v61  ;;  %v6794_v43 = vld [vmem:[#allocation29_spill] sm:$0xff] }
 0x19c   : > { %2086 = vmatpush.msra.mxu2 %v996_v18  ;;  %2114 = vmatpush.msra.mxu3 %v1064_v24  ;;  %v6791_v18 = vld [vmem:[#allocation27_spill] sm:$0xff]  ;;  %v6792_v24 = vld [vmem:[#allocation26_spill] sm:$0xff]  ;;  %v5581_v61 = vld [vmem:[%s4011_s28 + $0xe0] sm:$0xff] }
 0x19d   : > { %2028 = vmatpush.msra.mxu0 %v868_v27  ;;  %2056 = vmatpush.msra.mxu1 %v936_v42  ;;  %2285 = vst [vmem:[#allocation2 + $0x60] sm:$0xff] %v2269_v55  ;;  %v5519_v10 = vpop.f32.mrf.mxu2  ;;  %v844_v51 = vunpack.c.h.bf16 %v6791_v18  ;;  %v912_v27 = vunpack.c.h.bf16 %v6792_v24  ;;  %v6793_v25 = vld [vmem:[#allocation31_spill] sm:$0xff]  ;;  %v6806_v24 = vld [vmem:[#allocation41_spill] sm:$0xff] }
 0x19e   : > { %1928 = vmatmul.f32.gmra.mxu0 %v5501_v46  ;;  %2115 = vmatpush.msra.mxu3 %v1060_v19  ;;  %v968_v63 = vunpack.c.h.bf16 %v6793_v25  ;;  %v5554_v42 = vld [vmem:[%s4011_s28 + $0xb8] sm:$0xff]  ;;  %v1036_v19 = vunpack.c.h.bf16 %v6794_v43  ;;  %v6807_v25 = vld [vmem:[#allocation42_spill] sm:$0xff] }
 0x19f   : > { %2087 = vmatpush.msra.mxu2 %v992_v33  ;;  %2029 = vmatpush.msra.mxu0 %v864_v34  ;;  %v5529_v7 = vpop.f32.mrf.mxu0  ;;  %v6795_v33 = vld [vmem:[#allocation32_spill] sm:$0xff] }
 0x1a0   : > { %2057 = vmatpush.msra.mxu1 %v932_v45  ;;  %2116 = vmatpush.msra.mxu3 %v1056_v48  ;;  %v840_v34 = vunpack.c.h.bf16 %v6795_v33  ;;  %v5562_v45 = vld [vmem:[%s4011_s28 + $0xa8] sm:$0xff]  ;;  %v6808_v43 = vld [vmem:[#allocation44_spill] sm:$0xff] }
 0x1a1   : > { %2015 = vmatmul.f32.gmra.mxu3 %v5514_v36  ;;  %1957 = vmatmul.f32.gmra.mxu1 %v5522_v5  ;;  %v6809_v33 = vld [vmem:[#allocation46_spill] sm:$0xff] }
 0x1a2   : > { %2088 = vmatpush.msra.mxu2 %v988_v50  ;;  %2030 = vmatpush.msra.mxu0 %v860_v52  ;;  %v6796_v50 = vld [vmem:[#allocation30_spill] sm:$0xff]  ;;  %v6797_v52 = vld [vmem:[#allocation35_spill] sm:$0xff] }
 0x1a3   : > { %2058 = vmatpush.msra.mxu1 %v928_v58  ;;  %2117 = vmatpush.msra.mxu3 %v1052_v2  ;;  %v908_v48 = vunpack.c.h.bf16 %v6796_v50  ;;  %v964_v58 = vunpack.c.h.bf16 %v6797_v52  ;;  %v5594_v50 = vld [vmem:[%s4011_s28 + $0xf8] sm:$0xff] }
 0x1a4   : > { %2089 = vmatpush.msra.mxu2 %v984_v56  ;;  %2031 = vmatpush.msra.mxu0 %v856_v62  ;;  %v6798_v56 = vld [vmem:[#allocation33_spill] sm:$0xff]  ;;  %v6799_v62 = vld [vmem:[#allocation36_spill] sm:$0xff] }
 0x1a5   : > { %2059 = vmatpush.msra.mxu1 %v924_v31  ;;  %2118 = vmatpush.msra.mxu3 %v1048_v23  ;;  %v5559_v55 = vpop.f32.mrf.mxu2  ;;  %v1032_v2 = vunpack.c.h.bf16 %v6798_v56  ;;  %v836_v31 = vunpack.c.h.bf16 %v6799_v62  ;;  %v5571_v23 = vpop.f32.mrf.mxu3  ;;  %v5602_v62 = vld [vmem:[%s4011_s28 + $0xe8] sm:$0xff] }
 0x1a6   : > { %2090 = vmatpush.msra.mxu2 %v980_v1  ;;  %2032 = vmatpush.msra.mxu0 %v852_v54  ;;  %v6800_v54 = vld [vmem:[#allocation34_spill] sm:$0xff] }
 0x1a7   : > { %2060 = vmatpush.msra.mxu1 %v920_v9  ;;  %1931 = vmatmul.f32.gmra.mxu0 %v5541_v20  ;;  %v5569_v1 = vpop.f32.mrf.mxu0  ;;  %v904_v9 = vunpack.c.h.bf16 %v6800_v54 }
 0x1a8   : > { %1989 = vmatmul.f32.gmra.mxu2 %v5546_v32  ;;  %2119 = vmatpush.msra.mxu3 %v1044_v3  ;;  %v6801_v3 = vld [vmem:[#allocation39_spill] sm:$0xff] }
 0x1a9   : > { %2091 = vmatpush.msra.mxu2 %v976_v11  ;;  %2033 = vmatpush.msra.mxu0 %v848_v22  ;;  %v1028_v8 = vunpack.c.h.bf16 %v6801_v3  ;;  %v6802_v11 = vld [vmem:[#allocation37_spill] sm:$0xff]  ;;  %v6803_v22 = vld [vmem:[#allocation40_spill] sm:$0xff] }
 0x1aa   : > { %2061 = vmatpush.msra.mxu1 %v916_v12  ;;  %2018 = vmatmul.f32.gmra.mxu3 %v5554_v42  ;;  %v960_v40 = vunpack.c.h.bf16 %v6802_v11  ;;  %v832_v41 = vunpack.c.h.bf16 %v6803_v22  ;;  %v6804_v12 = vld [vmem:[#allocation38_spill] sm:$0xff] }
 0x1ab   : > { %1960 = vmatmul.f32.gmra.mxu1 %v5562_v45  ;;  %2092 = vmatpush.msra.mxu2 %v972_v38  ;;  %v900_v17 = vunpack.c.h.bf16 %v6804_v12  ;;  %v5578_v38 = vpop.f32.mrf.mxu1 }
 0x1ac   : > { %2120 = vmatpush.msra.mxu3 %v1040_v21  ;;  %2034 = vmatpush.msra.mxu0 %v844_v51  ;;  %v6805_v21 = vld [vmem:[#allocation43_spill] sm:$0xff] }
 0x1ad   : > { %2062 = vmatpush.msra.mxu1 %v912_v27  ;;  %2093 = vmatpush.msra.mxu2 %v968_v63  ;;  %v956_v18 = vunpack.c.h.bf16 %v6805_v21  ;;  %v5586_v51 = vld [vmem:[%s4011_s28 + $0xf0] sm:$0xff]  ;;  %v1024_v27 = vunpack.c.h.bf16 %v6806_v24  ;;  %v828_v63 = vunpack.c.h.bf16 %v6807_v25  ;;  %v5611_v12 = vpop.f32.mrf.mxu3 }
 0x1ae   : > { %2121 = vmatpush.msra.mxu3 %v1036_v19  ;;  %2035 = vmatpush.msra.mxu0 %v840_v34  ;;  %v896_v19 = vunpack.c.h.bf16 %v6808_v43  ;;  %v952_v34 = vunpack.c.h.bf16 %v6809_v33  ;;  %v1608_v33 = vadd.f32 %v5498_v26, %v5491_v44  ;;  %v6826_v44 = vld [vmem:[#allocation60_spill] sm:$0xff] }
 0x1af   : > { %2063 = vmatpush.msra.mxu1 %v908_v48  ;;  %2094 = vmatpush.msra.mxu2 %v964_v58  ;;  %v6810_v48 = vld [vmem:[#allocation45_spill] sm:$0xff]  ;;  %v6811_v58 = vld [vmem:[#allocation48_spill] sm:$0xff]  ;;  %v1200_v26 = vunpack.c.h.bf16 %v6826_v44 }
 0x1b0   : > { %2122 = vmatpush.msra.mxu3 %v1032_v2  ;;  %2036 = vmatpush.msra.mxu0 %v836_v31  ;;  %v1020_v52 = vunpack.c.h.bf16 %v6810_v48  ;;  %v824_v56 = vunpack.c.h.bf16 %v6811_v58  ;;  %v5599_v2 = vpop.f32.mrf.mxu2  ;;  %v6812_v31 = vld [vmem:[#allocation49_spill] sm:$0xff]  ;;  %v6822_v58 = vld [vmem:[#allocation55_spill] sm:$0xff] }
 0x1b1   : > { %2064 = vmatpush.msra.mxu1 %v904_v9  ;;  %1934 = vmatmul.f32.gmra.mxu0 %v5581_v61  ;;  %v892_v54 = vunpack.c.h.bf16 %v6812_v31  ;;  %v6813_v9 = vld [vmem:[#allocation47_spill] sm:$0xff]  ;;  %v6820_v48 = vld [vmem:[#allocation57_spill] sm:$0xff]  ;;  %v6823_v31 = vld [vmem:[#allocation66_spill] sm:$0xff] }
 0x1b2   : > { %1992 = vmatmul.f32.gmra.mxu2 %v5586_v51  ;;  %2123 = vmatpush.msra.mxu3 %v1028_v8  ;;  %v948_v3 = vunpack.c.h.bf16 %v6813_v9  ;;  %v6814_v8 = vld [vmem:[#allocation50_spill] sm:$0xff] }
 0x1b3   : > { %2095 = vmatpush.msra.mxu2 %v960_v40  ;;  %2037 = vmatpush.msra.mxu0 %v832_v41  ;;  %v1016_v11 = vunpack.c.h.bf16 %v6814_v8  ;;  %v6815_v40 = vld [vmem:[#allocation51_spill] sm:$0xff]  ;;  %v5609_v41 = vpop.f32.mrf.mxu0 }
 0x1b4   : > { %2065 = vmatpush.msra.mxu1 %v900_v17  ;;  %2021 = vmatmul.f32.gmra.mxu3 %v5594_v50  ;;  %v820_v22 = vunpack.c.h.bf16 %v6815_v40  ;;  %v6816_v17 = vld [vmem:[#allocation53_spill] sm:$0xff]  ;;  %v6825_v8 = vld [vmem:[#allocation59_spill] sm:$0xff] }
 0x1b5   : > { %1963 = vmatmul.f32.gmra.mxu1 %v5602_v62  ;;  %2096 = vmatpush.msra.mxu2 %v956_v18  ;;  %v888_v21 = vunpack.c.h.bf16 %v6816_v17  ;;  %v6817_v18 = vld [vmem:[#allocation54_spill] sm:$0xff]  ;;  %v6827_v40 = vld [vmem:[#allocation61_spill] sm:$0xff] }
 0x1b6   : > { %2124 = vmatpush.msra.mxu3 %v1024_v27  ;;  %2038 = vmatpush.msra.mxu0 %v828_v63  ;;  %v1012_v24 = vunpack.c.h.bf16 %v6817_v18  ;;  %v6818_v27 = vld [vmem:[#allocation52_spill] sm:$0xff]  ;;  %v6828_v17 = vld [vmem:[#allocation70_spill] sm:$0xff] }
 0x1b7   : > { %2066 = vmatpush.msra.mxu1 %v896_v19  ;;  %2097 = vmatpush.msra.mxu2 %v952_v34  ;;  %v1264_v25 = vunpack.c.h.bf16 %v6818_v27  ;;  %v6819_v63 = vld [vmem:[#allocation56_spill] sm:$0xff]  ;;  %v1136_v19 = vunpack.c.h.bf16 %v6820_v48  ;;  %v5620_v34 = vpop.f32.mrf.mxu1  ;;  %v6831_v48 = vld [vmem:[#allocation73_spill] sm:$0xff] }
 0x1b8   : > { %2125 = vmatpush.msra.mxu3 %v1020_v52  ;;  %2039 = vmatpush.msra.mxu0 %v824_v56  ;;  %v884_v43 = vunpack.c.h.bf16 %v6819_v63  ;;  %v6821_v52 = vld [vmem:[#allocation62_spill] sm:$0xff]  ;;  %v1260_v56 = vunpack.c.h.bf16 %v6822_v58  ;;  %v6830_v27 = vld [vmem:[#allocation64_spill] sm:$0xff] }
 0x1b9   : > { %2067 = vmatpush.msra.mxu1 %v892_v54  ;;  %2098 = vmatpush.msra.mxu2 %v948_v3  ;;  %v6824_v54 = vld [vmem:[#allocation58_spill] sm:$0xff]  ;;  %v1637_v3 = vadd.f32 %v5519_v10, %v1608_v33  ;;  %v1128_v63 = vunpack.c.h.bf16 %v6830_v27  ;;  %v6832_v10 = vld [vmem:[#allocation65_spill] sm:$0xff] }
 0x1ba   : > { %2126 = vmatpush.msra.mxu3 %v1016_v11  ;;  %2040 = vmatpush.msra.mxu0 %v820_v22  ;;  %v1328_v9 = vunpack.c.h.bf16 %v6824_v54  ;;  %v1132_v11 = vunpack.c.h.bf16 %v6825_v8  ;;  %v1256_v22 = vunpack.c.h.bf16 %v6827_v40  ;;  %v1196_v33 = vunpack.c.h.bf16 %v6832_v10  ;;  %v5641_v8 = vpop.f32.mrf.mxu3  ;;  %v6836_v40 = vld [vmem:[#allocation71_spill] sm:$0xff] }
 0x1bb   : > { %2068 = vmatpush.msra.mxu1 %v888_v21  ;;  %2041 = vmatmul.f32.vlgmr.msra.gmra.mxu0 %v6821_v52  ;;  %v6829_v21 = vld [vmem:[#allocation63_spill] sm:$0xff]  ;;  %v1666_v52 = vadd.f32 %v5531_v47, %v1637_v3  ;;  %v1694_v44 = vpop.f32.mrf.mxu0  ;;  %v6839_v3 = vld [vmem:[#allocation76_spill] sm:$0xff]  ;;  %v1611_v10 = vadd.f32 %v5538_v30, %v5529_v7 }
 0x1bc   : > { %2099 = vmatmul.f32.vlgmr.msra.gmra.mxu2 %v6823_v31  ;;  %2127 = vmatpush.msra.mxu3 %v1012_v24  ;;  %v1324_v18 = vunpack.c.h.bf16 %v6829_v21  ;;  %v5633_v24 = vpop.f32.mrf.mxu2  ;;  %v6835_v31 = vld [vmem:[#allocation67_spill] sm:$0xff]  ;;  %v6846_v7 = vld [vmem:[#allocation80_spill] sm:$0xff] }
 0x1bd   : > { %2199 = vmatpush.msrb.mxu2 %v1264_v25  ;;  %2069 = vmatpush.msra.mxu1 %v884_v43  ;;  %v6833_v25 = vld [vmem:[#allocation68_spill] sm:$0xff]  ;;  %v1124_v54 = vunpack.c.h.bf16 %v6835_v31  ;;  %v1695_v27 = vadd.f32 %v1694_v44, %v1666_v52  ;;  %v6843_v52 = vld [vmem:[#allocation86_spill] sm:$0xff]  ;;  %v6845_v31 = vld [vmem:[#allocation79_spill] sm:$0xff]  ;;  %v1184_v30 = vunpack.c.h.bf16 %v6846_v7 }
 0x1be   : > { %2141 = vmatpush.msrb.mxu0 %v1136_v19  ;;  %2070 = vmatmul.f32.vlgmr.msra.gmra.mxu1 %v6828_v17  ;;  %v1252_v43 = vunpack.c.h.bf16 %v6833_v25  ;;  %v6834_v19 = vld [vmem:[#allocation69_spill] sm:$0xff]  ;;  %v1192_v17 = vunpack.c.h.bf16 %v6836_v40 }
 0x1bf   : > { %2128 = vmatmul.f32.vlgmr.msra.gmra.mxu3 %v6831_v48  ;;  %2200 = vmatpush.msrb.mxu2 %v1260_v56  ;;  %v1320_v58 = vunpack.c.h.bf16 %v6834_v19  ;;  %v6837_v56 = vld [vmem:[#allocation74_spill] sm:$0xff]  ;;  %v1723_v48 = vpop.f32.mrf.mxu1  ;;  %v1640_v19 = vadd.f32 %v5559_v55, %v1611_v10  ;;  %v6852_v55 = vld [vmem:[#allocation85_spill] sm:$0xff] }
 0x1c0   : > { %2228 = vmatpush.msrb.mxu3 %v1328_v9  ;;  %2142 = vmatpush.msrb.mxu0 %v1132_v11  ;;  %v1316_v21 = vunpack.c.h.bf16 %v6837_v56  ;;  %v6838_v9 = vld [vmem:[#allocation72_spill] sm:$0xff]  ;;  %v1120_v11 = vunpack.c.h.bf16 %v6839_v3  ;;  %v1724_v44 = vadd.f32 %v1723_v48, %v1695_v27  ;;  %v6848_v56 = vld [vmem:[#allocation87_spill] sm:$0xff]  ;;  %v1180_v27 = vunpack.c.h.bf16 %v6852_v55 }
 0x1c1   : > { %2170 = vmatpush.msrb.mxu1 %v1200_v26  ;;  %2201 = vmatpush.msrb.mxu2 %v1256_v22  ;;  %v1248_v47 = vunpack.c.h.bf16 %v6838_v9  ;;  %v6840_v26 = vld [vmem:[#allocation77_spill] sm:$0xff]  ;;  %v6849_v9 = vld [vmem:[#allocation83_spill] sm:$0xff]  ;;  %v6853_v48 = vld [vmem:[#allocation88_spill] sm:$0xff] }
 0x1c2   : > { %2229 = vmatpush.msrb.mxu3 %v1324_v18  ;;  %2143 = vmatpush.msrb.mxu0 %v1128_v63  ;;  %v1188_v22 = vunpack.c.h.bf16 %v6840_v26  ;;  %v6841_v18 = vld [vmem:[#allocation82_spill] sm:$0xff]  ;;  %v6842_v63 = vld [vmem:[#allocation75_spill] sm:$0xff]  ;;  %v1308_v3 = vunpack.c.h.bf16 %v6849_v9  ;;  %v1304_v10 = vunpack.c.h.bf16 %v6853_v48  ;;  %v1781_v7 = vpop.f32.mrf.mxu3 }
 0x1c3   : > { %2171 = vmatpush.msrb.mxu1 %v1196_v33  ;;  %2202 = vmatpush.msrb.mxu2 %v1252_v43  ;;  %v1244_v25 = vunpack.c.h.bf16 %v6842_v63  ;;  %v6844_v33 = vld [vmem:[#allocation78_spill] sm:$0xff] }
 0x1c4   : > { %2230 = vmatpush.msrb.mxu3 %v1320_v58  ;;  %2144 = vmatpush.msrb.mxu0 %v1124_v54  ;;  %v1312_v43 = vunpack.c.h.bf16 %v6844_v33  ;;  %v1116_v58 = vunpack.c.h.bf16 %v6845_v31  ;;  %v6847_v54 = vld [vmem:[#allocation81_spill] sm:$0xff]  ;;  %v6851_v63 = vld [vmem:[#allocation90_spill] sm:$0xff]  ;;  %v1697_v33 = vpop.f32.mrf.mxu0 }
 0x1c5   : > { %2172 = vmatpush.msrb.mxu1 %v1192_v17  ;;  %2044 = vmatmul.f32.gmra.mxu0 %v6841_v18  ;;  %v1240_v40 = vunpack.c.h.bf16 %v6847_v54  ;;  %v1752_v17 = vpop.f32.mrf.mxu2  ;;  %v514_v31 = vld [vmem:[#allocation2] sm:$0xff]  ;;  %v6864_v48 = vld [vmem:[#allocation106_spill] sm:$0xff] }
 0x1c6   : > { %2102 = vmatmul.f32.gmra.mxu2 %v6843_v52  ;;  %2231 = vmatpush.msrb.mxu3 %v1316_v21  ;;  %v6850_v21 = vld [vmem:[#allocation84_spill] sm:$0xff]  ;;  %v1753_v18 = vadd.f32 %v1752_v17, %v1724_v44  ;;  %v1176_v44 = vunpack.c.h.bf16 %v5274_v15  ;;  %v1172_v15 = vunpack.c.h.bf16 %v5296_v13  ;;  %v6862_v13 = vld [vmem:[#allocation97_spill] sm:$0xff] }
 0x1c7   : > { %2203 = vmatpush.msrb.mxu2 %v1248_v47  ;;  %2145 = vmatpush.msrb.mxu0 %v1120_v11  ;;  %v1112_v26 = vunpack.c.h.bf16 %v6850_v21  ;;  %v1236_v47 = vunpack.c.h.bf16 %v5256_v53  ;;  %v1669_v11 = vadd.f32 %v5571_v23, %v1640_v19  ;;  %v1300_v53 = vunpack.c.h.bf16 %v5283_v4  ;;  %v6855_v23 = vld [vmem:[#allocation91_spill] sm:$0xff]  ;;  %v6858_v4 = vld [vmem:[#allocation94_spill] sm:$0xff]  ;;  %v6860_v21 = vld [vmem:[#allocation92_spill] sm:$0xff] }
 0x1c8   : > { %2173 = vmatpush.msrb.mxu1 %v1188_v22  ;;  %2131 = vmatmul.f32.gmra.mxu3 %v6848_v56  ;;  %v6854_v22 = vld [vmem:[#allocation89_spill] sm:$0xff]  ;;  %v1232_v19 = vunpack.c.h.bf16 %v6855_v23  ;;  %v6857_v56 = vld [vmem:[#allocation98_spill] sm:$0xff]  ;;  %v1228_v9 = vunpack.c.h.bf16 %v6858_v4 }
 0x1c9   : > { %2073 = vmatmul.f32.gmra.mxu1 %v6851_v63  ;;  %2204 = vmatpush.msrb.mxu2 %v1244_v25  ;;  %v1108_v52 = vunpack.c.h.bf16 %v6854_v22  ;;  %v1782_v25 = vadd.f32 %v1781_v7, %v1753_v18  ;;  %v6861_v63 = vld [vmem:[#allocation96_spill] sm:$0xff]  ;;  %v6867_v7 = vld [vmem:[#allocation105_spill] sm:$0xff] }
 0x1ca   : > { %2232 = vmatpush.msrb.mxu3 %v1312_v43  ;;  %2146 = vmatpush.msrb.mxu0 %v1116_v58  ;;  %v1698_v43 = vadd.f32 %v1697_v33, %v1669_v11  ;;  %v6856_v58 = vld [vmem:[#allocation93_spill] sm:$0xff]  ;;  %v1100_v55 = vunpack.c.h.bf16 %v6861_v63  ;;  %v6874_v63 = vld [vmem:[#allocation110_spill] sm:$0xff] }
 0x1cb   : > { %2174 = vmatpush.msrb.mxu1 %v1184_v30  ;;  %2205 = vmatpush.msrb.mxu2 %v1240_v40  ;;  %v1104_v54 = vunpack.c.h.bf16 %v6856_v58  ;;  %v2258_v17 = vadd.f32 %v1782_v25, %v514_v31  ;;  %v1614_v30 = vadd.f32 %v5578_v38, %v5569_v1  ;;  %v1726_v40 = vpop.f32.mrf.mxu1  ;;  %v1168_v38 = vunpack.c.h.bf16 %v6862_v13  ;;  %v6876_v13 = vld [vmem:[#allocation112_spill] sm:$0xff] }
 0x1cc   : > { %2233 = vmatpush.msrb.mxu3 %v1308_v3  ;;  %2147 = vmatpush.msrb.mxu0 %v1112_v26  ;;  %v6859_v3 = vld [vmem:[#allocation101_spill] sm:$0xff]  ;;  %v1296_v26 = vunpack.c.h.bf16 %v6860_v21  ;;  %v1727_v1 = vadd.f32 %v1726_v40, %v1698_v43  ;;  %v1220_v25 = vunpack.c.h.bf16 %v5340_v29  ;;  %v1784_v43 = vpop.f32.mrf.mxu3  ;;  %v1160_v40 = vunpack.c.h.bf16 %v5358_v60  ;;  %v6873_v21 = vld [vmem:[#allocation107_spill] sm:$0xff] }
 0x1cd   : > { %2175 = vmatpush.msrb.mxu1 %v1180_v27  ;;  %2206 = vmatpush.msrb.mxu2 %v1236_v47  ;;  %2274 = vst [vmem:[#allocation2] sm:$0xff] %v2258_v17  ;;  %v1643_v18 = vadd.f32 %v5599_v2, %v1614_v30  ;;  %v6863_v27 = vld [vmem:[#allocation95_spill] sm:$0xff]  ;;  %v1755_v11 = vpop.f32.mrf.mxu2  ;;  %v6868_v2 = vld [vmem:[#allocation102_spill] sm:$0xff]  ;;  %v1700_v30 = vpop.f32.mrf.mxu0 }
 0x1ce   : > { %2234 = vmatpush.msrb.mxu3 %v1304_v10  ;;  %2148 = vmatpush.msrb.mxu0 %v1108_v52  ;;  %v1224_v47 = vunpack.c.h.bf16 %v6863_v27  ;;  %v6865_v10 = vld [vmem:[#allocation99_spill] sm:$0xff]  ;;  %v6866_v52 = vld [vmem:[#allocation100_spill] sm:$0xff]  ;;  %v1756_v31 = vadd.f32 %v1755_v11, %v1727_v1 }
 0x1cf   : > { %2176 = vmatpush.msrb.mxu1 %v1176_v44  ;;  %2047 = vmatmul.f32.gmra.mxu0 %v6857_v56  ;;  %v1292_v22 = vunpack.c.h.bf16 %v6865_v10  ;;  %v1096_v33 = vunpack.c.h.bf16 %v6866_v52  ;;  %v1164_v44 = vunpack.c.h.bf16 %v6868_v2  ;;  %v1672_v23 = vadd.f32 %v5611_v12, %v1643_v18  ;;  %v6871_v56 = vld [vmem:[#allocation108_spill] sm:$0xff]  ;;  %v6877_v27 = vld [vmem:[#allocation119_spill] sm:$0xff]  ;;  %v6879_v10 = vld [vmem:[#allocation114_spill] sm:$0xff] }
 0x1d0   : > { %2105 = vmatmul.f32.gmra.mxu2 %v6859_v3  ;;  %2235 = vmatpush.msrb.mxu3 %v1300_v53  ;;  %v518_v53 = vld [vmem:[#allocation2 + $0x68] sm:$0xff]  ;;  %v1284_v29 = vunpack.c.h.bf16 %v6871_v56  ;;  %v1617_v18 = vadd.f32 %v5620_v34, %v5609_v41  ;;  %v6875_v1 = vld [vmem:[#allocation116_spill] sm:$0xff]  ;;  %v1076_v56 = vunpack.c.h.bf16 %v5433_v49 }
 0x1d1   : > { %2207 = vmatpush.msrb.mxu2 %v1232_v19  ;;  %2149 = vmatpush.msrb.mxu0 %v1104_v54  ;;  %v6869_v19 = vld [vmem:[#allocation103_spill] sm:$0xff]  ;;  %v6870_v54 = vld [vmem:[#allocation104_spill] sm:$0xff]  ;;  %v1701_v4 = vadd.f32 %v1700_v30, %v1672_v23  ;;  %v6872_v3 = vld [vmem:[#allocation109_spill] sm:$0xff] }
 0x1d2   : > { %2177 = vmatpush.msrb.mxu1 %v1172_v15  ;;  %2134 = vmatmul.f32.gmra.mxu3 %v6864_v48  ;;  %v1288_v58 = vunpack.c.h.bf16 %v6869_v19  ;;  %v1092_v17 = vunpack.c.h.bf16 %v6870_v54  ;;  %v1785_v15 = vadd.f32 %v1784_v43, %v1756_v31  ;;  %v1216_v12 = vunpack.c.h.bf16 %v6872_v3  ;;  %v6880_v34 = vld [vmem:[#allocation113_spill] sm:$0xff]  ;;  %v6882_v2 = vld [vmem:[#allocation122_spill] sm:$0xff] }
 0x1d3   : > { %2076 = vmatmul.f32.gmra.mxu1 %v6867_v7  ;;  %2208 = vmatpush.msrb.mxu2 %v1228_v9  ;;  %v1729_v60 = vpop.f32.mrf.mxu1  ;;  %v1646_v48 = vadd.f32 %v5633_v24, %v1617_v18  ;;  %v1152_v52 = vunpack.c.h.bf16 %v6880_v34  ;;  %v6885_v24 = vld [vmem:[#allocation120_spill] sm:$0xff] }
 0x1d4   : > { %2236 = vmatpush.msrb.mxu3 %v1296_v26  ;;  %2150 = vmatpush.msrb.mxu0 %v1100_v55  ;;  %v2262_v9 = vadd.f32 %v1785_v15, %v518_v53  ;;  %v1088_v26 = vunpack.c.h.bf16 %v6873_v21  ;;  %v1156_v55 = vunpack.c.h.bf16 %v6874_v63  ;;  %v1730_v41 = vadd.f32 %v1729_v60, %v1701_v4  ;;  %v6884_v53 = vld [vmem:[#allocation118_spill] sm:$0xff]  ;;  %v1787_v30 = vpop.f32.mrf.mxu3  ;;  %v515_v34 = vld [vmem:[#allocation2 + $0x58] sm:$0xff] }
 0x1d5   : > { %2178 = vmatpush.msrb.mxu1 %v1168_v38  ;;  %2209 = vmatpush.msrb.mxu2 %v1224_v47  ;;  %v1212_v38 = vunpack.c.h.bf16 %v6876_v13  ;;  %v6878_v47 = vld [vmem:[#allocation111_spill] sm:$0xff]  ;;  %v1758_v7 = vpop.f32.mrf.mxu2  ;;  %v1080_v43 = vunpack.c.h.bf16 %v6884_v53  ;;  %v1148_v19 = vunpack.c.h.bf16 %v6885_v24  ;;  %v1675_v15 = vadd.f32 %v5641_v8, %v1646_v48  ;;  %v519_v24 = vld [vmem:[#allocation2 + $0x8] sm:$0xff] }
 0x1d6   : > { %2237 = vmatpush.msrb.mxu3 %v1292_v22  ;;  %2151 = vmatpush.msrb.mxu0 %v1096_v33  ;;  %2278 = vst [vmem:[#allocation2 + $0x68] sm:$0xff] %v2262_v9  ;;  %v1280_v11 = vunpack.c.h.bf16 %v6878_v47  ;;  %v1084_v22 = vunpack.c.h.bf16 %v6879_v10  ;;  %v6881_v33 = vld [vmem:[#allocation115_spill] sm:$0xff]  ;;  %v1759_v23 = vadd.f32 %v1758_v7, %v1730_v41  ;;  %v1268_v9 = vunpack.c.h.bf16 %v5451_v0 }
 0x1d7   : > { %2179 = vmatpush.msrb.mxu1 %v1164_v44  ;;  %2210 = vmatpush.msrb.mxu2 %v1220_v25  ;;  %v1208_v31 = vunpack.c.h.bf16 %v6881_v33  ;;  %v6883_v44 = vld [vmem:[#allocation117_spill] sm:$0xff]  ;;  %v1140_v8 = vunpack.c.h.bf16 %v5456_v14  ;;  %v526_v21 = vld [vmem:[#allocation2 + $0x70] sm:$0xff] }
 0x1d8   : > { %2238 = vmatpush.msrb.mxu3 %v1288_v58  ;;  %2152 = vmatpush.msrb.mxu0 %v1092_v17  ;;  %v1276_v25 = vunpack.c.h.bf16 %v6883_v44  ;;  %v6886_v58 = vld [vmem:[#allocation121_spill] sm:$0xff]  ;;  %v1788_v4 = vadd.f32 %v1787_v30, %v1759_v23 }
 0x1d9   : > { %2180 = vmatpush.msrb.mxu1 %v1160_v40  ;;  %2050 = vmatmul.f32.gmra.mxu0 %v6875_v1  ;;  %v1204_v54 = vunpack.c.h.bf16 %v6886_v58  ;;  %v522_v17 = vld [vmem:[#allocation2 + $0x20] sm:$0xff]  ;;  %v1272_v40 = vunpack.c.h.bf16 %v5430_v6 }
 0x1da   : > { %2108 = vmatmul.f32.gmra.mxu2 %v6877_v27  ;;  %2239 = vmatpush.msrb.mxu3 %v1284_v29  ;;  %v1703_v29 = vpop.f32.mrf.mxu0 }
 0x1db   : > { %2211 = vmatpush.msrb.mxu2 %v1216_v12  ;;  %2153 = vmatpush.msrb.mxu0 %v1088_v26  ;;  %v1704_v3 = vadd.f32 %v1703_v29, %v1675_v15  ;;  %v2266_v12 = vadd.f32 %v1788_v4, %v522_v17  ;;  %v1732_v49 = vpop.f32.mrf.mxu1 }
 0x1dc   : > { %2181 = vmatpush.msrb.mxu1 %v1156_v55  ;;  %2137 = vmatmul.f32.gmra.mxu3 %v6882_v2  ;;  %v1790_v14 = vpop.f32.mrf.mxu3 }
 0x1dd   : > { %2079 = vmatmul.f32.gmra.mxu1 %v5445_v37  ;;  %2212 = vmatpush.msrb.mxu2 %v1212_v38  ;;  %v1144_v37 = vunpack.c.h.bf16 %v5442_v35  ;;  %2282 = vst [vmem:[#allocation2 + $0x20] sm:$0xff] %v2266_v12  ;;  %v1733_v6 = vadd.f32 %v1732_v49, %v1704_v3  ;;  %v1761_v35 = vpop.f32.mrf.mxu2  ;;  %v523_v3 = vld [vmem:[#allocation2 + $0x10] sm:$0xff] }
 0x1de   : > { %2240 = vmatpush.msrb.mxu3 %v1280_v11  ;;  %2154 = vmatpush.msrb.mxu0 %v1084_v22 }
 0x1df   : > { %2182 = vmatpush.msrb.mxu1 %v1152_v52  ;;  %2213 = vmatpush.msrb.mxu2 %v1208_v31  ;;  %v1762_v0 = vadd.f32 %v1761_v35, %v1733_v6 }
 0x1e0   : > { %2241 = vmatpush.msrb.mxu3 %v1276_v25  ;;  %2155 = vmatpush.msrb.mxu0 %v1080_v43 }
 0x1e1   : > { %2183 = vmatpush.msrb.mxu1 %v1148_v19  ;;  %2214 = vmatpush.msrb.mxu2 %v1204_v54  ;;  %v1791_v26 = vadd.f32 %v1790_v14, %v1762_v0 }
 0x1e2   : > { %2242 = vmatpush.msrb.mxu3 %v1272_v40  ;;  %2156 = vmatpush.msrb.mxu0 %v1076_v56  ;;  %v1810_v18 = vpop.f32.mrf.mxu0 }
 0x1e3   : > { %2184 = vmatpush.msrb.mxu1 %v1144_v37  ;;  %2157 = vmatmul.f32.vlgmr.msrb.gmra.mxu0 %v5465_v59  ;;  %v2270_v63 = vadd.f32 %v1791_v26, %v526_v21  ;;  %v1839_v59 = vpop.f32.mrf.mxu1 }
 0x1e4   : > { %2215 = vmatmul.f32.vlgmr.msrb.gmra.mxu2 %v5470_v39  ;;  %2243 = vmatpush.msrb.mxu3 %v1268_v9  ;;  %v1897_v55 = vpop.f32.mrf.mxu3  ;;  %v1840_v1 = vadd.f32 %v1839_v59, %v1810_v18 }
 0x1e5   : > { %2185 = vmatpush.msrb.mxu1 %v1140_v8  ;;  %2244 = vmatmul.f32.vlgmr.msrb.gmra.mxu3 %v5484_v16  ;;  %2286 = vst [vmem:[#allocation2 + $0x70] sm:$0xff] %v2270_v63  ;;  %v1868_v39 = vpop.f32.mrf.mxu2  ;;  %v527_v63 = vld [vmem:[#allocation2 + $0x78] sm:$0xff] }
 0x1e6   : > { %2186 = vmatmul.f32.vlgmr.msrb.gmra.mxu1 %v5478_v28  ;;  %v1869_v13 = vadd.f32 %v1868_v39, %v1840_v1 }
 0x1e8   : > { %v1898_v38 = vadd.f32 %v1897_v55, %v1869_v13 }
 0x1ea   : > { %v1813_v16 = vpop.f32.mrf.mxu0 }
 0x1eb   : > { %2160 = vmatmul.f32.gmra.mxu0 %v5501_v46  ;;  %v1842_v28 = vpop.f32.mrf.mxu1 }
 0x1ec   : > { %2218 = vmatmul.f32.gmra.mxu2 %v5506_v57 }
 0x1ed   : > { %2247 = vmatmul.f32.gmra.mxu3 %v5514_v36  ;;  %v1871_v46 = vpop.f32.mrf.mxu2 }
 0x1ee   : > { %2189 = vmatmul.f32.gmra.mxu1 %v5522_v5 }
 0x1f0   : > { %v1900_v36 = vpop.f32.mrf.mxu3 }
 0x1f2   : > { %v1816_v57 = vpop.f32.mrf.mxu0 }
 0x1f3   : > { %2163 = vmatmul.f32.gmra.mxu0 %v5541_v20 }
 0x1f4   : > { %2221 = vmatmul.f32.gmra.mxu2 %v5546_v32 }
 0x1f5   : > { %2250 = vmatmul.f32.gmra.mxu3 %v5554_v42 }
 0x1f6   : > { %2192 = vmatmul.f32.gmra.mxu1 %v5562_v45  ;;  %v1845_v5 = vpop.f32.mrf.mxu1  ;;  %v1874_v20 = vpop.f32.mrf.mxu2 }
 0x1f7   : > { %v1846_v2 = vadd.f32 %v1845_v5, %v1816_v57 }
 0x1f9   : > { %v1875_v25 = vadd.f32 %v1874_v20, %v1846_v2  ;;  %v516_v2 = vld [vmem:[#allocation2 + $0x18] sm:$0xff] }
 0x1fb   : > { %2166 = vmatmul.f32.gmra.mxu0 %v5581_v61 }
 0x1fc   : > { %2224 = vmatmul.f32.gmra.mxu2 %v5586_v51  ;;  %v1843_v51 = vadd.f32 %v1842_v28, %v1813_v16 }
 0x1fd   : > { %2253 = vmatmul.f32.gmra.mxu3 %v5594_v50 }
 0x1fe   : > { %2195 = vmatmul.f32.gmra.mxu1 %v5602_v62  ;;  %v1872_v48 = vadd.f32 %v1871_v46, %v1843_v51 }
 0x200   : > { %v1901_v41 = vadd.f32 %v1900_v36, %v1872_v48 }
 0x201   : > { %v1903_v32 = vpop.f32.mrf.mxu3 }
 0x202   : > { %v1819_v60 = vpop.f32.mrf.mxu0  ;;  %v1904_v58 = vadd.f32 %v1903_v32, %v1875_v25 }
 0x207   : > { %v1877_v45 = vpop.f32.mrf.mxu2 }
 0x209   : > { %v1848_v42 = vpop.f32.mrf.mxu1 }
 0x20a   : > { %v1849_v40 = vadd.f32 %v1848_v42, %v1819_v60 }
 0x20c   : > { %v1878_v29 = vadd.f32 %v1877_v45, %v1849_v40  ;;  %v520_v40 = vld [vmem:[#allocation2 + $0x48] sm:$0xff] }
 0x20f   : > { %v1984_v22 = vpop.f32.mrf.mxu2 }
 0x213   : > { %v1926_v47 = vpop.f32.mrf.mxu0 }
 0x214   : > { %v1906_v27 = vpop.f32.mrf.mxu3  ;;  %v1927_v61 = vadd.f32 %v1926_v47, %v1898_v38 }
 0x215   : > { %v1955_v11 = vpop.f32.mrf.mxu1  ;;  %v1907_v8 = vadd.f32 %v1906_v27, %v1878_v29 }
 0x216   : > { %v1956_v10 = vadd.f32 %v1955_v11, %v1927_v61 }
 0x218   : > { %v1985_v50 = vadd.f32 %v1984_v22, %v1956_v10 }
 0x219   : > { %v1987_v43 = vpop.f32.mrf.mxu2 }
 0x21b   : > { %v1929_v62 = vpop.f32.mrf.mxu0 }
 0x21c   : > { %v2013_v52 = vpop.f32.mrf.mxu3  ;;  %v1930_v31 = vadd.f32 %v1929_v62, %v1901_v41 }
 0x21d   : > { %v2014_v33 = vadd.f32 %v2013_v52, %v1985_v50 }
 0x21e   : > { %v1958_v44 = vpop.f32.mrf.mxu1 }
 0x21f   : > { %v2259_v7 = vadd.f32 %v2014_v33, %v515_v34  ;;  %v1959_v53 = vadd.f32 %v1958_v44, %v1930_v31 }
 0x221   : > { %2275 = vst [vmem:[#allocation2 + $0x58] sm:$0xff] %v2259_v7  ;;  %v1988_v23 = vadd.f32 %v1987_v43, %v1959_v53 }
 0x224   : > { %v2016_v19 = vpop.f32.mrf.mxu3  ;;  %v1932_v54 = vpop.f32.mrf.mxu0 }
 0x225   : > { %v2017_v17 = vadd.f32 %v2016_v19, %v1988_v23  ;;  %v1933_v30 = vadd.f32 %v1932_v54, %v1904_v58 }
 0x227   : > { %v2263_v15 = vadd.f32 %v2017_v17, %v519_v24 }
 0x228   : > { %v1961_v56 = vpop.f32.mrf.mxu1 }
 0x229   : > { %2279 = vst [vmem:[#allocation2 + $0x8] sm:$0xff] %v2263_v15  ;;  %v1962_v4 = vadd.f32 %v1961_v56, %v1933_v30 }
 0x22b   : > { %v1990_v37 = vpop.f32.mrf.mxu2 }
 0x22c   : > { %v1991_v9 = vadd.f32 %v1990_v37, %v1962_v4 }
 0x22d   : > { %v2019_v12 = vpop.f32.mrf.mxu3 }
 0x22e   : > { %v1935_v49 = vpop.f32.mrf.mxu0  ;;  %v2020_v6 = vadd.f32 %v2019_v12, %v1991_v9 }
 0x22f   : > { %v1936_v35 = vadd.f32 %v1935_v49, %v1907_v8 }
 0x230   : > { %v2267_v0 = vadd.f32 %v2020_v6, %v523_v3 }
 0x232   : > { %2283 = vst [vmem:[#allocation2 + $0x10] sm:$0xff] %v2267_v0  ;;  %v1964_v21 = vpop.f32.mrf.mxu1 }
 0x233   : > { %v1965_v14 = vadd.f32 %v1964_v21, %v1936_v35  ;;  %v524_v21 = vld [vmem:[#allocation2 + $0x38] sm:$0xff] }
 0x235   : > { %v1993_v26 = vpop.f32.mrf.mxu2 }
 0x236   : > { %v1994_v18 = vadd.f32 %v1993_v26, %v1965_v14 }
 0x237   : > { %v2022_v59 = vpop.f32.mrf.mxu3 }
 0x238   : > { %v2023_v39 = vadd.f32 %v2022_v59, %v1994_v18  ;;  %v2042_v16 = vpop.f32.mrf.mxu0 }
 0x23a   : > { %v2271_v55 = vadd.f32 %v2023_v39, %v527_v63 }
 0x23b   : > { %v2071_v28 = vpop.f32.mrf.mxu1 }
 0x23c   : > { %2287 = vst [vmem:[#allocation2 + $0x78] sm:$0xff] %v2271_v55  ;;  %v2072_v38 = vadd.f32 %v2071_v28, %v2042_v16  ;;  %v528_v28 = vld [vmem:[#allocation2 + $0x28] sm:$0xff] }
 0x23f   : > { %v2100_v46 = vpop.f32.mrf.mxu2 }
 0x240   : > { %v2101_v47 = vadd.f32 %v2100_v46, %v2072_v38 }
 0x242   : > { %v2045_v57 = vpop.f32.mrf.mxu0  ;;  %v2129_v36 = vpop.f32.mrf.mxu3 }
 0x243   : > { %v2130_v51 = vadd.f32 %v2129_v36, %v2101_v47 }
 0x246   : > { %v2074_v5 = vpop.f32.mrf.mxu1 }
 0x247   : > { %v2075_v10 = vadd.f32 %v2074_v5, %v2045_v57 }
 0x249   : > { %v2103_v20 = vpop.f32.mrf.mxu2 }
 0x24a   : > { %v2104_v41 = vadd.f32 %v2103_v20, %v2075_v10 }
 0x24b   : > { %v2132_v60 = vpop.f32.mrf.mxu3 }
 0x24c   : > { %v2048_v32 = vpop.f32.mrf.mxu0  ;;  %v2133_v52 = vadd.f32 %v2132_v60, %v2104_v41 }
 0x250   : > { %v2077_v1 = vpop.f32.mrf.mxu1 }
 0x251   : > { %v2078_v44 = vadd.f32 %v2077_v1, %v2048_v32 }
 0x253   : > { %v2106_v42 = vpop.f32.mrf.mxu2 }
 0x254   : > { %v2107_v23 = vadd.f32 %v2106_v42, %v2078_v44 }
 0x255   : > { %v2135_v13 = vpop.f32.mrf.mxu3 }
 0x256   : > { %v2051_v45 = vpop.f32.mrf.mxu0  ;;  %v2136_v54 = vadd.f32 %v2135_v13, %v2107_v23 }
 0x25a   : > { %v2080_v27 = vpop.f32.mrf.mxu1 }
 0x25b   : > { %v2081_v56 = vadd.f32 %v2080_v27, %v2051_v45 }
 0x25d   : > { %v2109_v61 = vpop.f32.mrf.mxu2 }
 0x25e   : > { %v2110_v9 = vadd.f32 %v2109_v61, %v2081_v56 }
 0x25f   : > { %v2138_v11 = vpop.f32.mrf.mxu3 }
 0x260   : > { %v2158_v48 = vpop.f32.mrf.mxu0  ;;  %v2139_v49 = vadd.f32 %v2138_v11, %v2110_v9 }
 0x261   : > { %v2159_v22 = vadd.f32 %v2158_v48, %v2130_v51 }
 0x263   : > { %v2187_v50 = vpop.f32.mrf.mxu1 }
 0x264   : > { %v2188_v62 = vadd.f32 %v2187_v50, %v2159_v22 }
 0x267   : > { %v2216_v34 = vpop.f32.mrf.mxu2 }
 0x268   : > { %v2217_v33 = vadd.f32 %v2216_v34, %v2188_v62  ;;  %v2161_v31 = vpop.f32.mrf.mxu0  ;;  %v2245_v7 = vpop.f32.mrf.mxu3 }
 0x269   : > { %v2162_v25 = vadd.f32 %v2161_v31, %v2133_v52 }
 0x26a   : > { %v2246_v53 = vadd.f32 %v2245_v7, %v2217_v33 }
 0x26b   : > { %v2190_v43 = vpop.f32.mrf.mxu1 }
 0x26c   : > { %v2260_v24 = vadd.f32 %v2246_v53, %v516_v2  ;;  %v2191_v19 = vadd.f32 %v2190_v43, %v2162_v25 }
 0x26e   : > { %2276 = vst [vmem:[#allocation2 + $0x18] sm:$0xff] %v2260_v24 }
 0x26f   : > { %v2219_v58 = vpop.f32.mrf.mxu2 }
 0x270   : > { %v2220_v17 = vadd.f32 %v2219_v58, %v2191_v19  ;;  %v2164_v30 = vpop.f32.mrf.mxu0  ;;  %v2248_v15 = vpop.f32.mrf.mxu3 }
 0x271   : > { %v2165_v29 = vadd.f32 %v2164_v30, %v2136_v54 }
 0x272   : > { %v2249_v4 = vadd.f32 %v2248_v15, %v2220_v17 }
 0x273   : > { %v2193_v37 = vpop.f32.mrf.mxu1 }
 0x274   : > { %v2264_v3 = vadd.f32 %v2249_v4, %v520_v40  ;;  %v2194_v12 = vadd.f32 %v2193_v37, %v2165_v29 }
 0x276   : > { %2280 = vst [vmem:[#allocation2 + $0x48] sm:$0xff] %v2264_v3 }
 0x277   : > { %v2222_v8 = vpop.f32.mrf.mxu2 }
 0x278   : > { %v2223_v6 = vadd.f32 %v2222_v8, %v2194_v12  ;;  %v2167_v35 = vpop.f32.mrf.mxu0  ;;  %v2251_v0 = vpop.f32.mrf.mxu3 }
 0x279   : > { %v2168_v14 = vadd.f32 %v2167_v35, %v2139_v49 }
 0x27a   : > { %v2252_v26 = vadd.f32 %v2251_v0, %v2223_v6 }
 0x27b   : > { %v2196_v18 = vpop.f32.mrf.mxu1 }
 0x27c   : > { %v2268_v63 = vadd.f32 %v2252_v26, %v524_v21  ;;  %v2197_v59 = vadd.f32 %v2196_v18, %v2168_v14 }
 0x27e   : > { %2284 = vst [vmem:[#allocation2 + $0x38] sm:$0xff] %v2268_v63 }
 0x27f   : > { %v2225_v39 = vpop.f32.mrf.mxu2 }
 0x280   : > { %v2226_v16 = vadd.f32 %v2225_v39, %v2197_v59  ;;  %v2254_v55 = vpop.f32.mrf.mxu3 }
 0x282   : > { %v2255_v46 = vadd.f32 %v2254_v55, %v2226_v16  ;;  %2292 = sbr.rel (%p3252_p1) target bundleno = 1414 (0x586), region = 92 }
 0x284   : > { %v2272_v57 = vadd.f32 %v2255_v46, %v528_v28 }
 0x286   : > { %2288 = vst [vmem:[#allocation2 + $0x28] sm:$0xff] %v2272_v57 }
 0x287   : > { %v5735_v36 = vld [vmem:[#allocation8 + $0x178] sm:$0xff]  ;;  %v5739_v20 = vld [vmem:[#allocation8 + $0x170] sm:$0xff]  ;;  %v5753_v61 = vld [vmem:[#allocation8 + $0x168] sm:$0xff]  ;;  %vm2939_vm0 = vcmask 523264   ;;  %vm2981_vm1 = vcmask 15360  }
 0x288   : > { %v5737_v5 = vld [vmem:[#allocation8 + $0x78] sm:$0xff]  ;;  %v2509_v60 = vunpack.c.l.bf16 %v5735_v36  ;;  %v2507_v1 = vunpack.c.l.bf16 %v5739_v20  ;;  %v5746_v13 = vld [vmem:[#allocation8 + $0x70] sm:$0xff]  ;;  %v5757_v51 = vld [vmem:[#allocation8 + $0x68] sm:$0xff]  ;;  %v2505_v48 = vunpack.c.l.bf16 %v5753_v61 }
 0x289   : > { %v2445_v32 = vunpack.c.l.bf16 %v5737_v5  ;;  %v5744_v42 = vld [vmem:[#allocation8 + $0x1f8] sm:$0xff]  ;;  %v2443_v27 = vunpack.c.l.bf16 %v5746_v13  ;;  %v5755_v11 = vld [vmem:[#allocation8 + $0x1f0] sm:$0xff]  ;;  %v2441_v22 = vunpack.c.l.bf16 %v5757_v51  ;;  %v5764_v41 = vld [vmem:[#allocation8 + $0x160] sm:$0xff] }
 0x28a   : > { %v5748_v45 = vld [vmem:[#allocation8 + $0xf8] sm:$0xff]  ;;  %v2541_v38 = vunpack.c.l.bf16 %v5744_v42  ;;  %2607 = vmatpush.msra.mxu2 %v2509_v60  ;;  %v2539_v10 = vunpack.c.l.bf16 %v5755_v11  ;;  %v5762_v50 = vld [vmem:[#allocation8 + $0xf0] sm:$0xff]  ;;  %v5766_v62 = vld [vmem:[#allocation8 + $0x1e8] sm:$0xff]  ;;  %v2503_v2 = vunpack.c.l.bf16 %v5764_v41 }
 0x28b   : > { %v2477_v47 = vunpack.c.l.bf16 %v5748_v45  ;;  %2549 = vmatpush.msra.mxu0 %v2445_v32  ;;  %v2475_v34 = vunpack.c.l.bf16 %v5762_v50  ;;  %v2537_v52 = vunpack.c.l.bf16 %v5766_v62  ;;  %v5770_v33 = vld [vmem:[#allocation8 + $0x60] sm:$0xff]  ;;  %v5772_v31 = vld [vmem:[#allocation8 + $0xe8] sm:$0xff]  ;;  %v5774_v7 = vld [vmem:[#allocation8 + $0x158] sm:$0xff] }
 0x28c   : > { %2636 = vmatpush.msra.mxu3 %v2541_v38  ;;  %2608 = vmatpush.msra.mxu2 %v2507_v1  ;;  %v2439_v44 = vunpack.c.l.bf16 %v5770_v33  ;;  %v2473_v25 = vunpack.c.l.bf16 %v5772_v31  ;;  %v5779_v53 = vld [vmem:[#allocation8 + $0x1e0] sm:$0xff]  ;;  %v5781_v43 = vld [vmem:[#allocation8 + $0x58] sm:$0xff]  ;;  %v5787_v58 = vld [vmem:[#allocation8 + $0x150] sm:$0xff]  ;;  %v2501_v30 = vunpack.c.l.bf16 %v5774_v7 }
 0x28d   : > { %2578 = vmatpush.msra.mxu1 %v2477_v47  ;;  %2550 = vmatpush.msra.mxu0 %v2443_v27  ;;  %v5783_v23 = vld [vmem:[#allocation8 + $0xe0] sm:$0xff]  ;;  %v2535_v24 = vunpack.c.l.bf16 %v5779_v53  ;;  %v5789_v54 = vld [vmem:[#allocation8 + $0x1d8] sm:$0xff]  ;;  %v5791_v17 = vld [vmem:[#allocation8 + $0x50] sm:$0xff]  ;;  %v2437_v15 = vunpack.c.l.bf16 %v5781_v43  ;;  %v2499_v12 = vunpack.c.l.bf16 %v5787_v58 }
 0x28e   : > { %2637 = vmatpush.msra.mxu3 %v2539_v10  ;;  %v2471_v19 = vunpack.c.l.bf16 %v5783_v23  ;;  %2609 = vmatpush.msra.mxu2 %v2505_v48  ;;  %v5795_v40 = vld [vmem:[#allocation8 + $0xd8] sm:$0xff]  ;;  %v5797_v56 = vld [vmem:[#allocation8 + $0x1d0] sm:$0xff]  ;;  %v2533_v29 = vunpack.c.l.bf16 %v5789_v54  ;;  %v5801_v37 = vld [vmem:[#allocation8 + $0x148] sm:$0xff]  ;;  %v2435_v8 = vunpack.c.l.bf16 %v5791_v17 }
 0x28f   : > { %2579 = vmatpush.msra.mxu1 %v2475_v34  ;;  %2551 = vmatpush.msra.mxu0 %v2441_v22  ;;  %v2469_v4 = vunpack.c.l.bf16 %v5795_v40  ;;  %v5803_v9 = vld [vmem:[#allocation8 + $0x48] sm:$0xff]  ;;  %v5805_v3 = vld [vmem:[#allocation8 + $0xd0] sm:$0xff]  ;;  %v2531_v35 = vunpack.c.l.bf16 %v5797_v56  ;;  %v5815_v21 = vld [vmem:[#allocation8 + $0x140] sm:$0xff]  ;;  %v2497_v26 = vunpack.c.l.bf16 %v5801_v37 }
 0x290   : > { %2638 = vmatpush.msra.mxu3 %v2537_v52  ;;  %2610 = vmatpush.msra.mxu2 %v2503_v2  ;;  %v5809_v49 = vld [vmem:[#allocation8 + $0x1c8] sm:$0xff]  ;;  %v2467_v0 = vunpack.c.l.bf16 %v5805_v3  ;;  %v5817_v14 = vld [vmem:[#allocation8 + $0x40] sm:$0xff]  ;;  %v2433_v18 = vunpack.c.l.bf16 %v5803_v9  ;;  %v5827_v55 = vld [vmem:[#allocation8 + $0x138] sm:$0xff]  ;;  %v2495_v46 = vunpack.c.l.bf16 %v5815_v21 }
 0x291   : > { %2580 = vmatpush.msra.mxu1 %v2473_v25  ;;  %2552 = vmatpush.msra.mxu0 %v2439_v44  ;;  %v5811_v6 = vld [vmem:[#allocation8 + $0xc8] sm:$0xff]  ;;  %v5821_v63 = vld [vmem:[#allocation8 + $0x1c0] sm:$0xff]  ;;  %v2529_v39 = vunpack.c.l.bf16 %v5809_v49  ;;  %v5829_v28 = vld [vmem:[#allocation8 + $0x38] sm:$0xff]  ;;  %v2431_v57 = vunpack.c.l.bf16 %v5817_v14  ;;  %v2493_v48 = vunpack.c.l.bf16 %v5827_v55 }
 0x292   : > { %2639 = vmatpush.msra.mxu3 %v2535_v24  ;;  %2611 = vmatpush.msra.mxu2 %v2501_v30  ;;  %v5823_v59 = vld [vmem:[#allocation8 + $0xc0] sm:$0xff]  ;;  %v2465_v16 = vunpack.c.l.bf16 %v5811_v6  ;;  %v5833_v60 = vld [vmem:[#allocation8 + $0x1b8] sm:$0xff]  ;;  %v2527_v1 = vunpack.c.l.bf16 %v5821_v63  ;;  %v5839_v27 = vld [vmem:[#allocation8 + $0x130] sm:$0xff]  ;;  %v2429_v10 = vunpack.c.l.bf16 %v5829_v28 }
 0x293   : > { %2581 = vmatpush.msra.mxu1 %v2471_v19  ;;  %2553 = vmatpush.msra.mxu0 %v2437_v15  ;;  %6887 = vst [vmem:[#allocation123_spill] sm:$0xff] %v5833_v60  ;;  %v5835_v32 = vld [vmem:[#allocation8 + $0xb8] sm:$0xff]  ;;  %v2463_v38 = vunpack.c.l.bf16 %v5823_v59  ;;  %v5841_v47 = vld [vmem:[#allocation8 + $0x30] sm:$0xff]  ;;  %v2525_v52 = vunpack.c.l.bf16 %v5833_v60  ;;  %v5851_v44 = vld [vmem:[#allocation8 + $0x128] sm:$0xff]  ;;  %v2491_v24 = vunpack.c.l.bf16 %v5839_v27 }
 0x294   : > { %2640 = vmatpush.msra.mxu3 %v2533_v29  ;;  %2612 = vmatpush.msra.mxu2 %v2499_v12  ;;  %6888 = vst [vmem:[#allocation124_spill] sm:$0xff] %v5835_v32  ;;  %v5845_v22 = vld [vmem:[#allocation8 + $0x1b0] sm:$0xff]  ;;  %v2461_v2 = vunpack.c.l.bf16 %v5835_v32  ;;  %v5853_v25 = vld [vmem:[#allocation8 + $0x28] sm:$0xff]  ;;  %v2427_v19 = vunpack.c.l.bf16 %v5841_v47  ;;  %v5863_v12 = vld [vmem:[#allocation8 + $0x120] sm:$0xff] }
 0x295   : > { %2582 = vmatpush.msra.mxu1 %v2469_v4  ;;  %2554 = vmatpush.msra.mxu0 %v2435_v8  ;;  %6889 = vst [vmem:[#allocation125_spill] sm:$0xff] %v5841_v47  ;;  %v5847_v34 = vld [vmem:[#allocation8 + $0xb0] sm:$0xff]  ;;  %v5857_v30 = vld [vmem:[#allocation8 + $0x1a8] sm:$0xff]  ;;  %v2523_v29 = vunpack.c.l.bf16 %v5845_v22  ;;  %v5865_v8 = vld [vmem:[#allocation8 + $0x20] sm:$0xff] }
 0x296   : > { %2641 = vmatpush.msra.mxu3 %v2531_v35  ;;  %2613 = vmatpush.msra.mxu2 %v2497_v26  ;;  %6890 = vst [vmem:[#allocation126_spill] sm:$0xff] %v5845_v22  ;;  %v5859_v15 = vld [vmem:[#allocation8 + $0xa8] sm:$0xff]  ;;  %v2459_v4 = vunpack.c.l.bf16 %v5847_v34  ;;  %v2489_v35 = vunpack.c.l.bf16 %v5851_v44  ;;  %v5869_v26 = vld [vmem:[#allocation8 + $0x1a0] sm:$0xff] }
 0x297   : > { %2583 = vmatpush.msra.mxu1 %v2467_v0  ;;  %2555 = vmatpush.msra.mxu0 %v2433_v18  ;;  %6891 = vst [vmem:[#allocation127_spill] sm:$0xff] %v5847_v34  ;;  %v2425_v0 = vunpack.c.l.bf16 %v5853_v25  ;;  %v5871_v18 = vld [vmem:[#allocation8 + $0xa0] sm:$0xff]  ;;  %v5883_v34 = vld [vmem:[#allocation8 + $0x98] sm:$0xff]  ;;  %v5903_v22 = vld [vmem:[#allocation8 + $0x108] sm:$0xff] }
 0x298   : > { %2642 = vmatpush.msra.mxu3 %v2529_v39  ;;  %6892 = vst [vmem:[#allocation128_spill] sm:$0xff] %v5851_v44  ;;  %2614 = vmatpush.msra.mxu2 %v2495_v46  ;;  %v2521_v39 = vunpack.c.l.bf16 %v5857_v30  ;;  %v5875_v46 = vld [vmem:[#allocation8 + $0x118] sm:$0xff]  ;;  %v5911_v32 = vld [vmem:[#allocation8 + $0x188] sm:$0xff]  ;;  %v5917_v47 = vld [vmem:[#allocation8 + $0x100] sm:$0xff] }
 0x299   : > { %2584 = vmatpush.msra.mxu1 %v2465_v16  ;;  %6893 = vst [vmem:[#allocation129_spill] sm:$0xff] %v5853_v25  ;;  %2556 = vmatpush.msra.mxu0 %v2431_v57  ;;  %v2457_v16 = vunpack.c.l.bf16 %v5859_v15  ;;  %v5877_v57 = vld [vmem:[#allocation8 + $0x18] sm:$0xff]  ;;  %v2453_v25 = vunpack.c.l.bf16 %v5883_v34  ;;  %v5926_v60 = vld [vmem:[#allocation8 + $0x180] sm:$0xff] }
 0x29a   : > { %6894 = vst [vmem:[#allocation130_spill] sm:$0xff] %v5857_v30  ;;  %2643 = vmatpush.msra.mxu3 %v2527_v1  ;;  %2615 = vmatpush.msra.mxu2 %v2493_v48  ;;  %v2309_v1 = vld [vmem:[#allocation7] sm:$0xf]  ;;  %v2423_v48 = vunpack.c.l.bf16 %v5865_v8  ;;  %v5889_v30 = vld [vmem:[#allocation8 + $0x10] sm:$0xff] }
 0x29b   : > { %6895 = vst [vmem:[#allocation131_spill] sm:$0xff] %v5859_v15  ;;  %2585 = vmatpush.msra.mxu1 %v2463_v38  ;;  %2557 = vmatpush.msra.mxu0 %v2429_v10  ;;  %v2487_v38 = vunpack.c.l.bf16 %v5863_v12  ;;  %v5881_v10 = vld [vmem:[#allocation8 + $0x198] sm:$0xff]  ;;  %v5887_v15 = vld [vmem:[#allocation8 + $0x110] sm:$0xff]  ;;  %v2419_v44 = vunpack.c.l.bf16 %v5889_v30 }
 0x29c   : > { %6896 = vst [vmem:[#allocation132_spill] sm:$0xff] %v5863_v12  ;;  %2644 = vmatpush.msra.mxu3 %v2525_v52  ;;  %2616 = vmatpush.msra.mxu2 %v2491_v24  ;;  %v2519_v52 = vunpack.c.l.bf16 %v5869_v26  ;;  %v5891_v24 = vperm.slane %v2309_v1, 2  ;;  %v5895_v12 = vld [vmem:[#allocation8 + $0x190] sm:$0xff] }
 0x29d   : > { %6897 = vst [vmem:[#allocation133_spill] sm:$0xff] %v5865_v8  ;;  %2586 = vmatpush.msra.mxu1 %v2461_v2  ;;  %2558 = vmatpush.msra.mxu0 %v2427_v19  ;;  %v2455_v2 = vunpack.c.l.bf16 %v5871_v18  ;;  %v2485_v19 = vunpack.c.l.bf16 %v5875_v46  ;;  %v2421_v8 = vunpack.c.l.bf16 %v5877_v57 }
 0x29e   : > { %6898 = vst [vmem:[#allocation134_spill] sm:$0xff] %v5869_v26  ;;  %2645 = vmatpush.msra.mxu3 %v2523_v29  ;;  %2617 = vmatpush.msra.mxu2 %v2489_v35  ;;  %v5897_v29 = vld [vmem:[#allocation8 + $0x90] sm:$0xff]  ;;  %v5899_v26 = vperm.slane %v2309_v1, 0  ;;  %v5905_v35 = vld [vmem:[#allocation8 + $0x8] sm:$0xff] }
 0x29f   : > { %6899 = vst [vmem:[#allocation135_spill] sm:$0xff] %v5871_v18  ;;  %2587 = vmatpush.msra.mxu1 %v2459_v4  ;;  %2559 = vmatpush.msra.mxu0 %v2425_v0  ;;  %v2295_v4 = vld [vmem:[#allocation2 + $0x58] sm:$0xff]  ;;  %v2517_v18 = vunpack.c.l.bf16 %v5881_v10  ;;  %v2293_v0 = vld [vmem:[#allocation2 + $0x30] sm:$0xff] }
 0x2a0   : > { %6900 = vst [vmem:[#allocation136_spill] sm:$0xff] %v5875_v46  ;;  %2646 = vmatpush.msra.mxu3 %v2521_v39  ;;  %v5907_v46 = vperm.slane %v2309_v1, 3  ;;  %2618 = vmatpush.msra.mxu2 %v2487_v38  ;;  %v5913_v39 = vld [vmem:[#allocation8 + $0x88] sm:$0xff]  ;;  %v5920_v38 = vadd.f32 %v5891_v24, %v2295_v4  ;;  %v2513_v4 = vunpack.c.l.bf16 %v5911_v32 }
 0x2a1   : > { %6901 = vst [vmem:[#allocation137_spill] sm:$0xff] %v5877_v57  ;;  %2588 = vmatpush.msra.mxu1 %v2457_v16  ;;  %2560 = vmatpush.msra.mxu0 %v2423_v48  ;;  %v2483_v57 = vunpack.c.l.bf16 %v5887_v15  ;;  %v2296_v16 = vld [vmem:[#allocation2 + $0x18] sm:$0xff]  ;;  %v5922_v48 = vld [vmem:[#allocation8] sm:$0xff] }
 0x2a2   : > { %6902 = vst [vmem:[#allocation138_spill] sm:$0xff] %v5881_v10  ;;  %2647 = vmatpush.msra.mxu3 %v2519_v52  ;;  %v2451_v10 = vunpack.c.l.bf16 %v5897_v29  ;;  %2619 = vmatpush.msra.mxu2 %v2485_v19  ;;  %v5929_v52 = vadd.f32 %v5899_v26, %v2293_v0  ;;  %v5936_v19 = vadd.f32 %v5907_v46, %v2296_v16  ;;  %v5944_v16 = vld [vmem:[#allocation8 + $0x80] sm:$0xff] }
 0x2a3   : > { %6903 = vst [vmem:[#allocation139_spill] sm:$0xff] %v5883_v34  ;;  %2589 = vmatpush.msra.mxu1 %v2455_v2  ;;  %v2515_v34 = vunpack.c.l.bf16 %v5895_v12  ;;  %2561 = vmatpush.msra.mxu0 %v2421_v8  ;;  %v5931_v2 = vperm.slane %v2309_v1, 1  ;;  %v2294_v8 = vld [vmem:[#allocation2] sm:$0xff]  ;;  %v2337_v1 = vmax.f32 %v5920_v38, 0.0  ;;  %v3348_v38 = vld [vmem:[%s6250_s5 + $0x28] sm:$0xff]  }
 0x2a4   : > { %6904 = vst [vmem:[#allocation140_spill] sm:$0xff] %v5887_v15  ;;  %v2417_v15 = vunpack.c.l.bf16 %v5905_v35  ;;  %2648 = vmatpush.msra.mxu3 %v2517_v18  ;;  %2620 = vmatpush.msra.mxu2 %v2483_v57  ;;  %v2510_v18 = vunpack.c.h.bf16 %v5735_v36  ;;  %v2335_v0 = vmax.f32 %v5929_v52, 0.0  ;;  %v2446_v57 = vunpack.c.h.bf16 %v5737_v5 }
 0x2a5   : > { %6905 = vst [vmem:[#allocation141_spill] sm:$0xff] %v5889_v30  ;;  %v2481_v30 = vunpack.c.l.bf16 %v5903_v22  ;;  %2590 = vmatpush.msra.mxu1 %v2453_v25  ;;  %2562 = vmatpush.msra.mxu0 %v2419_v44  ;;  %v2511_v25 = vunpack.c.l.bf16 %v5926_v60  ;;  %v5947_v44 = vadd.f32 %v5931_v2, %v2294_v8  ;;  %v2542_v36 = vunpack.c.h.bf16 %v5744_v42  ;;  %v2300_v42 = vld [vmem:[#allocation2 + $0x48] sm:$0xff] }
 0x2a6   : > { %6906 = vst [vmem:[#allocation142_spill] sm:$0xff] %v5895_v12  ;;  %v2415_v12 = vunpack.c.l.bf16 %v5922_v48  ;;  %2649 = vmatpush.msra.mxu3 %v2515_v34  ;;  %v2338_v34 = vmax.f32 %v5936_v19, 0.0  ;;  %v2442_v8 = vunpack.c.h.bf16 %v5757_v51  ;;  %v2440_v51 = vunpack.c.h.bf16 %v5770_v33 }
 0x2a7   : > { %6907 = vst [vmem:[#allocation143_spill] sm:$0xff] %v5897_v29  ;;  %v2449_v29 = vunpack.c.l.bf16 %v5913_v39  ;;  %2591 = vmatpush.msra.mxu1 %v2451_v10  ;;  %2621 = vmatpush.msra.mxu2 %v2481_v30  ;;  %v2299_v10 = vld [vmem:[#allocation2 + $0x8] sm:$0xff]  ;;  %v2508_v30 = vunpack.c.h.bf16 %v5739_v20  ;;  %v2336_v5 = vmax.f32 %v5947_v44, 0.0  ;;  %v2438_v33 = vunpack.c.h.bf16 %v5781_v43  ;;  %v3346_v44 = vld [vmem:[%s6250_s5 + $0x18] sm:$0xff]  }
 0x2a8   : > { %6908 = vst [vmem:[#allocation144_spill] sm:$0xff] %v5905_v35  ;;  %v2479_v35 = vunpack.c.l.bf16 %v5917_v47  ;;  %2563 = vmatpush.msra.mxu0 %v2417_v15  ;;  %2650 = vmatpush.msra.mxu3 %v2513_v4  ;;  %v2447_v15 = vunpack.c.l.bf16 %v5944_v16  ;;  %v2444_v4 = vunpack.c.h.bf16 %v5746_v13  ;;  %v5962_v20 = vadd.f32 %v5891_v24, %v2299_v10 }
 0x2a9   : > { %2592 = vmatpush.msra.mxu1 %v2449_v29  ;;  %v2297_v29 = vld [vmem:[#allocation2 + $0x50] sm:$0xff]  ;;  %v2540_v13 = vunpack.c.h.bf16 %v5755_v11  ;;  %v2476_v10 = vunpack.c.h.bf16 %v5762_v50  ;;  %v2436_v43 = vunpack.c.h.bf16 %v5791_v17  ;;  %v2468_v17 = vunpack.c.h.bf16 %v5805_v3 }
 0x2aa   : > { %2622 = vmatpush.msra.mxu2 %v2479_v35  ;;  %2564 = vmatpush.msra.mxu0 %v2415_v12  ;;  %v2506_v12 = vunpack.c.h.bf16 %v5753_v61  ;;  %v2478_v35 = vunpack.c.h.bf16 %v5748_v45  ;;  %v5971_v61 = vadd.f32 %v5899_v26, %v2297_v29  ;;  %v5976_v45 = vadd.f32 %v5907_v46, %v2300_v42 }
 0x2ab   : > { %2623 = vmatmul.f32.vlgmr.msra.gmra.mxu2 %v2337_v1  ;;  %2651 = vmatpush.msra.mxu3 %v2511_v25  ;;  %v2504_v25 = vunpack.c.h.bf16 %v5764_v41  ;;  %v2341_v11 = vmax.f32 %v5962_v20, 0.0  ;;  %v2474_v41 = vunpack.c.h.bf16 %v5772_v31  ;;  %v2472_v31 = vunpack.c.h.bf16 %v5783_v23  ;;  %v2304_v23 = vld [vmem:[#allocation2 + $0x38] sm:$0xff] }
 0x2ac   : > { %2723 = vmatpush.msrb.mxu2 %v2510_v18  ;;  %2565 = vmatmul.f32.vlgmr.msra.gmra.mxu0 %v2335_v0  ;;  %v2298_v18 = vld [vmem:[#allocation2 + $0x68] sm:$0xff]  ;;  %v2470_v42 = vunpack.c.h.bf16 %v5795_v40  ;;  %v2432_v3 = vunpack.c.h.bf16 %v5817_v14  ;;  %v2430_v14 = vunpack.c.h.bf16 %v5829_v28  ;;  %v3287_v19 = vunpack.c.h.bf16 %v3348_v38 }
 0x2ad   : > { %2652 = vmatmul.f32.vlgmr.msra.gmra.mxu3 %v2338_v34  ;;  %2665 = vmatpush.msrb.mxu0 %v2446_v57  ;;  %v2538_v57 = vunpack.c.h.bf16 %v5766_v62  ;;  %v5985_v50 = vadd.f32 %v5931_v2, %v2298_v18  ;;  %v2536_v62 = vunpack.c.h.bf16 %v5779_v53  ;;  %v2534_v53 = vunpack.c.h.bf16 %v5789_v54  ;;  %v6910_v28 = vld [vmem:[#allocation125_spill] sm:$0xff] }
 0x2ae   : > { %2724 = vmatpush.msrb.mxu2 %v2508_v30  ;;  %2752 = vmatpush.msrb.mxu3 %v2542_v36  ;;  %v2502_v30 = vunpack.c.h.bf16 %v5774_v7  ;;  %v2339_v36 = vmax.f32 %v5971_v61, 0.0  ;;  %v2500_v7 = vunpack.c.h.bf16 %v5787_v58  ;;  %v2498_v58 = vunpack.c.h.bf16 %v5801_v37  ;;  %v3345_v61 = vld [vmem:[%s6250_s5 + $0x10] sm:$0xff]  }
 0x2af   : > { %2593 = vmatpush.msra.mxu1 %v2447_v15  ;;  %2666 = vmatpush.msrb.mxu0 %v2444_v4  ;;  %v2342_v15 = vmax.f32 %v5976_v45, 0.0  ;;  %v2303_v4 = vld [vmem:[#allocation2 + $0x10] sm:$0xff]  ;;  %v2340_v29 = vmax.f32 %v5985_v50, 0.0  ;;  %v2532_v54 = vunpack.c.h.bf16 %v5797_v56  ;;  %v2530_v37 = vunpack.c.h.bf16 %v5809_v49  ;;  %v3344_v50 = vld [vmem:[%s6250_s5 + $0x8] sm:$0xff]  }
 0x2b0   : > { %2594 = vmatmul.f32.vlgmr.msra.gmra.mxu1 %v2336_v5  ;;  %2725 = vmatpush.msrb.mxu2 %v2506_v12  ;;  %v2301_v12 = vld [vmem:[#allocation2 + $0x40] sm:$0xff]  ;;  %v6018_v56 = vadd.f32 %v5907_v46, %v2304_v23  ;;  %v2466_v18 = vunpack.c.h.bf16 %v5811_v6  ;;  %v2528_v49 = vunpack.c.h.bf16 %v5821_v63  ;;  %v2464_v6 = vunpack.c.h.bf16 %v5823_v59  ;;  %v6909_v63 = vld [vmem:[#allocation123_spill] sm:$0xff]  ;;  %v2308_v59 = vld [vmem:[#allocation2 + $0x28] sm:$0xff] }
 0x2b1   : > { %2694 = vmatpush.msrb.mxu1 %v2478_v35  ;;  %2753 = vmatpush.msrb.mxu3 %v2540_v13  ;;  %v6002_v35 = vadd.f32 %v5891_v24, %v2303_v4  ;;  %v2434_v13 = vunpack.c.h.bf16 %v5803_v9  ;;  %v6011_v40 = vadd.f32 %v5899_v26, %v2301_v12  ;;  %v2428_v4 = vunpack.c.h.bf16 %v6910_v28  ;;  %v6914_v23 = vld [vmem:[#allocation129_spill] sm:$0xff] }
 0x2b2   : > { %2667 = vmatpush.msrb.mxu0 %v2442_v8  ;;  %2726 = vmatpush.msrb.mxu2 %v2504_v25  ;;  %v2302_v8 = vld [vmem:[#allocation2 + $0x20] sm:$0xff]  ;;  %v2496_v25 = vunpack.c.h.bf16 %v5815_v21  ;;  %v3278_v20 = vunpack.c.l.bf16 %v3346_v44  ;;  %v3275_v45 = vunpack.c.h.bf16 %v3345_v61 }
 0x2b3   : > { %2695 = vmatpush.msrb.mxu1 %v2476_v10  ;;  %2754 = vmatpush.msrb.mxu3 %v2538_v57  ;;  %v2345_v9 = vmax.f32 %v6002_v35, 0.0  ;;  %v2494_v10 = vunpack.c.h.bf16 %v5827_v55  ;;  %v6025_v57 = vadd.f32 %v5931_v2, %v2302_v8  ;;  %v2343_v21 = vmax.f32 %v6011_v40, 0.0  ;;  %v6916_v8 = vld [vmem:[#allocation132_spill] sm:$0xff] }
 0x2b4   : > { %2626 = vmatmul.f32.gmra.mxu2 %v2341_v11  ;;  %2668 = vmatpush.msrb.mxu0 %v2440_v51  ;;  %v2346_v51 = vmax.f32 %v6018_v56, 0.0  ;;  %v2492_v55 = vunpack.c.h.bf16 %v5839_v27  ;;  %v6912_v27 = vld [vmem:[#allocation128_spill] sm:$0xff] }
 0x2b5   : > { %2696 = vmatpush.msrb.mxu1 %v2474_v41  ;;  %2727 = vmatpush.msrb.mxu2 %v2502_v30  ;;  %v2307_v41 = vld [vmem:[#allocation2 + $0x78] sm:$0xff]  ;;  %v2526_v30 = vunpack.c.h.bf16 %v6909_v63  ;;  %v2490_v12 = vunpack.c.h.bf16 %v6912_v27 }
 0x2b6   : > { %2755 = vmatpush.msrb.mxu3 %v2536_v62  ;;  %2568 = vmatmul.f32.gmra.mxu0 %v2339_v36  ;;  %v2344_v62 = vmax.f32 %v6025_v57, 0.0  ;;  %v3358_v56 = vld [vmem:[%s6250_s5 + $0x78] sm:$0xff]  }
 0x2b7   : > { %2655 = vmatmul.f32.gmra.mxu3 %v2342_v15  ;;  %2669 = vmatpush.msrb.mxu0 %v2438_v33  ;;  %v2305_v33 = vld [vmem:[#allocation2 + $0x60] sm:$0xff]  ;;  %v3326_v57 = vunpack.c.l.bf16 %v3358_v56 }
 0x2b8   : > { %2697 = vmatpush.msrb.mxu1 %v2472_v31  ;;  %2728 = vmatpush.msrb.mxu2 %v2500_v7  ;;  %v6911_v31 = vld [vmem:[#allocation124_spill] sm:$0xff] }
 0x2b9   : > { %2756 = vmatpush.msrb.mxu3 %v2534_v53  ;;  %2597 = vmatmul.f32.gmra.mxu1 %v2340_v29  ;;  %v2462_v7 = vunpack.c.h.bf16 %v6911_v31  ;;  %v6042_v53 = vadd.f32 %v5891_v24, %v2307_v41  ;;  %v2306_v24 = vld [vmem:[#allocation2 + $0x70] sm:$0xff] }
 0x2ba   : > { %2670 = vmatpush.msrb.mxu0 %v2436_v43  ;;  %2698 = vmatpush.msrb.mxu1 %v2470_v42  ;;  %v6913_v43 = vld [vmem:[#allocation126_spill] sm:$0xff]  ;;  %v6065_v63 = vadd.f32 %v5931_v2, %v2306_v24  ;;  %v6924_v2 = vld [vmem:[#allocation140_spill] sm:$0xff]  ;;  %v2482_v24 = vunpack.c.h.bf16 %v5903_v22  ;;  %v2416_v22 = vunpack.c.h.bf16 %v5922_v48 }
 0x2bb   : > { %2729 = vmatpush.msrb.mxu2 %v2498_v58  ;;  %2757 = vmatpush.msrb.mxu3 %v2532_v54  ;;  %v2524_v42 = vunpack.c.h.bf16 %v6913_v43  ;;  %v2426_v58 = vunpack.c.h.bf16 %v6914_v23  ;;  %v6915_v54 = vld [vmem:[#allocation127_spill] sm:$0xff]  ;;  %v2484_v27 = vunpack.c.h.bf16 %v6924_v2  ;;  %v6926_v23 = vld [vmem:[#allocation141_spill] sm:$0xff] }
 0x2bc   : > { %2671 = vmatpush.msrb.mxu0 %v2434_v13  ;;  %2699 = vmatpush.msrb.mxu1 %v2468_v17  ;;  %v2460_v13 = vunpack.c.h.bf16 %v6915_v54  ;;  %v6051_v17 = vadd.f32 %v5899_v26, %v2305_v33  ;;  %v6919_v26 = vld [vmem:[#allocation131_spill] sm:$0xff] }
 0x2bd   : > { %2730 = vmatpush.msrb.mxu2 %v2496_v25  ;;  %2758 = vmatpush.msrb.mxu3 %v2530_v37  ;;  %v2488_v25 = vunpack.c.h.bf16 %v6916_v8  ;;  %v6917_v37 = vld [vmem:[#allocation130_spill] sm:$0xff]  ;;  %v2458_v41 = vunpack.c.h.bf16 %v6919_v26  ;;  %v6927_v54 = vld [vmem:[#allocation139_spill] sm:$0xff]  ;;  %v2480_v26 = vunpack.c.h.bf16 %v5917_v47  ;;  %v2448_v47 = vunpack.c.h.bf16 %v5944_v16 }
 0x2be   : > { %2629 = vmatmul.f32.gmra.mxu2 %v2345_v9  ;;  %2672 = vmatpush.msrb.mxu0 %v2432_v3  ;;  %v2522_v3 = vunpack.c.h.bf16 %v6917_v37  ;;  %v2347_v33 = vmax.f32 %v6051_v17, 0.0  ;;  %v6928_v8 = vld [vmem:[#allocation142_spill] sm:$0xff]  ;;  %v6929_v37 = vld [vmem:[#allocation144_spill] sm:$0xff] }
 0x2bf   : > { %2700 = vmatpush.msrb.mxu1 %v2466_v18  ;;  %2731 = vmatpush.msrb.mxu2 %v2494_v10  ;;  %v6058_v18 = vadd.f32 %v5907_v46, %v2308_v59  ;;  %v2349_v10 = vmax.f32 %v6042_v53, 0.0  ;;  %v3356_v53 = vld [vmem:[%s6250_s5 + $0x68] sm:$0xff]  }
 0x2c0   : > { %2759 = vmatpush.msrb.mxu3 %v2528_v49  ;;  %2571 = vmatmul.f32.gmra.mxu0 %v2343_v21  ;;  %v6918_v49 = vld [vmem:[#allocation133_spill] sm:$0xff]  ;;  %v3319_v17 = vunpack.c.h.bf16 %v3356_v53 }
 0x2c1   : > { %2658 = vmatmul.f32.gmra.mxu3 %v2346_v51  ;;  %2673 = vmatpush.msrb.mxu0 %v2430_v14  ;;  %v2424_v14 = vunpack.c.h.bf16 %v6918_v49  ;;  %v2350_v28 = vmax.f32 %v6058_v18, 0.0  ;;  %v6930_v49 = vld [vmem:[#allocation143_spill] sm:$0xff]  ;;  %v6160_v18 = vld [vmem:[#allocation10] sm:$0x3] }
 0x2c2   : > { %2701 = vmatpush.msrb.mxu1 %v2464_v6  ;;  %2732 = vmatpush.msrb.mxu2 %v2492_v55  ;;  %v6920_v6 = vld [vmem:[#allocation136_spill] sm:$0xff] }
 0x2c3   : > { %2760 = vmatpush.msrb.mxu3 %v2526_v30  ;;  %2600 = vmatmul.f32.gmra.mxu1 %v2344_v62  ;;  %v2486_v55 = vunpack.c.h.bf16 %v6920_v6  ;;  %v6921_v30 = vld [vmem:[#allocation134_spill] sm:$0xff]  ;;  %v2450_v6 = vunpack.c.h.bf16 %v5913_v39 }
 0x2c4   : > { %2674 = vmatpush.msrb.mxu0 %v2428_v4  ;;  %2702 = vmatpush.msrb.mxu1 %v2462_v7  ;;  %v2520_v46 = vunpack.c.h.bf16 %v6921_v30  ;;  %v6922_v4 = vld [vmem:[#allocation137_spill] sm:$0xff]  ;;  %v6923_v7 = vld [vmem:[#allocation135_spill] sm:$0xff] }
 0x2c5   : > { %2733 = vmatpush.msrb.mxu2 %v2490_v12  ;;  %2761 = vmatpush.msrb.mxu3 %v2524_v42  ;;  %v2422_v31 = vunpack.c.h.bf16 %v6922_v4  ;;  %v2456_v59 = vunpack.c.h.bf16 %v6923_v7  ;;  %v6925_v12 = vld [vmem:[#allocation138_spill] sm:$0xff]  ;;  %v2348_v42 = vmax.f32 %v6065_v63, 0.0  ;;  %v3350_v30 = vld [vmem:[%s6250_s5 + $0x38] sm:$0xff]   ;;  %v2545_v63 = vperm.slane %v6160_v18, 0 }
 0x2c6   : > { %2675 = vmatpush.msrb.mxu0 %v2426_v58  ;;  %2703 = vmatpush.msrb.mxu1 %v2460_v13  ;;  %v2518_v43 = vunpack.c.h.bf16 %v6925_v12  ;;  %v2420_v58 = vunpack.c.h.bf16 %v6926_v23  ;;  %v2454_v13 = vunpack.c.h.bf16 %v6927_v54  ;;  %v3294_v39 = vunpack.c.l.bf16 %v3350_v30  ;;  %v3354_v7 = vld [vmem:[%s6250_s5 + $0x58] sm:$0xff]  }
 0x2c7   : > { %2734 = vmatpush.msrb.mxu2 %v2488_v25  ;;  %2762 = vmatpush.msrb.mxu3 %v2522_v3  ;;  %v2516_v25 = vunpack.c.h.bf16 %v6928_v8  ;;  %v2418_v3 = vunpack.c.h.bf16 %v6929_v37 }
 0x2c8   : > { %2632 = vmatmul.f32.gmra.mxu2 %v2349_v10  ;;  %2676 = vmatpush.msrb.mxu0 %v2424_v14  ;;  %v2452_v14 = vunpack.c.h.bf16 %v6930_v49 }
 0x2c9   : > { %2704 = vmatpush.msrb.mxu1 %v2458_v41  ;;  %2735 = vmatpush.msrb.mxu2 %v2486_v55  ;;  %v2514_v41 = vunpack.c.h.bf16 %v5911_v32  ;;  %v2512_v55 = vunpack.c.h.bf16 %v5926_v60  ;;  %v3295_v32 = vunpack.c.h.bf16 %v3350_v30  ;;  %v3349_v60 = vld [vmem:[%s6250_s5 + $0x30] sm:$0xff]  }
 0x2ca   : > { %2763 = vmatpush.msrb.mxu3 %v2520_v46  ;;  %2574 = vmatmul.f32.gmra.mxu0 %v2347_v33  ;;  %v3291_v48 = vunpack.c.h.bf16 %v3349_v60  ;;  %v3290_v52 = vunpack.c.l.bf16 %v3349_v60  ;;  %v3355_v46 = vld [vmem:[%s6250_s5 + $0x60] sm:$0xff]  }
 0x2cb   : > { %2661 = vmatmul.f32.gmra.mxu3 %v2350_v28  ;;  %2677 = vmatpush.msrb.mxu0 %v2422_v31 }
 0x2cc   : > { %2705 = vmatpush.msrb.mxu1 %v2456_v59  ;;  %2736 = vmatpush.msrb.mxu2 %v2484_v27  ;;  %v3311_v59 = vunpack.c.h.bf16 %v3354_v7  ;;  %v3310_v27 = vunpack.c.l.bf16 %v3354_v7 }
 0x2cd   : > { %2764 = vmatpush.msrb.mxu3 %v2518_v43  ;;  %2603 = vmatmul.f32.gmra.mxu1 %v2348_v42 }
 0x2ce   : > { %2678 = vmatpush.msrb.mxu0 %v2420_v58  ;;  %2706 = vmatpush.msrb.mxu1 %v2454_v13 }
 0x2cf   : > { %2737 = vmatpush.msrb.mxu2 %v2482_v24  ;;  %2765 = vmatpush.msrb.mxu3 %v2516_v25  ;;  %v3352_v25 = vld [vmem:[%s6250_s5 + $0x48] sm:$0xff]  }
 0x2d0   : > { %2679 = vmatpush.msrb.mxu0 %v2418_v3  ;;  %2707 = vmatpush.msrb.mxu1 %v2452_v14  ;;  %v3303_v49 = vunpack.c.h.bf16 %v3352_v25 }
 0x2d1   : > { %2738 = vmatpush.msrb.mxu2 %v2480_v26  ;;  %2766 = vmatpush.msrb.mxu3 %v2514_v41  ;;  %v3302_v26 = vunpack.c.l.bf16 %v3352_v25 }
 0x2d2   : > { %2680 = vmatpush.msrb.mxu0 %v2416_v22  ;;  %2708 = vmatpush.msrb.mxu1 %v2450_v6  ;;  %v3351_v6 = vld [vmem:[%s6250_s5 + $0x40] sm:$0xff]  }
 0x2d3   : > { %2739 = vmatmul.f32.vlgmr.msrb.gmra.mxu2 %v2337_v1  ;;  %2767 = vmatpush.msrb.mxu3 %v2512_v55  ;;  %v3347_v1 = vld [vmem:[%s6250_s5 + $0x20] sm:$0xff]   ;;  %v3299_v55 = vunpack.c.h.bf16 %v3351_v6 }
 0x2d4   : > { %2681 = vmatmul.f32.vlgmr.msrb.gmra.mxu0 %v2335_v0  ;;  %2709 = vmatpush.msrb.mxu1 %v2448_v47  ;;  %v3286_v0 = vunpack.c.l.bf16 %v3348_v38  ;;  %v3283_v16 = vunpack.c.h.bf16 %v3347_v1 }
 0x2d5   : > { %2768 = vmatmul.f32.vlgmr.msrb.gmra.mxu3 %v2338_v34  ;;  %2710 = vmatmul.f32.vlgmr.msrb.gmra.mxu1 %v2336_v5  ;;  %v3282_v34 = vunpack.c.l.bf16 %v3347_v1  ;;  %v3279_v5 = vunpack.c.h.bf16 %v3346_v44 }
 0x2d6   : > { %2857 = vmatpush.msra.mxu0 %v3295_v32  ;;  %3362 = vmatpush.msra.mxu3 %v3295_v32  ;;  %v3298_v32 = vunpack.c.l.bf16 %v3351_v6 }
 0x2d8   : > { %2858 = vmatpush.msra.mxu0 %v3294_v39  ;;  %3363 = vmatpush.msra.mxu3 %v3294_v39 }
 0x2da   : > { %2859 = vmatpush.msra.mxu0 %v3291_v48  ;;  %3364 = vmatpush.msra.mxu3 %v3291_v48 }
 0x2db   : > { %2742 = vmatmul.f32.gmra.mxu2 %v2341_v11  ;;  %v3274_v11 = vunpack.c.l.bf16 %v3345_v61 }
 0x2dc   : > { %2684 = vmatmul.f32.gmra.mxu0 %v2339_v36  ;;  %3365 = vmatpush.msra.mxu3 %v3290_v52  ;;  %v3271_v36 = vunpack.c.h.bf16 %v3344_v50 }
 0x2dd   : > { %2771 = vmatmul.f32.gmra.mxu3 %v2342_v15  ;;  %2713 = vmatmul.f32.gmra.mxu1 %v2340_v29  ;;  %v3270_v15 = vunpack.c.l.bf16 %v3344_v50  ;;  %v3265_v29 = vld [vmem:[%s6250_s5] sm:$0xff]  }
 0x2de   : > { %2860 = vmatpush.msra.mxu0 %v3290_v52  ;;  %3366 = vmatpush.msra.mxu3 %v3287_v19  ;;  %v3267_v35 = vunpack.c.h.bf16 %v3265_v29  ;;  %v3266_v40 = vunpack.c.l.bf16 %v3265_v29 }
 0x2e0   : > { %2861 = vmatpush.msra.mxu0 %v3287_v19  ;;  %3367 = vmatpush.msra.mxu3 %v3286_v0 }
 0x2e2   : > { %2862 = vmatpush.msra.mxu0 %v3286_v0  ;;  %3368 = vmatpush.msra.mxu3 %v3283_v16 }
 0x2e3   : > { %2745 = vmatmul.f32.gmra.mxu2 %v2345_v9  ;;  %v3327_v9 = vunpack.c.h.bf16 %v3358_v56 }
 0x2e4   : > { %2687 = vmatmul.f32.gmra.mxu0 %v2343_v21  ;;  %3369 = vmatpush.msra.mxu3 %v3282_v34  ;;  %v3357_v21 = vld [vmem:[%s6250_s5 + $0x70] sm:$0xff]  }
 0x2e5   : > { %2774 = vmatmul.f32.gmra.mxu3 %v2346_v51  ;;  %2716 = vmatmul.f32.gmra.mxu1 %v2344_v62  ;;  %v3323_v51 = vunpack.c.h.bf16 %v3357_v21  ;;  %v3322_v62 = vunpack.c.l.bf16 %v3357_v21 }
 0x2e6   : > { %2863 = vmatpush.msra.mxu0 %v3283_v16  ;;  %3370 = vmatpush.msra.mxu3 %v3279_v5 }
 0x2e7   : > { %2886 = vmatpush.msra.mxu1 %v3327_v9 }
 0x2e8   : > { %2864 = vmatpush.msra.mxu0 %v3282_v34  ;;  %3371 = vmatpush.msra.mxu3 %v3278_v20 }
 0x2e9   : > { %2887 = vmatpush.msra.mxu1 %v3326_v57 }
 0x2ea   : > { %2865 = vmatpush.msra.mxu0 %v3279_v5  ;;  %3372 = vmatpush.msra.mxu3 %v3275_v45 }
 0x2eb   : > { %2748 = vmatmul.f32.gmra.mxu2 %v2349_v10  ;;  %2888 = vmatpush.msra.mxu1 %v3323_v51  ;;  %v3318_v10 = vunpack.c.l.bf16 %v3356_v53 }
 0x2ec   : > { %2690 = vmatmul.f32.gmra.mxu0 %v2347_v33  ;;  %3373 = vmatpush.msra.mxu3 %v3274_v11  ;;  %v3315_v33 = vunpack.c.h.bf16 %v3355_v46 }
 0x2ed   : > { %2777 = vmatmul.f32.gmra.mxu3 %v2350_v28  ;;  %2719 = vmatmul.f32.gmra.mxu1 %v2348_v42  ;;  %v3314_v28 = vunpack.c.l.bf16 %v3355_v46  ;;  %v3353_v42 = vld [vmem:[%s6250_s5 + $0x50] sm:$0xff]  }
 0x2ee   : > { %2866 = vmatpush.msra.mxu0 %v3278_v20  ;;  %3374 = vmatpush.msra.mxu3 %v3271_v36  ;;  %v3307_v54 = vunpack.c.h.bf16 %v3353_v42  ;;  %v3306_v24 = vunpack.c.l.bf16 %v3353_v42 }
 0x2ef   : > { %2889 = vmatpush.msra.mxu1 %v3322_v62 }
 0x2f0   : > { %2867 = vmatpush.msra.mxu0 %v3275_v45  ;;  %3375 = vmatpush.msra.mxu3 %v3270_v15 }
 0x2f1   : > { %2890 = vmatpush.msra.mxu1 %v3319_v17 }
 0x2f2   : > { %2868 = vmatpush.msra.mxu0 %v3274_v11  ;;  %3376 = vmatpush.msra.mxu3 %v3267_v35 }
 0x2f3   : > { %2891 = vmatpush.msra.mxu1 %v3318_v10 }
 0x2f4   : > { %2869 = vmatpush.msra.mxu0 %v3271_v36  ;;  %3377 = vmatpush.msra.mxu3 %v3266_v40 }
 0x2f5   : > { %2892 = vmatpush.msra.mxu1 %v3315_v33 }
 0x2f6   : > { %2870 = vmatpush.msra.mxu0 %v3270_v15  ;;  %v2546_v15 = vperm.slane %v6160_v18, 1 }
 0x2f7   : > { %2893 = vmatpush.msra.mxu1 %v3314_v28 }
 0x2f8   : > { %2871 = vmatpush.msra.mxu0 %v3267_v35 }
 0x2f9   : > { %2894 = vmatpush.msra.mxu1 %v3311_v59 }
 0x2fa   : > { %2872 = vmatpush.msra.mxu0 %v3266_v40 }
 0x2fb   : > { %2895 = vmatpush.msra.mxu1 %v3310_v27 }
 0x2fd   : > { %2896 = vmatpush.msra.mxu1 %v3307_v54 }
 0x2ff   : > { %2897 = vmatpush.msra.mxu1 %v3306_v24 }
 0x301   : > { %2898 = vmatpush.msra.mxu1 %v3303_v49 }
 0x303   : > { %2899 = vmatpush.msra.mxu1 %v3302_v26 }
 0x305   : > { %2900 = vmatpush.msra.mxu1 %v3299_v55 }
 0x307   : > { %2901 = vmatpush.msra.mxu1 %v3298_v32  ;;  %v3359_v32 = vld [vmem:[%s6252_s7 + $0x8] sm:$0xff]  }
 0x329   : > { %v2566_v4 = vpop.f32.mrf.mxu0 }
 0x32a   : > { %v2567_v31 = vadd.f32 %v2566_v4, %v2545_v63 }
 0x32d   : > { %v2595_v2 = vpop.f32.mrf.mxu1 }
 0x32e   : > { %v2596_v12 = vadd.f32 %v2595_v2, %v2567_v31  ;;  %v2624_v43 = vpop.f32.mrf.mxu2 }
 0x330   : > { %v2625_v23 = vadd.f32 %v2624_v43, %v2596_v12  ;;  %v2653_v58 = vpop.f32.mrf.mxu3 }
 0x332   : > { %v2654_v13 = vadd.f32 %v2653_v58, %v2625_v23 }
 0x333   : > { %v2569_v8 = vpop.f32.mrf.mxu0 }
 0x334   : > { %v2781_v37 = vmax.f32 %v2654_v13, 0.0  ;;  %v2570_v3 = vadd.f32 %v2569_v8, %v2545_v63 }
 0x336   : > { %v2598_v14 = vpop.f32.mrf.mxu1  ;;  %2873 = vmatmul.f32.vlgmr.msra.gmra.mxu0 %v2781_v37 }
 0x337   : > { %v2599_v41 = vadd.f32 %v2598_v14, %v2570_v3  ;;  %v2627_v22 = vpop.f32.mrf.mxu2 }
 0x339   : > { %v2628_v30 = vadd.f32 %v2627_v22, %v2599_v41  ;;  %v3361_v41 = vld [vmem:[%s6252_s7 + $0x18] sm:$0xff]   ;;  %v3360_v22 = vld [vmem:[%s6252_s7 + $0x10] sm:$0xff]  }
 0x33a   : > { %v2656_v47 = vpop.f32.mrf.mxu3  ;;  %v3343_v6 = vunpack.c.h.bf16 %v3361_v41  ;;  %v3342_v55 = vunpack.c.l.bf16 %v3361_v41 }
 0x33b   : > { %v2657_v60 = vadd.f32 %v2656_v47, %v2628_v30  ;;  %v3339_v30 = vunpack.c.h.bf16 %v3360_v22  ;;  %v3338_v47 = vunpack.c.l.bf16 %v3360_v22 }
 0x33c   : > { %2960 = vmatpush.msra.mxu2 %v3343_v6 }
 0x33d   : > { %v2783_v39 = vmax.f32 %v2657_v60, 0.0  ;;  %v2572_v48 = vpop.f32.mrf.mxu0  ;;  %v3335_v60 = vunpack.c.h.bf16 %v3359_v32 }
 0x33e   : > { %v2573_v38 = vadd.f32 %v2572_v48, %v2545_v63  ;;  %2961 = vmatpush.msra.mxu2 %v3342_v55  ;;  %v3329_v48 = vld [vmem:[%s6252_s7] sm:$0xff]  }
 0x33f   : > { %2876 = vmatmul.f32.vlgmr.msra.gmra.mxu3 %v2783_v39  ;;  %v3334_v39 = vunpack.c.l.bf16 %v3359_v32 }
 0x340   : > { %v2601_v52 = vpop.f32.mrf.mxu1  ;;  %2962 = vmatpush.msra.mxu2 %v3339_v30 }
 0x341   : > { %v2602_v19 = vadd.f32 %v2601_v52, %v2573_v38  ;;  %v2630_v1 = vpop.f32.mrf.mxu2  ;;  %v3331_v38 = vunpack.c.h.bf16 %v3329_v48  ;;  %v3330_v52 = vunpack.c.l.bf16 %v3329_v48 }
 0x342   : > { %2963 = vmatpush.msra.mxu2 %v3338_v47 }
 0x343   : > { %v2631_v0 = vadd.f32 %v2630_v1, %v2602_v19  ;;  %v3529_v19 = vld [vmem:[#allocation11] ss:$0 sm:$0xff] }
 0x344   : > { %v2659_v16 = vpop.f32.mrf.mxu3  ;;  %2964 = vmatpush.msra.mxu2 %v3335_v60 }
 0x345   : > { %v2660_v44 = vadd.f32 %v2659_v16, %v2631_v0 }
 0x346   : > { %2965 = vmatpush.msra.mxu2 %v3334_v39 }
 0x347   : > { %v2785_v34 = vmax.f32 %v2660_v44, 0.0  ;;  %v2575_v5 = vpop.f32.mrf.mxu0 }
 0x348   : > { %v2576_v20 = vadd.f32 %v2575_v5, %v2545_v63  ;;  %2966 = vmatpush.msra.mxu2 %v3331_v38 }
 0x349   : > { %2879 = vmatmul.f32.gmra.mxu3 %v2785_v34 }
 0x34a   : > { %v2604_v61 = vpop.f32.mrf.mxu1  ;;  %2967 = vmatpush.msra.mxu2 %v3330_v52 }
 0x34b   : > { %v2605_v45 = vadd.f32 %v2604_v61, %v2576_v20  ;;  %v2633_v11 = vpop.f32.mrf.mxu2 }
 0x34d   : > { %v2634_v50 = vadd.f32 %v2633_v11, %v2605_v45 }
 0x34e   : > { %v2662_v36 = vpop.f32.mrf.mxu3 }
 0x34f   : > { %v2663_v29 = vadd.f32 %v2662_v36, %v2634_v50 }
 0x351   : > { %v2787_v35 = vmax.f32 %v2663_v29, 0.0  ;;  %v2682_v40 = vpop.f32.mrf.mxu0 }
 0x352   : > { %v2683_v56 = vadd.f32 %v2682_v40, %v2546_v15  ;;  %v2711_v9 = vpop.f32.mrf.mxu1 }
 0x353   : > { %2882 = vmatmul.f32.gmra.mxu3 %v2787_v35 }
 0x354   : > { %v2712_v57 = vadd.f32 %v2711_v9, %v2683_v56 }
 0x356   : > { %v2740_v21 = vpop.f32.mrf.mxu2 }
 0x357   : > { %v2741_v51 = vadd.f32 %v2740_v21, %v2712_v57 }
 0x358   : > { %v2769_v62 = vpop.f32.mrf.mxu3 }
 0x359   : > { %v2770_v53 = vadd.f32 %v2769_v62, %v2741_v51  ;;  %v2685_v17 = vpop.f32.mrf.mxu0  ;;  %v3530_v51 = vld [vmem:[#allocation13] ss:$0 sm:$0xff] }
 0x35a   : > { %v2686_v10 = vadd.f32 %v2685_v17, %v2546_v15  ;;  %v2714_v63 = vpop.f32.mrf.mxu1 }
 0x35b   : > { %v2782_v46 = vmax.f32 %v2770_v53, 0.0 }
 0x35c   : > { %v2715_v33 = vadd.f32 %v2714_v63, %v2686_v10 }
 0x35d   : > { %2902 = vmatmul.f32.vlgmr.msra.gmra.mxu1 %v2782_v46 }
 0x35e   : > { %v2743_v28 = vpop.f32.mrf.mxu2 }
 0x35f   : > { %v2744_v4 = vadd.f32 %v2743_v28, %v2715_v33 }
 0x360   : > { %v2772_v18 = vpop.f32.mrf.mxu3 }
 0x361   : > { %v2773_v31 = vadd.f32 %v2772_v18, %v2744_v4  ;;  %v2688_v7 = vpop.f32.mrf.mxu0 }
 0x362   : > { %v2689_v59 = vadd.f32 %v2688_v7, %v2546_v15  ;;  %v2717_v2 = vpop.f32.mrf.mxu1 }
 0x363   : > { %v2784_v27 = vmax.f32 %v2773_v31, 0.0 }
 0x364   : > { %v2718_v12 = vadd.f32 %v2717_v2, %v2689_v59 }
 0x365   : > { %2905 = vmatmul.f32.gmra.mxu1 %v2784_v27 }
 0x366   : > { %v2746_v43 = vpop.f32.mrf.mxu2 }
 0x367   : > { %v2747_v42 = vadd.f32 %v2746_v43, %v2718_v12 }
 0x368   : > { %v2775_v23 = vpop.f32.mrf.mxu3 }
 0x369   : > { %v2776_v58 = vadd.f32 %v2775_v23, %v2747_v42  ;;  %v2691_v54 = vpop.f32.mrf.mxu0 }
 0x36a   : > { %v2692_v13 = vadd.f32 %v2691_v54, %v2546_v15  ;;  %v2720_v24 = vpop.f32.mrf.mxu1 }
 0x36b   : > { %v2786_v8 = vmax.f32 %v2776_v58, 0.0 }
 0x36c   : > { %v2721_v25 = vadd.f32 %v2720_v24, %v2692_v13 }
 0x36d   : > { %2908 = vmatmul.f32.gmra.mxu1 %v2786_v8 }
 0x36e   : > { %v2749_v37 = vpop.f32.mrf.mxu2 }
 0x36f   : > { %v2750_v3 = vadd.f32 %v2749_v37, %v2721_v25 }
 0x370   : > { %v2778_v49 = vpop.f32.mrf.mxu3 }
 0x371   : > { %v2779_v14 = vadd.f32 %v2778_v49, %v2750_v3 }
 0x373   : > { %v2788_v26 = vmax.f32 %v2779_v14, 0.0 }
 0x375   : > { %2911 = vmatmul.f32.gmra.mxu1 %v2788_v26 }
 0x3b3   : > { %v2874_v1 = vpop.f32.mrf.mxu0 }
 0x3b4   : > { %v2875_v0 = vadd.f32 %v3529_v19, %v2874_v1 }
 0x3c2   : > { %v2877_v16 = vpop.f32.mrf.mxu3 }
 0x3c3   : > { %v2878_v20 = vadd.f32 %v3529_v19, %v2877_v16 }
 0x3cc   : > { %v2880_v11 = vpop.f32.mrf.mxu3 }
 0x3cd   : > { %v2881_v36 = vadd.f32 %v3529_v19, %v2880_v11 }
 0x3d6   : > { %v2883_v40 = vpop.f32.mrf.mxu3 }
 0x3d7   : > { %v2884_v56 = vadd.f32 %v3529_v19, %v2883_v40 }
 0x3da   : > { %v2903_v44 = vpop.f32.mrf.mxu1 }
 0x3db   : > { %v2904_v34 = vadd.f32 %v2903_v44, %v2875_v0 }
 0x3dd   : > { %v2915_v5 = vmax.f32 %v2904_v34, 0.0 }
 0x3df   : > { %3253 = vmatmul.msk.f32.vlgmr.msra.gmra.mxu2 %vm2939_vm0, %v2915_v5 }
 0x3e2   : > { %v2906_v61 = vpop.f32.mrf.mxu1 }
 0x3e3   : > { %v2907_v45 = vadd.f32 %v2906_v61, %v2878_v20 }
 0x3e5   : > { %v2916_v50 = vmax.f32 %v2907_v45, 0.0 }
 0x3e7   : > { %3254 = vmatmul.msk.f32.gmra.mxu2 %vm2939_vm0, %v2916_v50 }
 0x3ea   : > { %v2909_v15 = vpop.f32.mrf.mxu1 }
 0x3eb   : > { %v2910_v29 = vadd.f32 %v2909_v15, %v2881_v36 }
 0x3ed   : > { %v2917_v35 = vmax.f32 %v2910_v29, 0.0 }
 0x3ef   : > { %3255 = vmatmul.msk.f32.gmra.mxu2 %vm2939_vm0, %v2917_v35 }
 0x3f2   : > { %v2912_v9 = vpop.f32.mrf.mxu1 }
 0x3f3   : > { %v2913_v57 = vadd.f32 %v2912_v9, %v2884_v56 }
 0x3f5   : > { %v2918_v21 = vmax.f32 %v2913_v57, 0.0 }
 0x3f7   : > { %3256 = vmatmul.msk.f32.gmra.mxu2 %vm2939_vm0, %v2918_v21 }
 0x462   : > { %v2969_v62 = vpop.f32.mrf.mxu2 }
 0x463   : > { %v2970_v53 = vadd.f32 %v3530_v51, %v2969_v62 }
 0x465   : > { %v2982_v17 = vsel %vm2981_vm1, %v2970_v53, -inf }
 0x466   : > { %2983 = vmax.xlane.f32.xlu0 %v2982_v17 }
 0x46a   : > { %v2972_v10 = vpop.f32.mrf.mxu2 }
 0x46b   : > { %v2973_v63 = vadd.f32 %v3530_v51, %v2972_v10 }
 0x46d   : > { %v2985_v46 = vsel %vm2981_vm1, %v2973_v63, -inf }
 0x46e   : > { %2986 = vmax.xlane.f32.xlu0 %v2985_v46 }
 0x472   : > { %v2975_v33 = vpop.f32.mrf.mxu2 }
 0x473   : > { %v2976_v28 = vadd.f32 %v3530_v51, %v2975_v33 }
 0x475   : > { %v2988_v4 = vsel %vm2981_vm1, %v2976_v28, -inf }
 0x476   : > { %2989 = vmax.xlane.f32.xlu1 %v2988_v4 }
 0x47a   : > { %v2978_v18 = vpop.f32.mrf.mxu2 }
 0x47b   : > { %v2979_v31 = vadd.f32 %v3530_v51, %v2978_v18 }
 0x47d   : > { %v2991_v7 = vsel %vm2981_vm1, %v2979_v31, -inf }
 0x47e   : > { %2992 = vmax.xlane.f32.xlu1 %v2991_v7 }
 0x4d9   : > { %v2984_v59 = vpop.xlane.xlu0 %2983 }
 0x4da   : > { %v2994_v2 = vsub.f32 %v2970_v53, %v2984_v59 }
 0x4dc   : > { %v2998_v27 = vmul.f32 1.442695, %v2994_v2 }
 0x4de   : > { %3531 = vpow2.f32 %v2998_v27 }
 0x4e1   : > { %v2987_v12 = vpop.xlane.xlu0 %2986 }
 0x4e2   : > { %v2995_v43 = vsub.f32 %v2973_v63, %v2987_v12 }
 0x4e4   : > { %v3532_v42 = vpop.eup %3531  ;;  %v3000_v23 = vmul.f32 1.442695, %v2995_v43 }
 0x4e5   : > { %v3006_v58 = vsel %vm2981_vm1, %v3532_v42, 0.0 }
 0x4e6   : > { %3533 = vpow2.f32 %v3000_v23  ;;  %3007 = vadd.xlane.f32.xlu2 %v3006_v58 }
 0x4e9   : > { %v2990_v54 = vpop.xlane.xlu1 %2989 }
 0x4ea   : > { %v2996_v13 = vsub.f32 %v2976_v28, %v2990_v54 }
 0x4ec   : > { %v3534_v24 = vpop.eup %3533  ;;  %v3002_v8 = vmul.f32 1.442695, %v2996_v13 }
 0x4ed   : > { %v3009_v25 = vsel %vm2981_vm1, %v3534_v24, 0.0 }
 0x4ee   : > { %3535 = vpow2.f32 %v3002_v8  ;;  %3010 = vadd.xlane.f32.xlu2 %v3009_v25 }
 0x4f1   : > { %v2993_v37 = vpop.xlane.xlu1 %2992 }
 0x4f2   : > { %v2997_v3 = vsub.f32 %v2979_v31, %v2993_v37 }
 0x4f4   : > { %v6201_v49 = vpop.eup %3535  ;;  %v3004_v14 = vmul.f32 1.442695, %v2997_v3 }
 0x4f5   : > { %v3012_v26 = vsel %vm2981_vm1, %v6201_v49, 0.0 }
 0x4f6   : > { %3537 = vpow2.f32 %v3004_v14  ;;  %3013 = vadd.xlane.f32.xlu0 %v3012_v26 }
 0x4fc   : > { %v6205_v41 = vpop.eup %3537 }
 0x4fd   : > { %v3015_v22 = vsel %vm2981_vm1, %v6205_v41, 0.0 }
 0x4fe   : > { %3016 = vadd.xlane.f32.xlu1 %v3015_v22 }
 0x559   : > { %v3008_v6 = vpop.xlane.xlu2 %3007 }
 0x55a   : > { %3539 = vrcp.f32 %v3008_v6  ;;  %v3029_v60 = vand.u32 2147483648, %v3008_v6  ;;  %v3027_v48 = vand.u32 2147483647, %v3008_v6  ;;  %vm3023_vm3 = vweird.f32 %v3008_v6 }
 0x55c   : > { %v3030_v19 = vor.u32 1.1754944e-38, %v3029_v60  ;;  %vm3028_vm5 = vcmp.eq.f32.partialorder %v3027_v48, 8.507059e+37 }
 0x560   : > { %v3540_v55 = vpop.eup %3539 }
 0x561   : > { %v3019_v30 = vmul.f32 %v3540_v55, %v3008_v6  ;;  %v3011_v47 = vpop.xlane.xlu2 %3010  ;;  %vm3024_vm2 = vweird.f32 %v3540_v55 }
 0x562   : > { %3541 = vrcp.f32 %v3011_v47  ;;  %vm3025_vm4 = vmor %vm3023_vm3, %vm3024_vm2  ;;  %v3043_v20 = vand.u32 2147483648, %v3011_v47  ;;  %v3041_v45 = vand.u32 2147483647, %v3011_v47  ;;  %vm3037_vm7 = vweird.f32 %v3011_v47 }
 0x563   : > { %v3020_v32 = vsub.f32 1.0, %v3019_v30 }
 0x564   : > { %v3044_v36 = vor.u32 1.1754944e-38, %v3043_v20  ;;  %vm3042_vm9 = vcmp.eq.f32.partialorder %v3041_v45, 8.507059e+37 }
 0x565   : > { %v3021_v39 = vmul.f32 %v3540_v55, %v3020_v32 }
 0x567   : > { %v3022_v38 = vadd.f32 %v3540_v55, %v3021_v39 }
 0x568   : > { %v3542_v52 = vpop.eup %3541 }
 0x569   : > { %v3026_v1 = vsel %vm3025_vm4, %v3540_v55, %v3022_v38  ;;  %v3033_v0 = vmul.f32 %v3542_v52, %v3011_v47  ;;  %v3014_v16 = vpop.xlane.xlu0 %3013  ;;  %vm3038_vm6 = vweird.f32 %v3542_v52 }
 0x56a   : > { %v3031_v44 = vsel %vm3028_vm5, %v3030_v19, %v3026_v1  ;;  %3543 = vrcp.f32 %v3014_v16  ;;  %vm3039_vm8 = vmor %vm3037_vm7, %vm3038_vm6  ;;  %v3057_v57 = vand.u32 2147483648, %v3014_v16  ;;  %v3055_v51 = vand.u32 2147483647, %v3014_v16 }
 0x56b   : > { %v3074_v34 = vmul.f32 %v3532_v42, %v3031_v44  ;;  %v3034_v5 = vsub.f32 1.0, %v3033_v0  ;;  %vm3051_vm11 = vweird.f32 %v3014_v16 }
 0x56c   : > { %v3058_v17 = vor.u32 1.1754944e-38, %v3057_v57  ;;  %vm3056_vm13 = vcmp.eq.f32.partialorder %v3055_v51, 8.507059e+37 }
 0x56d   : > { %3078 = vst.msk [vmem:[%s6254_s9] sm:$0xff] %vm2981_vm1, %v3074_v34  ;;  %v3035_v61 = vmul.f32 %v3542_v52, %v3034_v5 }
 0x56f   : > { %v3036_v11 = vadd.f32 %v3542_v52, %v3035_v61 }
 0x570   : > { %v3544_v50 = vpop.eup %3543 }
 0x571   : > { %v3040_v15 = vsel %vm3039_vm8, %v3542_v52, %v3036_v11  ;;  %v3047_v29 = vmul.f32 %v3544_v50, %v3014_v16  ;;  %v3017_v35 = vpop.xlane.xlu1 %3016  ;;  %vm3052_vm10 = vweird.f32 %v3544_v50 }
 0x572   : > { %v3045_v40 = vsel %vm3042_vm9, %v3044_v36, %v3040_v15  ;;  %3545 = vrcp.f32 %v3017_v35  ;;  %vm3053_vm12 = vmor %vm3051_vm11, %vm3052_vm10  ;;  %v3071_v4 = vand.u32 2147483648, %v3017_v35  ;;  %v3069_v31 = vand.u32 2147483647, %v3017_v35 }
 0x573   : > { %v3075_v56 = vmul.f32 %v3534_v24, %v3045_v40  ;;  %v3048_v9 = vsub.f32 1.0, %v3047_v29  ;;  %vm3065_vm15 = vweird.f32 %v3017_v35 }
 0x574   : > { %v3072_v59 = vor.u32 1.1754944e-38, %v3071_v4  ;;  %vm3070_vm2 = vcmp.eq.f32.partialorder %v3069_v31, 8.507059e+37 }
 0x575   : > { %3079 = vst.msk [vmem:[%s6254_s9 + $0x8] sm:$0xff] %vm2981_vm1, %v3075_v56  ;;  %v3049_v21 = vmul.f32 %v3544_v50, %v3048_v9 }
 0x577   : > { %v3050_v62 = vadd.f32 %v3544_v50, %v3049_v21 }
 0x578   : > { %v3546_v53 = vpop.eup %3545 }
 0x579   : > { %v3054_v10 = vsel %vm3053_vm12, %v3544_v50, %v3050_v62  ;;  %v3061_v63 = vmul.f32 %v3546_v53, %v3017_v35  ;;  %vm3066_vm14 = vweird.f32 %v3546_v53 }
 0x57a   : > { %v3059_v46 = vsel %vm3056_vm13, %v3058_v17, %v3054_v10  ;;  %vm3067_vm0 = vmor %vm3065_vm15, %vm3066_vm14 }
 0x57b   : > { %v3076_v33 = vmul.f32 %v6201_v49, %v3059_v46  ;;  %v3062_v28 = vsub.f32 1.0, %v3061_v63 }
 0x57d   : > { %3080 = vst.msk [vmem:[%s6254_s9 + $0x10] sm:$0xff] %vm2981_vm1, %v3076_v33  ;;  %v3063_v18 = vmul.f32 %v3546_v53, %v3062_v28 }
 0x57f   : > { %v3064_v7 = vadd.f32 %v3546_v53, %v3063_v18 }
 0x581   : > { %v3068_v2 = vsel %vm3067_vm0, %v3546_v53, %v3064_v7 }
 0x582   : > { %v3073_v27 = vsel %vm3070_vm2, %v3072_v59, %v3068_v2 }
 0x583   : > { %v3077_v12 = vmul.f32 %v6205_v41, %v3073_v27 }
 0x585   : > { %3081 = vst.msk [vmem:[%s6254_s9 + $0x18] sm:$0xff] %vm2981_vm1, %v3077_v12 }
 0x586 PF: > { %s27_s14 = sadd.s32 1, %s3823_s14   ;;  %s6931_s12 = sld [smem:[#allocation19_spill]] }
 0x587   : > { %p24_p3 = scmp.ge.s32.totalorder %s27_s14, 8   ;;  %s6932_s11 = sld [smem:[#allocation21_spill]] }
 0x588   : > { %s6933_s16 = sld [smem:[#allocation20_spill]]  ;;  %s6934_s30 = smov %s3807_s10 }
 0x58a   :  { %26 = sbr.rel (!%p24_p3) target bundleno = 15 (0xf), region = 137 }
 0x58c   : > { %s6935_s10 = smov %s6931_s12  ;;  %s6936_s12 = smov %s3819_s13 }
 0x58e   : > { %s6937_s13 = smov %s6933_s16 }
 0x58f   :  { %3104 = vsyncpa [#allocation4], 1 }
 0x590   :  { %3106 = vsyncpa [#allocation4 + $0x1], 1 }
 0x591   :  { %3107 = vsyncpa [#allocation6], 1 }
 0x592   :  { %3109 = vsyncpa [#allocation6 + $0x1], 1 }
 0x593   :  { %3110 = vsyncpa [#allocation9], 1 }
 0x594   :  { %3111 = vsyncpa [#allocation12], 1 }

</bundles_post_ra>
